<compile_context>
chip_gen: v6e
topology: v6e:2x2x1
jax: 0.10.0
libtpu: 0.0.40
codegen_flags: <defaults>
</compile_context>

<pallas_src>
import jax
import jax.numpy as jnp
from jax import lax
from jax.experimental import pallas as pl
from jax.experimental.pallas import tpu as pltpu

BN_EPS = 1e-5          # PyTorch BatchNorm2d default
NEG = -1e30            # "-inf" for max-pool padding (valid ReLU cells are >= 0)
CO_PAD = 128           # conv output channels padded 64 -> 128 (lane dense)
CU = 32                # space-to-depth channels (16) x 2 paired W taps
K_TOT = 4 * 2 * CU     # 4 H-taps * 2 paired-W-taps * 32 channels = 256


# ----------------------------- fused Pallas kernel ---------------------------

def _make_stem_kernel(SP, HC, WC_pad, Wp, Ho, Wo, n_strips):
    """conv(4x4/s1 over s2d) + BN + ReLU + maxpool(3x3/s2) for one row strip."""
    M = HC * WC_pad

    def kernel(x_ref, w_ref, scale_ref, bias_ref, o_ref, a_ref, y_ref):
        s = lax.rem(pl.program_id(0), n_strips)        # strip index inside image

        # ---- im2col into VMEM scratch: 8 dense 32-lane placements -----------
        for di in range(4):
            for q in range(2):
                t = 2 * di + q
                a_ref[:, :, 32 * t:32 * (t + 1)] = \
                    x_ref[di:di + HC, 2 * q:2 * q + WC_pad, :]

        # ---- single K=256 bf16 MXU matmul + folded BN + ReLU ----------------
        a = a_ref[...].reshape(M, K_TOT)
        acc = jnp.dot(a, w_ref[...], preferred_element_type=jnp.float32)
        y = jnp.maximum(acc * scale_ref[...] + bias_ref[...], 0.0)
        y_ref[...] = y.reshape(HC, WC_pad, CO_PAD)

        # ---- validity masking: targeted edge writes only --------------------
        neg_col = jnp.full((HC, 1, CO_PAD), NEG, jnp.float32)
        neg_row = jnp.full((1, WC_pad, CO_PAD), NEG, jnp.float32)
        y_ref[:, 0:1, :] = neg_col                     # conv col -1 (left pad)
        if Wo % 2 == 1:                                # conv col Wo is only ever
            y_ref[:, Wo + 1:Wo + 2, :] = neg_col       # read when Wo is odd

        @pl.when(s == 0)
        def _():                                       # conv row -1 (top pad)
            y_ref[0:1, :, :] = neg_row

        r_bad = Ho + 1 - 2 * SP * s                    # local index of conv row Ho
        @pl.when(jnp.logical_and(r_bad >= 0, r_bad < HC))
        def _():                                       # conv row Ho (bottom pad)
            y_ref[pl.ds(r_bad, 1), :, :] = neg_row

        # ---- fused 3x3 / stride-2 max-pool -----------------------------------
        # W direction: three stride-2 sublane loads, two vector maxes.
        wm = jnp.maximum(jnp.maximum(y_ref[:, pl.ds(0, Wp, stride=2), :],
                                     y_ref[:, pl.ds(1, Wp, stride=2), :]),
                         y_ref[:, pl.ds(2, Wp, stride=2), :])     # (HC, Wp, 128)
        # H direction: pairwise-max reshape trick (no strided value slicing).
        pa = wm[0:2 * SP].reshape(SP, 2, Wp, CO_PAD).max(axis=1)      # rows 2p,2p+1
        pb = wm[1:2 * SP + 1].reshape(SP, 2, Wp, CO_PAD).max(axis=1)  # rows 2p+1,2p+2
        o_ref[...] = jnp.maximum(pa, pb).astype(o_ref.dtype)          # single store

    return kernel


# --------------------------------- wrapper -----------------------------------

def thermal_module_forward(x_nchw, params, *, sp=8):
    """conv1(7x7/s2/p3) + BN(eval) + ReLU + maxpool(3x3/s2/p1); NCHW in / out."""
    w = params["conv1_w"]                      # (64, 3, 7, 7)  OIHW, like PyTorch
    gamma, beta = params["bn1_gamma"], params["bn1_beta"]
    mean, var = params["bn1_mean"], params["bn1_var"]

    N, Cin, H, W = x_nchw.shape
    Co = w.shape[0]
    assert Cin <= 4 and Co <= CO_PAD

    # output geometry (conv 7x7/s2/p3, maxpool 3x3/s2/p1)
    Ho = (H - 1) // 2 + 1
    Wo = (W - 1) // 2 + 1
    Hp = (Ho - 1) // 2 + 1
    Wp = (Wo - 1) // 2 + 1

    SP = max(1, min(sp, Hp))                   # pooled rows per strip
    n_strips = -(-Hp // SP)
    Hp_pad = n_strips * SP
    HC = 2 * SP + 1                            # conv rows computed per strip
    RS = 2 * SP + 4                            # s2d rows per strip (4-row halo)
    WC = 2 * Wp + 1                            # conv cols needed by the pool
    WC_pad = ((WC + 15) // 16) * 16            # multiple of 16, NOT power of two
    WS = WC_pad + 3                            # s2d cols
    WS_u = WC_pad + 2                          # s2d cols after x2 W-unfold
    Rtot = 2 * Hp_pad + 4                      # total s2d rows

    # -------------- XLA-side prep: bf16 from the start, O(input) work --------
    xb = jnp.transpose(x_nchw, (0, 2, 3, 1)).astype(jnp.bfloat16)
    xb = jnp.pad(xb, ((0, 0), (5, 2 * Rtot - 5 - H),
                      (5, 2 * WS - 5 - W), (0, 4 - Cin)))
    s2d = xb.reshape(N, Rtot, 2, WS, 2, 4)
    s2d = jnp.transpose(s2d, (0, 1, 3, 2, 4, 5)).reshape(N, Rtot, WS, 16)
    # pair adjacent W taps (x2 unfold): channel dim 16 -> 32
    u2 = jnp.concatenate([s2d[:, :, :WS_u, :], s2d[:, :, 1:WS_u + 1, :]], axis=-1)
    # per-strip slabs with the 4-row halo duplicated -> plain BlockSpec pipelining
    xin = jnp.stack([u2[:, 2 * SP * t: 2 * SP * t + RS] for t in range(n_strips)],
                    axis=1).reshape(N * n_strips, RS, WS_u, CU)

    # weights: 7x7/s2 conv -> 4x4/s1 conv over (paired-tap) s2d channels
    w8 = jnp.pad(w.astype(jnp.float32),
                 ((0, CO_PAD - Co), (0, 4 - Cin), (0, 1), (0, 1)))   # (128,4,8,8)
    w8 = w8.reshape(CO_PAD, 4, 4, 2, 2, 2, 2)        # (co, c, di, pi, q, p, pj)
    w8 = jnp.transpose(w8, (2, 4, 5, 3, 6, 1, 0))    # (di, q, p, pi, pj, c, co)
    w_mat = w8.reshape(K_TOT, CO_PAD).astype(jnp.bfloat16)

    inv_std = 1.0 / jnp.sqrt(var + BN_EPS)
    scale = jnp.pad((gamma * inv_std).astype(jnp.float32), (0, CO_PAD - Co))
    bias = jnp.pad((beta - mean * gamma * inv_std).astype(jnp.float32),
                   (0, CO_PAD - Co))
    scale = scale.reshape(1, CO_PAD)
    bias = bias.reshape(1, CO_PAD)

    # explicit VMEM budget (input block is lane-padded 32 -> 128 by Mosaic)
    vmem_need = (2 * RS * WS_u * 128 * 2           # input block, double buffered
                 + 2 * K_TOT * CO_PAD * 2          # weights
                 + 2 * SP * max(Wp, 16) * CO_PAD * 2   # output block, double buf
                 + HC * WC_pad * K_TOT * 2         # im2col scratch (bf16)
                 + HC * WC_pad * CO_PAD * 4)       # conv+BN+ReLU scratch (f32)
    vmem_limit = int(min(48 * 2 ** 20, max(16 * 2 ** 20, 2 * vmem_need)))

    kernel = _make_stem_kernel(SP, HC, WC_pad, Wp, Ho, Wo, n_strips)

    out = pl.pallas_call(
        kernel,
        out_shape=jax.ShapeDtypeStruct((N * n_strips, SP, Wp, CO_PAD),
                                       jnp.bfloat16),
        grid_spec=pltpu.PrefetchScalarGridSpec(
            num_scalar_prefetch=0,
            grid=(N * n_strips,),                  # flat "parallel" axis (v7x 2 TC)
            in_specs=[
                pl.BlockSpec((None, RS, WS_u, CU), lambda g: (g, 0, 0, 0)),
                pl.BlockSpec((K_TOT, CO_PAD), lambda g: (0, 0)),
                pl.BlockSpec((1, CO_PAD), lambda g: (0, 0)),
                pl.BlockSpec((1, CO_PAD), lambda g: (0, 0)),
            ],
            out_specs=pl.BlockSpec((None, SP, Wp, CO_PAD), lambda g: (g, 0, 0, 0)),
            scratch_shapes=[
                pltpu.VMEM((HC, WC_pad, K_TOT), jnp.bfloat16),   # im2col A
                pltpu.VMEM((HC, WC_pad, CO_PAD), jnp.float32),   # conv/BN/ReLU tile
            ],
        ),
        compiler_params=pltpu.CompilerParams(
            dimension_semantics=("parallel",),
            vmem_limit_bytes=vmem_limit),
    )(xin, w_mat, scale, bias)

    out = out.reshape(N, Hp_pad, Wp, CO_PAD)[:, :Hp, :, :Co]
    # TODO(synk): downstream ResNet blocks could consume NHWC / 128-padded
    #             channels directly; NCHW f32 is returned to match PyTorch.
    return jnp.transpose(out, (0, 3, 1, 2)).astype(jnp.float32)


# ------------------------------ reference & test -----------------------------

def init_params(key, cin=3, cout=64, k=7):
    k0, k1, k2, k3, k4 = jax.random.split(key, 5)
    return {
        "conv1_w": 0.05 * jax.random.normal(k0, (cout, cin, k, k), jnp.float32),
        "bn1_gamma": 1.0 + 0.1 * jax.random.normal(k1, (cout,), jnp.float32),
        "bn1_beta": 0.1 * jax.random.normal(k2, (cout,), jnp.float32),
        "bn1_mean": 0.1 * jax.random.normal(k3, (cout,), jnp.float32),
        "bn1_var": 0.5 + jax.random.uniform(k4, (cout,), jnp.float32),
    }


def reference_forward(x, params):
    w = params["conv1_w"]
    y = lax.conv_general_dilated(x.astype(jnp.float32), w, window_strides=(2, 2),
                                 padding=((3, 3), (3, 3)),
                                 dimension_numbers=("NCHW", "OIHW", "NCHW"))
    inv_std = 1.0 / jnp.sqrt(params["bn1_var"] + BN_EPS)
    scale = (params["bn1_gamma"] * inv_std)[None, :, None, None]
    bias = (params["bn1_beta"]
            - params["bn1_mean"] * params["bn1_gamma"] * inv_std)[None, :, None, None]
    y = jnp.maximum(y * scale + bias, 0.0)
    z = lax.reduce_window(y, -jnp.inf, lax.max, (1, 1, 3, 3), (1, 1, 2, 2),
                          ((0, 0), (0, 0), (1, 1), (1, 1)))
    return z


if __name__ == "__main__":
    key = jax.random.PRNGKey(0)
    kx1, kx2, kp = jax.random.split(key, 3)
    params = init_params(kp)

    fwd = jax.jit(thermal_module_forward)

    # stem-consistent small NCHW input
    x1 = jax.random.normal(kx1, (2, 3, 32, 32), jnp.float32)
    out1 = jax.block_until_ready(fwd(x1, params))
    assert out1.shape == (2, 64, 8, 8), out1.shape
    ref1 = jax.block_until_ready(reference_forward(x1, params))
    err1 = float(jnp.max(jnp.abs(out1 - ref1) - 0.05 * jnp.abs(ref1)))
    assert err1 < 0.05, f"mismatch vs reference (test 1): {err1}"

    # odd conv geometry + two strips: exercises every edge-masking path
    x2 = jax.random.normal(kx2, (1, 3, 62, 26), jnp.float32)
    out2 = jax.block_until_ready(fwd(x2, params))
    assert out2.shape == (1, 64, 16, 7), out2.shape
    ref2 = jax.block_until_ready(reference_forward(x2, params))
    err2 = float(jnp.max(jnp.abs(out2 - ref2) - 0.05 * jnp.abs(ref2)))
    assert err2 < 0.05, f"mismatch vs reference (test 2): {err2}"

    print("KERNEL_OK")
</pallas_src>

<mosaic_0001>
module attributes {stable_mosaic.version = 11 : i64} {
  func.func @kernel(%arg0: i32, %arg1: memref<1x20x34x32xbf16, #tpu.memory_space<vmem>>, %arg2: memref<256x128xbf16, #tpu.memory_space<vmem>>, %arg3: memref<1x128xf32, #tpu.memory_space<vmem>>, %arg4: memref<1x128xf32, #tpu.memory_space<vmem>>, %arg5: memref<1x8x8x128xbf16, #tpu.memory_space<vmem>>, %arg6: memref<17x32x256xbf16, #tpu.memory_space<vmem>>, %arg7: memref<17x32x128xf32, #tpu.memory_space<vmem>>) attributes {dimension_semantics = [#tpu.dimension_semantics<parallel>], iteration_bounds = array<i64: 2>, scalar_prefetch = 0 : i64, scratch_operands = 2 : i64, tpu.core_type = #tpu.core_type<tc>, window_params = [{transform_indices = @transform_0, window_bounds = array<i64: 1, 20, 34, 32>}, {pipeline_mode = #tpu.pipeline_mode<synchronous>, transform_indices = @transform_1, window_bounds = array<i64: 256, 128>}, {pipeline_mode = #tpu.pipeline_mode<synchronous>, transform_indices = @transform_2, window_bounds = array<i64: 1, 128>}, {pipeline_mode = #tpu.pipeline_mode<synchronous>, transform_indices = @transform_3, window_bounds = array<i64: 1, 128>}, {transform_indices = @transform_4, window_bounds = array<i64: 1, 8, 8, 128>}]} {
    %c1_i32 = arith.constant 1 : i32
    %0 = arith.remsi %arg0, %c1_i32 : i32
    %c0 = arith.constant 0 : index
    %c0_0 = arith.constant 0 : index
    %c0_1 = arith.constant 0 : index
    %c0_2 = arith.constant 0 : index
    %1 = vector.load %arg1[%c0, %c0_0, %c0_1, %c0_2] : memref<1x20x34x32xbf16, #tpu.memory_space<vmem>>, vector<1x17x32x32xbf16>
    %2 = vector.shape_cast %1 : vector<1x17x32x32xbf16> to vector<17x32x32xbf16>
    %c0_3 = arith.constant 0 : index
    %c0_4 = arith.constant 0 : index
    %c0_5 = arith.constant 0 : index
    %3 = vector.load %arg6[%c0_3, %c0_4, %c0_5] : memref<17x32x256xbf16, #tpu.memory_space<vmem>>, vector<17x32x32xbf16>
    tpu.vector_store %arg6[%c0_3, %c0_4, %c0_5], %2 {strides = array<i32>} : memref<17x32x256xbf16, #tpu.memory_space<vmem>>, vector<17x32x32xbf16>,
    %c0_6 = arith.constant 0 : index
    %c0_7 = arith.constant 0 : index
    %c2 = arith.constant 2 : index
    %c0_8 = arith.constant 0 : index
    %4 = vector.load %arg1[%c0_6, %c0_7, %c2, %c0_8] : memref<1x20x34x32xbf16, #tpu.memory_space<vmem>>, vector<1x17x32x32xbf16>
    %5 = vector.shape_cast %4 : vector<1x17x32x32xbf16> to vector<17x32x32xbf16>
    %c0_9 = arith.constant 0 : index
    %c0_10 = arith.constant 0 : index
    %c32 = arith.constant 32 : index
    %6 = vector.load %arg6[%c0_9, %c0_10, %c32] : memref<17x32x256xbf16, #tpu.memory_space<vmem>>, vector<17x32x32xbf16>
    tpu.vector_store %arg6[%c0_9, %c0_10, %c32], %5 {strides = array<i32>} : memref<17x32x256xbf16, #tpu.memory_space<vmem>>, vector<17x32x32xbf16>,
    %c0_11 = arith.constant 0 : index
    %c1 = arith.constant 1 : index
    %c0_12 = arith.constant 0 : index
    %c0_13 = arith.constant 0 : index
    %7 = vector.load %arg1[%c0_11, %c1, %c0_12, %c0_13] : memref<1x20x34x32xbf16, #tpu.memory_space<vmem>>, vector<1x17x32x32xbf16>
    %8 = vector.shape_cast %7 : vector<1x17x32x32xbf16> to vector<17x32x32xbf16>
    %c0_14 = arith.constant 0 : index
    %c0_15 = arith.constant 0 : index
    %c64 = arith.constant 64 : index
    %9 = vector.load %arg6[%c0_14, %c0_15, %c64] : memref<17x32x256xbf16, #tpu.memory_space<vmem>>, vector<17x32x32xbf16>
    tpu.vector_store %arg6[%c0_14, %c0_15, %c64], %8 {strides = array<i32>} : memref<17x32x256xbf16, #tpu.memory_space<vmem>>, vector<17x32x32xbf16>,
    %c0_16 = arith.constant 0 : index
    %c1_17 = arith.constant 1 : index
    %c2_18 = arith.constant 2 : index
    %c0_19 = arith.constant 0 : index
    %10 = vector.load %arg1[%c0_16, %c1_17, %c2_18, %c0_19] : memref<1x20x34x32xbf16, #tpu.memory_space<vmem>>, vector<1x17x32x32xbf16>
    %11 = vector.shape_cast %10 : vector<1x17x32x32xbf16> to vector<17x32x32xbf16>
    %c0_20 = arith.constant 0 : index
    %c0_21 = arith.constant 0 : index
    %c96 = arith.constant 96 : index
    %12 = vector.load %arg6[%c0_20, %c0_21, %c96] : memref<17x32x256xbf16, #tpu.memory_space<vmem>>, vector<17x32x32xbf16>
    tpu.vector_store %arg6[%c0_20, %c0_21, %c96], %11 {strides = array<i32>} : memref<17x32x256xbf16, #tpu.memory_space<vmem>>, vector<17x32x32xbf16>,
    %c0_22 = arith.constant 0 : index
    %c2_23 = arith.constant 2 : index
    %c0_24 = arith.constant 0 : index
    %c0_25 = arith.constant 0 : index
    %13 = vector.load %arg1[%c0_22, %c2_23, %c0_24, %c0_25] : memref<1x20x34x32xbf16, #tpu.memory_space<vmem>>, vector<1x17x32x32xbf16>
    %14 = vector.shape_cast %13 : vector<1x17x32x32xbf16> to vector<17x32x32xbf16>
    %c0_26 = arith.constant 0 : index
    %c0_27 = arith.constant 0 : index
    %c128 = arith.constant 128 : index
    %15 = vector.load %arg6[%c0_26, %c0_27, %c128] : memref<17x32x256xbf16, #tpu.memory_space<vmem>>, vector<17x32x32xbf16>
    tpu.vector_store %arg6[%c0_26, %c0_27, %c128], %14 {strides = array<i32>} : memref<17x32x256xbf16, #tpu.memory_space<vmem>>, vector<17x32x32xbf16>,
    %c0_28 = arith.constant 0 : index
    %c2_29 = arith.constant 2 : index
    %c2_30 = arith.constant 2 : index
    %c0_31 = arith.constant 0 : index
    %16 = vector.load %arg1[%c0_28, %c2_29, %c2_30, %c0_31] : memref<1x20x34x32xbf16, #tpu.memory_space<vmem>>, vector<1x17x32x32xbf16>
    %17 = vector.shape_cast %16 : vector<1x17x32x32xbf16> to vector<17x32x32xbf16>
    %c0_32 = arith.constant 0 : index
    %c0_33 = arith.constant 0 : index
    %c160 = arith.constant 160 : index
    %18 = vector.load %arg6[%c0_32, %c0_33, %c160] : memref<17x32x256xbf16, #tpu.memory_space<vmem>>, vector<17x32x32xbf16>
    tpu.vector_store %arg6[%c0_32, %c0_33, %c160], %17 {strides = array<i32>} : memref<17x32x256xbf16, #tpu.memory_space<vmem>>, vector<17x32x32xbf16>,
    %c0_34 = arith.constant 0 : index
    %c3 = arith.constant 3 : index
    %c0_35 = arith.constant 0 : index
    %c0_36 = arith.constant 0 : index
    %19 = vector.load %arg1[%c0_34, %c3, %c0_35, %c0_36] : memref<1x20x34x32xbf16, #tpu.memory_space<vmem>>, vector<1x17x32x32xbf16>
    %20 = vector.shape_cast %19 : vector<1x17x32x32xbf16> to vector<17x32x32xbf16>
    %c0_37 = arith.constant 0 : index
    %c0_38 = arith.constant 0 : index
    %c192 = arith.constant 192 : index
    %21 = vector.load %arg6[%c0_37, %c0_38, %c192] : memref<17x32x256xbf16, #tpu.memory_space<vmem>>, vector<17x32x32xbf16>
    tpu.vector_store %arg6[%c0_37, %c0_38, %c192], %20 {strides = array<i32>} : memref<17x32x256xbf16, #tpu.memory_space<vmem>>, vector<17x32x32xbf16>,
    %c0_39 = arith.constant 0 : index
    %c3_40 = arith.constant 3 : index
    %c2_41 = arith.constant 2 : index
    %c0_42 = arith.constant 0 : index
    %22 = vector.load %arg1[%c0_39, %c3_40, %c2_41, %c0_42] : memref<1x20x34x32xbf16, #tpu.memory_space<vmem>>, vector<1x17x32x32xbf16>
    %23 = vector.shape_cast %22 : vector<1x17x32x32xbf16> to vector<17x32x32xbf16>
    %c0_43 = arith.constant 0 : index
    %c0_44 = arith.constant 0 : index
    %c224 = arith.constant 224 : index
    %24 = vector.load %arg6[%c0_43, %c0_44, %c224] : memref<17x32x256xbf16, #tpu.memory_space<vmem>>, vector<17x32x32xbf16>
    tpu.vector_store %arg6[%c0_43, %c0_44, %c224], %23 {strides = array<i32>} : memref<17x32x256xbf16, #tpu.memory_space<vmem>>, vector<17x32x32xbf16>,
    %c0_45 = arith.constant 0 : index
    %c0_46 = arith.constant 0 : index
    %c0_47 = arith.constant 0 : index
    %25 = vector.load %arg6[%c0_45, %c0_46, %c0_47] : memref<17x32x256xbf16, #tpu.memory_space<vmem>>, vector<17x32x256xbf16>
    %26 = vector.shape_cast %25 : vector<17x32x256xbf16> to vector<544x256xbf16>
    %c0_48 = arith.constant 0 : index
    %c0_49 = arith.constant 0 : index
    %27 = vector.load %arg2[%c0_48, %c0_49] : memref<256x128xbf16, #tpu.memory_space<vmem>>, vector<256x128xbf16>
    %cst = arith.constant dense<0.000000e+00> : vector<544x128xf32>
    %28 = tpu.matmul %26, %27, %cst {dimension_numbers = #tpu.dot_dimension_numbers<[1], [0], [0], [1], [0, 0, 1, 1], [], []>} : vector<544x256xbf16>, vector<256x128xbf16>, vector<544x128xf32> -> vector<544x128xf32>
    %c0_50 = arith.constant 0 : index
    %c0_51 = arith.constant 0 : index
    %29 = vector.load %arg3[%c0_50, %c0_51] : memref<1x128xf32, #tpu.memory_space<vmem>>, vector<1x128xf32>
    %30 = vector.broadcast %29 : vector<1x128xf32> to vector<544x128xf32>
    %31 = arith.mulf %28, %30 : vector<544x128xf32>
    %c0_52 = arith.constant 0 : index
    %c0_53 = arith.constant 0 : index
    %32 = vector.load %arg4[%c0_52, %c0_53] : memref<1x128xf32, #tpu.memory_space<vmem>>, vector<1x128xf32>
    %33 = vector.broadcast %32 : vector<1x128xf32> to vector<544x128xf32>
    %34 = arith.addf %31, %33 : vector<544x128xf32>
    %cst_54 = arith.constant 0.000000e+00 : f32
    %35 = vector.broadcast %cst_54 : f32 to vector<544x128xf32>
    %36 = arith.maximumf %34, %35 : vector<544x128xf32>
    %37 = vector.shape_cast %36 : vector<544x128xf32> to vector<17x32x128xf32>
    %c0_55 = arith.constant 0 : index
    %c0_56 = arith.constant 0 : index
    %c0_57 = arith.constant 0 : index
    %38 = vector.load %arg7[%c0_55, %c0_56, %c0_57] : memref<17x32x128xf32, #tpu.memory_space<vmem>>, vector<17x32x128xf32>
    tpu.vector_store %arg7[%c0_55, %c0_56, %c0_57], %37 {strides = array<i32>} : memref<17x32x128xf32, #tpu.memory_space<vmem>>, vector<17x32x128xf32>,
    %cst_58 = arith.constant -1.000000e+30 : f32
    %39 = vector.broadcast %cst_58 : f32 to vector<17x1x128xf32>
    %cst_59 = arith.constant -1.000000e+30 : f32
    %40 = vector.broadcast %cst_59 : f32 to vector<1x32x128xf32>
    %c0_60 = arith.constant 0 : index
    %c0_61 = arith.constant 0 : index
    %c0_62 = arith.constant 0 : index
    %41 = vector.load %arg7[%c0_60, %c0_61, %c0_62] : memref<17x32x128xf32, #tpu.memory_space<vmem>>, vector<17x1x128xf32>
    tpu.vector_store %arg7[%c0_60, %c0_61, %c0_62], %39 {strides = array<i32>} : memref<17x32x128xf32, #tpu.memory_space<vmem>>, vector<17x1x128xf32>,
    %c0_i32 = arith.constant 0 : i32
    %42 = arith.cmpi eq, %0, %c0_i32 : i32
    %43 = arith.extui %42 : i1 to i32
    %c0_i32_63 = arith.constant 0 : i32
    %44 = arith.cmpi ne, %43, %c0_i32_63 : i32
    scf.if %44 {
      %c0_82 = arith.constant 0 : index
      %c0_83 = arith.constant 0 : index
      %c0_84 = arith.constant 0 : index
      %68 = vector.load %arg7[%c0_82, %c0_83, %c0_84] : memref<17x32x128xf32, #tpu.memory_space<vmem>>, vector<1x32x128xf32>
      tpu.vector_store %arg7[%c0_82, %c0_83, %c0_84], %40 {strides = array<i32>} : memref<17x32x128xf32, #tpu.memory_space<vmem>>, vector<1x32x128xf32>,
    } else {
    }
    %c16_i32 = arith.constant 16 : i32
    %45 = arith.muli %c16_i32, %0 : i32
    %c17_i32 = arith.constant 17 : i32
    %46 = arith.subi %c17_i32, %45 : i32
    %c0_i32_64 = arith.constant 0 : i32
    %47 = arith.cmpi sge, %46, %c0_i32_64 : i32
    %c17_i32_65 = arith.constant 17 : i32
    %48 = arith.cmpi slt, %46, %c17_i32_65 : i32
    %49 = arith.andi %47, %48 : i1
    %50 = arith.extui %49 : i1 to i32
    %c0_i32_66 = arith.constant 0 : i32
    %51 = arith.cmpi ne, %50, %c0_i32_66 : i32
    scf.if %51 {
      %68 = arith.index_cast %46 : i32 to index
      %c0_82 = arith.constant 0 : index
      %c0_83 = arith.constant 0 : index
      %69 = vector.load %arg7[%68, %c0_82, %c0_83] : memref<17x32x128xf32, #tpu.memory_space<vmem>>, vector<1x32x128xf32>
      tpu.vector_store %arg7[%68, %c0_82, %c0_83], %40 {strides = array<i32>} : memref<17x32x128xf32, #tpu.memory_space<vmem>>, vector<1x32x128xf32>,
    } else {
    }
    %c0_67 = arith.constant 0 : index
    %c0_68 = arith.constant 0 : index
    %c0_69 = arith.constant 0 : index
    %52 = tpu.strided_load %arg7[%c0_67, %c0_68, %c0_69] {strides = array<i32: 1, 2, 1>} : memref<17x32x128xf32, #tpu.memory_space<vmem>>, vector<17x8x128xf32>
    %c0_70 = arith.constant 0 : index
    %c1_71 = arith.constant 1 : index
    %c0_72 = arith.constant 0 : index
    %53 = tpu.strided_load %arg7[%c0_70, %c1_71, %c0_72] {strides = array<i32: 1, 2, 1>} : memref<17x32x128xf32, #tpu.memory_space<vmem>>, vector<17x8x128xf32>
    %54 = arith.maximumf %52, %53 : vector<17x8x128xf32>
    %c0_73 = arith.constant 0 : index
    %c2_74 = arith.constant 2 : index
    %c0_75 = arith.constant 0 : index
    %55 = tpu.strided_load %arg7[%c0_73, %c2_74, %c0_75] {strides = array<i32: 1, 2, 1>} : memref<17x32x128xf32, #tpu.memory_space<vmem>>, vector<17x8x128xf32>
    %56 = arith.maximumf %54, %55 : vector<17x8x128xf32>
    %57 = vector.extract_strided_slice %56 {offsets = [0, 0, 0], sizes = [16, 8, 128], strides = [1, 1, 1]} : vector<17x8x128xf32> to vector<16x8x128xf32>
    %58 = vector.shape_cast %57 : vector<16x8x128xf32> to vector<8x2x8x128xf32>
    %cst_76 = arith.constant dense<0xFF800000> : vector<8x8x128xf32>
    %59 = vector.multi_reduction <maximumf>, %58, %cst_76 [1] : vector<8x2x8x128xf32> to vector<8x8x128xf32>
    %60 = vector.extract_strided_slice %56 {offsets = [1, 0, 0], sizes = [16, 8, 128], strides = [1, 1, 1]} : vector<17x8x128xf32> to vector<16x8x128xf32>
    %61 = vector.shape_cast %60 : vector<16x8x128xf32> to vector<8x2x8x128xf32>
    %cst_77 = arith.constant dense<0xFF800000> : vector<8x8x128xf32>
    %62 = vector.multi_reduction <maximumf>, %61, %cst_77 [1] : vector<8x2x8x128xf32> to vector<8x8x128xf32>
    %63 = arith.maximumf %59, %62 : vector<8x8x128xf32>
    %64 = arith.truncf %63 : vector<8x8x128xf32> to vector<8x8x128xbf16>
    %c0_78 = arith.constant 0 : index
    %c0_79 = arith.constant 0 : index
    %c0_80 = arith.constant 0 : index
    %c0_81 = arith.constant 0 : index
    %65 = vector.load %arg5[%c0_78, %c0_79, %c0_80, %c0_81] : memref<1x8x8x128xbf16, #tpu.memory_space<vmem>>, vector<1x8x8x128xbf16>
    %66 = vector.shape_cast %65 : vector<1x8x8x128xbf16> to vector<8x8x128xbf16>
    %67 = vector.shape_cast %64 : vector<8x8x128xbf16> to vector<1x8x8x128xbf16>
    tpu.vector_store %arg5[%c0_78, %c0_79, %c0_80, %c0_81], %67 {strides = array<i32>} : memref<1x8x8x128xbf16, #tpu.memory_space<vmem>>, vector<1x8x8x128xbf16>,
    return
  }
  func.func @transform_0(%arg0: i32) -> (i32, i32, i32, i32) {
    %c0_i32 = arith.constant 0 : i32
    %c0_i32_0 = arith.constant 0 : i32
    %c0_i32_1 = arith.constant 0 : i32
    %c0_i32_2 = arith.constant 0 : i32
    return %arg0, %c0_i32, %c0_i32_0, %c0_i32_1 : i32, i32, i32, i32
  }
  func.func @transform_1(%arg0: i32) -> (i32, i32) {
    %c0_i32 = arith.constant 0 : i32
    %c0_i32_0 = arith.constant 0 : i32
    %c0_i32_1 = arith.constant 0 : i32
    return %c0_i32, %c0_i32_0 : i32, i32
  }
  func.func @transform_2(%arg0: i32) -> (i32, i32) {
    %c0_i32 = arith.constant 0 : i32
    %c0_i32_0 = arith.constant 0 : i32
    %c0_i32_1 = arith.constant 0 : i32
    return %c0_i32, %c0_i32_0 : i32, i32
  }
  func.func @transform_3(%arg0: i32) -> (i32, i32) {
    %c0_i32 = arith.constant 0 : i32
    %c0_i32_0 = arith.constant 0 : i32
    %c0_i32_1 = arith.constant 0 : i32
    return %c0_i32, %c0_i32_0 : i32, i32
  }
  func.func @transform_4(%arg0: i32) -> (i32, i32, i32, i32) {
    %c0_i32 = arith.constant 0 : i32
    %c0_i32_0 = arith.constant 0 : i32
    %c0_i32_1 = arith.constant 0 : i32
    %c0_i32_2 = arith.constant 0 : i32
    return %arg0, %c0_i32, %c0_i32_0, %c0_i32_1 : i32, i32, i32, i32
  }
}

</mosaic_0001>

<bundles_post_ra>
// kernel: thermal_module_forward.1
= control target key start
LH: loop header
LB: loop body
LE: loop exit
PB: predicated region body
PF: predicated region fallthrough
CT: control target
= control target key end

     0   :  { %s6149_s15 = smov 0   ;;  %s8778_s0 = inlined_call_operand.vmem [shape: bf16[2,20,34,32], index: 0, kind: input, shape index: {}]   ;;  %s8779_s1 = inlined_call_operand.vmem [shape: bf16[256,128], index: 1, kind: input, shape index: {}]   ;;  %s8780_s2 = inlined_call_operand.vmem [shape: f32[1,128], index: 2, kind: input, shape index: {}]   ;;  %s8781_s3 = inlined_call_operand.vmem [shape: f32[1,128], index: 3, kind: input, shape index: {}]   ;;  %s8782_s4 = inlined_call_operand.vmem [shape: bf16[2,8,8,128], index: 4, kind: output, shape index: {}]  }
   0x1 LB: > { %s5327_s16 = sadd.s32 4294967295, %s6117_s15   ;;  %p5331_p0 = scmp.ge.s32.totalorder %s6117_s15, 1  ;;  %s6117_s15 = sphi %s6149_s15, %s14_s15  }
   0x2   : > { %p162_p1 = scmp.lt.s32.totalorder %s6117_s15, 3 }
   0x4   : > { %p163_p2 = pnand %p5331_p0, %p162_p1 }
   0x5   : > { %p188_p3 = scmp.lt.s32.totalorder (!%p163_p2), %s5327_s16, 1  ;;  %s6119_s21 = smov (!%p163_p2), 32  }
   0x6   : > { %166 = sbr.rel (%p163_p2) target bundleno = 1173 (0x495), region = 36  ;;  %s6120_s22 = smov (!%p163_p2), 64  }
   0x7   : > { %s6121_s23 = smov (!%p163_p2), 96  }
   0xb   : > { %vm506_vm0 = vcmask 1042432   ;;  %vm507_vm1 = vcmask 1046532   ;;  %s8786_s16 = smov (!%p188_p3, %s5327_s16), 1  ;;  %vm267_vm3 = vcmask 257024   ;;  %vm934_vm4 = vcmask 519424  }
   0xc   : > { %s6006_s17 = smul.u32 400, %s8786_s16  ;;  %vm6160_vm2 = vmor %vm506_vm0, %vm507_vm1  ;;  %vm1344_vm5 = vcmask 781824   ;;  %vm2008_vm6 = vcmask 1044224   ;;  %s5950_s14 = sshll.u32 %s8786_s16, 5 }
   0xd   : > { %s8710_s19 = scalar_lea.vmem %s8782_s4, %s5950_s14 }
   0xe   : > { %s6167_s20 = scalar_lea.vmem %s8778_s0, %s6006_s17 }
   0xf   : > { %v336_v1 = vld [vmem:[%s6167_s20] sm:$0xe]  ;;  %v337_v2 = vld [vmem:[%s6167_s20 + $0x4] sm:$0xf]  ;;  %v338_v3 = vld [vmem:[%s6167_s20 + $0x8] sm:$0xf] }
  0x10   : > { %v5335_v4 = vrot.slane %v336_v1, 9  ;;  %v511_v5 = vrot.slane %v337_v2, 5  ;;  %v339_v6 = vld [vmem:[%s6167_s20 + $0xc] sm:$0xf]  ;;  %v514_v7 = vrot.slane %v338_v3, 5 }
  0x11   : > { %v517_v8 = vrot.slane %v339_v6, 5  ;;  %v341_v9 = vld [vmem:[%s6167_s20 + $0x14] sm:$0xe]  ;;  %v342_v10 = vld [vmem:[%s6167_s20 + $0x18] sm:$0xf] }
  0x12   : > { %v512_v11 = vsel %vm6160_vm2, %v5335_v4, %v511_v5  ;;  %v516_v12 = vrot.slane %v514_v7, 4  ;;  %v5336_v13 = vrot.slane %v341_v9, 9  ;;  %v524_v14 = vrot.slane %v342_v10, 5  ;;  %v340_v15 = vld [vmem:[%s6167_s20 + $0x10] sm:$0x1] }
  0x13   : > { %730 = vrot.lane.b32.xlu0 %v512_v11, %s6119_s21  ;;  %v519_v16 = vrot.slane %v517_v8, 4  ;;  %v520_v17 = vrot.slane %v340_v15, 5  ;;  %v343_v18 = vld [vmem:[%s6167_s20 + $0x1c] sm:$0xf]  ;;  %v513_v21 = vrot.slane %v511_v5, 4 }
  0x14   : > { %v518_v19 = vsel %vm6160_vm2, %v516_v12, %v517_v8  ;;  %v525_v20 = vsel %vm6160_vm2, %v5336_v13, %v524_v14  ;;  %v527_v22 = vrot.slane %v343_v18, 5  ;;  %v344_v23 = vld [vmem:[%s6167_s20 + $0x20] sm:$0xf]  ;;  %v526_v25 = vrot.slane %v524_v14, 4  ;;  %v345_v27 = vld [vmem:[%s6167_s20 + $0x24] sm:$0x1] }
  0x15   : > { %734 = vrot.lane.b32.xlu1 %v518_v19, %s6119_s21  ;;  %v521_v24 = vsel %vm6160_vm2, %v519_v16, %v520_v17  ;;  %v530_v26 = vrot.slane %v344_v23, 5  ;;  %v347_v28 = vld [vmem:[%s6167_s20 + $0x2c] sm:$0xf]  ;;  %v515_v29 = vsel %vm6160_vm2, %v513_v21, %v514_v7  ;;  %v346_v31 = vld [vmem:[%s6167_s20 + $0x28] sm:$0xe]  ;;  %v533_v35 = vrot.slane %v345_v27, 5 }
  0x16   : > { %v529_v30 = vrot.slane %v527_v22, 4  ;;  %v348_v32 = vld [vmem:[%s6167_s20 + $0x30] sm:$0xf]  ;;  %v528_v33 = vsel %vm6160_vm2, %v526_v25, %v527_v22  ;;  %v537_v36 = vrot.slane %v347_v28, 5  ;;  %v349_v37 = vld [vmem:[%s6167_s20 + $0x34] sm:$0xf] }
  0x17   : > { %738 = vrot.lane.b32.xlu0 %v525_v20, %s6119_s21  ;;  %v532_v34 = vrot.slane %v530_v26, 4  ;;  %v5337_v39 = vrot.slane %v346_v31, 9  ;;  %v540_v40 = vrot.slane %v348_v32, 5  ;;  %v543_v43 = vrot.slane %v349_v37, 5  ;;  %v350_v44 = vld [vmem:[%s6167_s20 + $0x38] sm:$0x1] }
  0x18   : > { %v531_v38 = vsel %vm6160_vm2, %v529_v30, %v530_v26  ;;  %v539_v42 = vrot.slane %v537_v36, 4  ;;  %v352_v45 = vld [vmem:[%s6167_s20 + $0x40] sm:$0xf]  ;;  %v351_v48 = vld [vmem:[%s6167_s20 + $0x3c] sm:$0xe]  ;;  %v546_v52 = vrot.slane %v350_v44, 5 }
  0x19   : > { %736 = vrot.lane.b32.xlu1 %v521_v24, %s6119_s21  ;;  %v534_v41 = vsel %vm6160_vm2, %v532_v34, %v533_v35  ;;  %v538_v46 = vsel %vm6160_vm2, %v5337_v39, %v537_v36  ;;  %v542_v47 = vrot.slane %v540_v40, 4  ;;  %v353_v49 = vld [vmem:[%s6167_s20 + $0x44] sm:$0xf]  ;;  %v545_v51 = vrot.slane %v543_v43, 4  ;;  %v354_v54 = vld [vmem:[%s6167_s20 + $0x48] sm:$0xf] }
  0x1a   : > { %v541_v50 = vsel %vm6160_vm2, %v539_v42, %v540_v40  ;;  %v550_v53 = vrot.slane %v352_v45, 5  ;;  %v5338_v56 = vrot.slane %v351_v48, 9  ;;  %v553_v57 = vrot.slane %v353_v49, 5  ;;  %v355_v61 = vld [vmem:[%s6167_s20 + $0x4c] sm:$0x1] }
  0x1b   : > { %732 = vrot.lane.b32.xlu0 %v515_v29, %s6119_s21  ;;  %v544_v55 = vsel %vm6160_vm2, %v542_v47, %v543_v43  ;;  %v547_v58 = vsel %vm6160_vm2, %v545_v51, %v546_v52  ;;  %v556_v60 = vrot.slane %v354_v54, 5  ;;  %v357_v62 = vld [vmem:[%s6167_s20 + $0x54] sm:$0xf]  ;;  %v356_v2 = vld [vmem:[%s6167_s20 + $0x50] sm:$0xe]  ;;  %v559_v6 = vrot.slane %v355_v61, 5 }
  0x1c   : > { %v552_v59 = vrot.slane %v550_v53, 4  ;;  %v551_v63 = vsel %vm6160_vm2, %v5338_v56, %v550_v53  ;;  %v555_v1 = vrot.slane %v553_v57, 4  ;;  %v358_v3 = vld [vmem:[%s6167_s20 + $0x58] sm:$0xf]  ;;  %v563_v7 = vrot.slane %v357_v62, 5 }
  0x1d   : > { %740 = vrot.lane.b32.xlu1 %v528_v33, %s6119_s21  ;;  %v558_v5 = vrot.slane %v556_v60, 4  ;;  %v359_v8 = vld [vmem:[%s6167_s20 + $0x5c] sm:$0xf]  ;;  %v5339_v10 = vrot.slane %v356_v2, 9  ;;  %v566_v11 = vrot.slane %v358_v3, 5 }
  0x1e   : > { %v554_v4 = vsel %vm6160_vm2, %v552_v59, %v553_v57  ;;  %v557_v9 = vsel %vm6160_vm2, %v555_v1, %v556_v60  ;;  %v565_v13 = vrot.slane %v563_v7, 4  ;;  %v569_v14 = vrot.slane %v359_v8, 5  ;;  %v360_v15 = vld [vmem:[%s6167_s20 + $0x60] sm:$0x1]  ;;  %v362_v16 = vld [vmem:[%s6167_s20 + $0x68] sm:$0xf] }
  0x1f   : > { %742 = vrot.lane.b32.xlu0 %v531_v38, %s6119_s21  ;;  %v560_v12 = vsel %vm6160_vm2, %v558_v5, %v559_v6  ;;  %v564_v17 = vsel %vm6160_vm2, %v5339_v10, %v563_v7  ;;  %v568_v18 = vrot.slane %v566_v11, 4  ;;  %v361_v19 = vld [vmem:[%s6167_s20 + $0x64] sm:$0xe]  ;;  %v363_v20 = vld [vmem:[%s6167_s20 + $0x6c] sm:$0xf]  ;;  %v572_v23 = vrot.slane %v360_v15, 5 }
  0x20   : > { %v567_v21 = vsel %vm6160_vm2, %v565_v13, %v566_v11  ;;  %v571_v22 = vrot.slane %v569_v14, 4  ;;  %v576_v24 = vrot.slane %v362_v16, 5  ;;  %v364_v25 = vld [vmem:[%s6167_s20 + $0x70] sm:$0xf]  ;;  %v5340_v27 = vrot.slane %v361_v19, 9 }
  0x21   : > { %744 = vrot.lane.b32.xlu1 %v534_v41, %s6119_s21  ;;  %v570_v26 = vsel %vm6160_vm2, %v568_v18, %v569_v14  ;;  %v579_v28 = vrot.slane %v363_v20, 5  ;;  %v582_v31 = vrot.slane %v364_v25, 5  ;;  %v365_v32 = vld [vmem:[%s6167_s20 + $0x74] sm:$0x1]  ;;  %v367_v33 = vld [vmem:[%s6167_s20 + $0x7c] sm:$0xf] }
  0x22   : > { %v573_v29 = vsel %vm6160_vm2, %v571_v22, %v572_v23  ;;  %v578_v30 = vrot.slane %v576_v24, 4  ;;  %v577_v34 = vsel %vm6160_vm2, %v5340_v27, %v576_v24  ;;  %v366_v36 = vld [vmem:[%s6167_s20 + $0x78] sm:$0xe]  ;;  %v368_v37 = vld [vmem:[%s6167_s20 + $0x80] sm:$0xf]  ;;  %v585_v40 = vrot.slane %v365_v32, 5 }
  0x23   : > { %746 = vrot.lane.b32.xlu0 %v538_v46, %s6119_s21  ;;  %v581_v35 = vrot.slane %v579_v28, 4  ;;  %v584_v39 = vrot.slane %v582_v31, 4  ;;  %v589_v41 = vrot.slane %v367_v33, 5  ;;  %v369_v42 = vld [vmem:[%s6167_s20 + $0x84] sm:$0xf]  ;;  %v5341_v44 = vrot.slane %v366_v36, 9 }
  0x24   : > { %v580_v38 = vsel %vm6160_vm2, %v578_v30, %v579_v28  ;;  %v592_v45 = vrot.slane %v368_v37, 5  ;;  %v595_v48 = vrot.slane %v369_v42, 5  ;;  %v199_v49 = vld [vmem:[%s6167_s20] sm:$0xf]  ;;  %v372_v51 = vld [vmem:[%s6167_s20 + $0x90] sm:$0xf] }
  0x25   : > { %748 = vrot.lane.b32.xlu1 %v541_v50, %s6119_s21  ;;  %v583_v43 = vsel %vm6160_vm2, %v581_v35, %v582_v31  ;;  %v586_v46 = vsel %vm6160_vm2, %v584_v39, %v585_v40  ;;  %v591_v47 = vrot.slane %v589_v41, 4  ;;  %v370_v50 = vld [vmem:[%s6167_s20 + $0x88] sm:$0x1]  ;;  %268 = vst.msk [vmem:[#allocation2] sm:$0xf] %vm267_vm3, %v199_v49  ;;  %v590_v53 = vsel %vm6160_vm2, %v5341_v44, %v589_v41 }
  0x26   : > { %v201_v52 = vld [vmem:[%s6167_s20 + $0x8] sm:$0xf]  ;;  %v594_v54 = vrot.slane %v592_v45, 4  ;;  %v371_v56 = vld [vmem:[%s6167_s20 + $0x8c] sm:$0xe]  ;;  %v597_v60 = vrot.slane %v595_v48, 4 }
  0x27   : > { %750 = vrot.lane.b32.xlu0 %v544_v55, %s6119_s21  ;;  %270 = vst.msk [vmem:[#allocation2 + $0x10] sm:$0xf] %vm267_vm3, %v201_v52  ;;  %v203_v55 = vld [vmem:[%s6167_s20 + $0x14] sm:$0xf]  ;;  %v593_v59 = vsel %vm6160_vm2, %v591_v47, %v592_v45  ;;  %v598_v61 = vrot.slane %v370_v50, 5  ;;  %v602_v62 = vrot.slane %v372_v51, 5 }
  0x28   : > { %v373_v57 = vld [vmem:[%s6167_s20 + $0x94] sm:$0xf]  ;;  %272 = vst.msk [vmem:[#allocation2 + $0x20] sm:$0xf] %vm267_vm3, %v203_v55  ;;  %v200_v1 = vld [vmem:[%s6167_s20 + $0x4] sm:$0xf]  ;;  %v596_v3 = vsel %vm6160_vm2, %v594_v54, %v595_v48 }
  0x29   : > { %752 = vrot.lane.b32.xlu1 %v547_v58, %s6119_s21  ;;  %v202_v58 = vld [vmem:[%s6167_s20 + $0xc] sm:$0xf]  ;;  %v204_v2 = vld [vmem:[%s6167_s20 + $0x18] sm:$0xf]  ;;  %v605_v5 = vrot.slane %v373_v57, 5  ;;  %v599_v8 = vsel %vm6160_vm2, %v597_v60, %v598_v61 }
  0x2a   : > { %271 = vst.msk [vmem:[#allocation2 + $0x18] sm:$0xf] %vm267_vm3, %v202_v58  ;;  %269 = vst.msk [vmem:[#allocation2 + $0x8] sm:$0xf] %vm267_vm3, %v200_v1  ;;  %v205_v6 = vld [vmem:[%s6167_s20 + $0x1c] sm:$0xf] }
  0x2b   : > { %754 = vrot.lane.b32.xlu0 %v551_v63, %s6119_s21  ;;  %v374_v63 = vld [vmem:[%s6167_s20 + $0x98] sm:$0xf]  ;;  %273 = vst.msk [vmem:[#allocation2 + $0x28] sm:$0xf] %vm267_vm3, %v204_v2  ;;  %274 = vst.msk [vmem:[#allocation2 + $0x30] sm:$0xf] %vm267_vm3, %v205_v6 }
  0x2c   : > { %v206_v7 = vld [vmem:[%s6167_s20 + $0x20] sm:$0xf]  ;;  %v608_v10 = vrot.slane %v374_v63, 5  ;;  %v375_v11 = vld [vmem:[%s6167_s20 + $0x9c] sm:$0x1]  ;;  %v607_v15 = vrot.slane %v605_v5, 4 }
  0x2d   : > { %756 = vrot.lane.b32.xlu1 %v554_v4, %s6119_s21  ;;  %v5342_v4 = vrot.slane %v371_v56, 9  ;;  %275 = vst.msk [vmem:[#allocation2 + $0x38] sm:$0xf] %vm267_vm3, %v206_v7  ;;  %v207_v13 = vld [vmem:[%s6167_s20 + $0x28] sm:$0xf]  ;;  %v611_v22 = vrot.slane %v375_v11, 5 }
  0x2e   : > { %v378_v16 = vld [vmem:[%s6167_s20 + $0xa8] sm:$0xf]  ;;  %276 = vst.msk [vmem:[#allocation2 + $0x40] sm:$0xf] %vm267_vm3, %v207_v13  ;;  %v376_v18 = vld [vmem:[%s6167_s20 + $0xa0] sm:$0xe]  ;;  %v609_v27 = vsel %vm6160_vm2, %v607_v15, %v608_v10 }
  0x2f   : > { %758 = vrot.lane.b32.xlu0 %v557_v9, %s6119_s21  ;;  %v604_v9 = vrot.slane %v602_v62, 4  ;;  %v603_v14 = vsel %vm6160_vm2, %v5342_v4, %v602_v62  ;;  %v209_v19 = vld [vmem:[%s6167_s20 + $0x30] sm:$0xf]  ;;  %v210_v24 = vld [vmem:[%s6167_s20 + $0x34] sm:$0xf]  ;;  %v618_v25 = vrot.slane %v378_v16, 5 }
  0x30   : > { %278 = vst.msk [vmem:[#allocation2 + $0x50] sm:$0xf] %vm267_vm3, %v209_v19  ;;  %279 = vst.msk [vmem:[#allocation2 + $0x58] sm:$0xf] %vm267_vm3, %v210_v24  ;;  %v5343_v28 = vrot.slane %v376_v18, 9 }
  0x31   : > { %760 = vrot.lane.b32.xlu1 %v560_v12, %s6119_s21  ;;  %v377_v12 = vld [vmem:[%s6167_s20 + $0xa4] sm:$0xf]  ;;  %v606_v20 = vsel %vm6160_vm2, %v604_v9, %v605_v5  ;;  %v212_v30 = vld [vmem:[%s6167_s20 + $0x40] sm:$0xf]  ;;  %v380_v31 = vld [vmem:[%s6167_s20 + $0xb0] sm:$0x1] }
  0x32   : > { %v615_v23 = vrot.slane %v377_v12, 5  ;;  %281 = vst.msk [vmem:[#allocation2 + $0x68] sm:$0xf] %vm267_vm3, %v212_v30  ;;  %v213_v32 = vld [vmem:[%s6167_s20 + $0x44] sm:$0xf]  ;;  %v620_v39 = vrot.slane %v618_v25, 4 }
  0x33   : > { %762 = vrot.lane.b32.xlu0 %v564_v17, %s6119_s21  ;;  %v208_v17 = vld [vmem:[%s6167_s20 + $0x2c] sm:$0xf]  ;;  %v214_v33 = vld [vmem:[%s6167_s20 + $0x48] sm:$0xf]  ;;  %v382_v37 = vld [vmem:[%s6167_s20 + $0xb8] sm:$0xf] }
  0x34   : > { %277 = vst.msk [vmem:[#allocation2 + $0x48] sm:$0xf] %vm267_vm3, %v208_v17  ;;  %v617_v35 = vrot.slane %v615_v23, 4  ;;  %282 = vst.msk [vmem:[#allocation2 + $0x70] sm:$0xf] %vm267_vm3, %v213_v32  ;;  %v616_v42 = vsel %vm6160_vm2, %v5343_v28, %v615_v23  ;;  %v624_v51 = vrot.slane %v380_v31, 5 }
  0x35   : > { %764 = vrot.lane.b32.xlu1 %v567_v21, %s6119_s21  ;;  %v610_v21 = vrot.slane %v608_v10, 4  ;;  %283 = vst.msk [vmem:[#allocation2 + $0x78] sm:$0xf] %vm267_vm3, %v214_v33  ;;  %v381_v40 = vld [vmem:[%s6167_s20 + $0xb4] sm:$0xe] }
  0x36   : > { %v216_v41 = vld [vmem:[%s6167_s20 + $0x54] sm:$0xf]  ;;  %v217_v44 = vld [vmem:[%s6167_s20 + $0x58] sm:$0xf]  ;;  %v218_v45 = vld [vmem:[%s6167_s20 + $0x5c] sm:$0xf]  ;;  %v619_v49 = vsel %vm6160_vm2, %v617_v35, %v618_v25 }
  0x37   : > { %766 = vrot.lane.b32.xlu0 %v570_v26, %s6119_s21  ;;  %v379_v26 = vld [vmem:[%s6167_s20 + $0xac] sm:$0xf]  ;;  %285 = vst.msk [vmem:[#allocation2 + $0x88] sm:$0xf] %vm267_vm3, %v216_v41  ;;  %286 = vst.msk [vmem:[#allocation2 + $0x90] sm:$0xf] %vm267_vm3, %v217_v44 }
  0x38   : > { %v621_v36 = vrot.slane %v379_v26, 5  ;;  %287 = vst.msk [vmem:[#allocation2 + $0x98] sm:$0xf] %vm267_vm3, %v218_v45  ;;  %v219_v47 = vld [vmem:[%s6167_s20 + $0x64] sm:$0xf]  ;;  %v5344_v57 = vrot.slane %v381_v40, 9 }
  0x39   : > { %768 = vrot.lane.b32.xlu1 %v573_v29, %s6119_s21  ;;  %v211_v29 = vld [vmem:[%s6167_s20 + $0x3c] sm:$0xf]  ;;  %v220_v48 = vld [vmem:[%s6167_s20 + $0x68] sm:$0xf]  ;;  %v384_v52 = vld [vmem:[%s6167_s20 + $0xc0] sm:$0xf] }
  0x3a   : > { %280 = vst.msk [vmem:[#allocation2 + $0x60] sm:$0xf] %vm267_vm3, %v211_v29  ;;  %v623_v50 = vrot.slane %v621_v36, 4  ;;  %288 = vst.msk [vmem:[#allocation2 + $0xa0] sm:$0xf] %vm267_vm3, %v219_v47  ;;  %v622_v56 = vsel %vm6160_vm2, %v620_v39, %v621_v36  ;;  %v634_v61 = vrot.slane %v384_v52, 5 }
  0x3b   : > { %770 = vrot.lane.b32.xlu0 %v577_v34, %s6119_s21  ;;  %v612_v34 = vsel %vm6160_vm2, %v610_v21, %v611_v22  ;;  %289 = vst.msk [vmem:[#allocation2 + $0xa8] sm:$0xf] %vm267_vm3, %v220_v48  ;;  %v222_v55 = vld [vmem:[%s6167_s20 + $0x70] sm:$0xf]  ;;  %v223_v58 = vld [vmem:[%s6167_s20 + $0x78] sm:$0xf] }
  0x3c   : > { %291 = vst.msk [vmem:[#allocation2 + $0xb8] sm:$0xf] %vm267_vm3, %v222_v55  ;;  %v385_v62 = vld [vmem:[%s6167_s20 + $0xc4] sm:$0x1]  ;;  %292 = vst.msk [vmem:[#allocation2 + $0xc0] sm:$0xf] %vm267_vm3, %v223_v58  ;;  %v625_v2 = vsel %vm6160_vm2, %v623_v50, %v624_v51 }
  0x3d   : > { %772 = vrot.lane.b32.xlu1 %v580_v38, %s6119_s21  ;;  %v215_v38 = vld [vmem:[%s6167_s20 + $0x50] sm:$0xf]  ;;  %v225_v63 = vld [vmem:[%s6167_s20 + $0x80] sm:$0xf]  ;;  %v226_v1 = vld [vmem:[%s6167_s20 + $0x84] sm:$0xf] }
  0x3e   : > { %284 = vst.msk [vmem:[#allocation2 + $0x80] sm:$0xf] %vm267_vm3, %v215_v38  ;;  %v387_v4 = vld [vmem:[%s6167_s20 + $0xcc] sm:$0xf]  ;;  %294 = vst.msk [vmem:[#allocation2 + $0xd0] sm:$0xf] %vm267_vm3, %v225_v63 }
  0x3f   : > { %774 = vrot.lane.b32.xlu0 %v583_v43, %s6119_s21  ;;  %v383_v43 = vld [vmem:[%s6167_s20 + $0xbc] sm:$0xf]  ;;  %295 = vst.msk [vmem:[#allocation2 + $0xd8] sm:$0xf] %vm267_vm3, %v226_v1  ;;  %v227_v5 = vld [vmem:[%s6167_s20 + $0x8c] sm:$0xf] }
  0x40   : > { %v631_v54 = vrot.slane %v383_v43, 5  ;;  %v6386_v7 = vld [vmem:[%s6167_s20 + $0xd0] sm:$0xf]  ;;  %296 = vst.msk [vmem:[#allocation2 + $0xe0] sm:$0xf] %vm267_vm3, %v227_v5  ;;  %v636_v16 = vrot.slane %v634_v61, 4 }
  0x41   : > { %776 = vrot.lane.b32.xlu1 %v586_v46, %s6119_s21  ;;  %v628_v46 = vrot.slane %v382_v37, 5  ;;  %v6393_v10 = vld [vmem:[%s6167_s20 + $0xd4] sm:$0xf]  ;;  %v230_v12 = vld [vmem:[%s6167_s20 + $0x98] sm:$0xf]  ;;  %v637_v17 = vrot.slane %v385_v62, 5 }
  0x42   : > { %v633_v6 = vrot.slane %v631_v54, 4  ;;  %v229_v11 = vld [vmem:[%s6167_s20 + $0x94] sm:$0xf]  ;;  %299 = vst.msk [vmem:[#allocation2 + $0xf8] sm:$0xf] %vm267_vm3, %v230_v12  ;;  %v641_v18 = vrot.slane %v387_v4, 5 }
  0x43   : > { %778 = vrot.lane.b32.xlu0 %v590_v53, %s6119_s21  ;;  %v221_v53 = vld [vmem:[%s6167_s20 + $0x6c] sm:$0xf]  ;;  %v630_v60 = vrot.slane %v628_v46, 4  ;;  %v629_v9 = vsel %vm6160_vm2, %v5344_v57, %v628_v46  ;;  %298 = vst.msk [vmem:[#allocation2 + $0xf0] sm:$0xf] %vm267_vm3, %v229_v11  ;;  %v644_v21 = vrot.slane %v6386_v7, 5  ;;  %v638_v31 = vsel %vm6160_vm2, %v636_v16, %v637_v17 }
  0x44   : > { %290 = vst.msk [vmem:[#allocation2 + $0xb0] sm:$0xf] %vm267_vm3, %v221_v53  ;;  %v231_v13 = vld [vmem:[%s6167_s20 + $0xa0] sm:$0xf]  ;;  %v233_v19 = vld [vmem:[%s6167_s20 + $0xa8] sm:$0xf]  ;;  %v635_v24 = vsel %vm6160_vm2, %v633_v6, %v634_v61 }
  0x45   : > { %780 = vrot.lane.b32.xlu1 %v593_v59, %s6119_s21  ;;  %v224_v59 = vld [vmem:[%s6167_s20 + $0x7c] sm:$0xf]  ;;  %v632_v15 = vsel %vm6160_vm2, %v630_v60, %v631_v54  ;;  %300 = vst.msk [vmem:[#allocation2 + $0x100] sm:$0xf] %vm267_vm3, %v231_v13  ;;  %v647_v22 = vrot.slane %v6393_v10, 5  ;;  %v643_v32 = vrot.slane %v641_v18, 4 }
  0x46   : > { %293 = vst.msk [vmem:[#allocation2 + $0xc8] sm:$0xf] %vm267_vm3, %v224_v59  ;;  %302 = vst.msk [vmem:[#allocation2 + $0x110] sm:$0xf] %vm267_vm3, %v233_v19  ;;  %v234_v23 = vld [vmem:[%s6167_s20 + $0xac] sm:$0xf] }
  0x47   : > { %782 = vrot.lane.b32.xlu0 %v596_v3, %s6119_s21  ;;  %v386_v3 = vld [vmem:[%s6167_s20 + $0xc8] sm:$0xe]  ;;  %v392_v25 = vld [vmem:[%s6167_s20 + $0xe0] sm:$0xf]  ;;  %303 = vst.msk [vmem:[#allocation2 + $0x118] sm:$0xf] %vm267_vm3, %v234_v23  ;;  %v645_v47 = vsel %vm6160_vm2, %v643_v32, %v644_v21 }
  0x48   : > { %v235_v26 = vld [vmem:[%s6167_s20 + $0xb4] sm:$0xf]  ;;  %v390_v28 = vld [vmem:[%s6167_s20 + $0xd8] sm:$0x1]  ;;  %v237_v29 = vld [vmem:[%s6167_s20 + $0xbc] sm:$0xf] }
  0x49   : > { %784 = vrot.lane.b32.xlu1 %v599_v8, %s6119_s21  ;;  %v228_v8 = vld [vmem:[%s6167_s20 + $0x90] sm:$0xf]  ;;  %304 = vst.msk [vmem:[#allocation2 + $0x120] sm:$0xf] %vm267_vm3, %v235_v26  ;;  %v238_v30 = vld [vmem:[%s6167_s20 + $0xc0] sm:$0xf] }
  0x4a   : > { %297 = vst.msk [vmem:[#allocation2 + $0xe8] sm:$0xf] %vm267_vm3, %v228_v8  ;;  %v391_v33 = vld [vmem:[%s6167_s20 + $0xdc] sm:$0xe]  ;;  %306 = vst.msk [vmem:[#allocation2 + $0x130] sm:$0xf] %vm267_vm3, %v237_v29 }
  0x4b   : > { %786 = vrot.lane.b32.xlu0 %v603_v14, %s6119_s21  ;;  %v232_v14 = vld [vmem:[%s6167_s20 + $0xa4] sm:$0xf]  ;;  %307 = vst.msk [vmem:[#allocation2 + $0x138] sm:$0xf] %vm267_vm3, %v238_v30  ;;  %v646_v35 = vrot.slane %v644_v21, 4  ;;  %v654_v36 = vrot.slane %v392_v25, 5 }
  0x4c   : > { %301 = vst.msk [vmem:[#allocation2 + $0x108] sm:$0xf] %vm267_vm3, %v232_v14  ;;  %v393_v37 = vld [vmem:[%s6167_s20 + $0xe4] sm:$0xf]  ;;  %v240_v38 = vld [vmem:[%s6167_s20 + $0xcc] sm:$0xf] }
  0x4d   : > { %788 = vrot.lane.b32.xlu1 %v606_v20, %s6119_s21  ;;  %v5345_v20 = vrot.slane %v386_v3, 9  ;;  %v394_v40 = vld [vmem:[%s6167_s20 + $0xe8] sm:$0xf]  ;;  %309 = vst.msk [vmem:[#allocation2 + $0x148] sm:$0xf] %vm267_vm3, %v240_v38  ;;  %v649_v43 = vrot.slane %v647_v22, 4  ;;  %v648_v55 = vsel %vm6160_vm2, %v646_v35, %v647_v22 }
  0x4e   : > { %v241_v41 = vld [vmem:[%s6167_s20 + $0xd0] sm:$0xf]  ;;  %v650_v44 = vrot.slane %v390_v28, 5  ;;  %v243_v45 = vld [vmem:[%s6167_s20 + $0xdc] sm:$0xf]  ;;  %v5346_v48 = vrot.slane %v391_v33, 9 }
  0x4f   : > { %790 = vrot.lane.b32.xlu0 %v609_v27, %s6119_s21  ;;  %v236_v27 = vld [vmem:[%s6167_s20 + $0xb8] sm:$0xf]  ;;  %v642_v39 = vsel %vm6160_vm2, %v5345_v20, %v641_v18  ;;  %310 = vst.msk [vmem:[#allocation2 + $0x150] sm:$0xf] %vm267_vm3, %v241_v41  ;;  %v244_v46 = vld [vmem:[%s6167_s20 + $0xe0] sm:$0xf] }
  0x50   : > { %305 = vst.msk [vmem:[#allocation2 + $0x128] sm:$0xf] %vm267_vm3, %v236_v27  ;;  %v395_v50 = vld [vmem:[%s6167_s20 + $0xec] sm:$0x1]  ;;  %312 = vst.msk [vmem:[#allocation2 + $0x160] sm:$0xf] %vm267_vm3, %v243_v45  ;;  %v651_v58 = vsel %vm6160_vm2, %v649_v43, %v650_v44  ;;  %v655_v1 = vsel %vm6160_vm2, %v5346_v48, %v654_v36 }
  0x51   : > { %792 = vrot.lane.b32.xlu1 %v612_v34, %s6119_s21  ;;  %v239_v34 = vld [vmem:[%s6167_s20 + $0xc8] sm:$0xf]  ;;  %313 = vst.msk [vmem:[#allocation2 + $0x168] sm:$0xf] %vm267_vm3, %v244_v46  ;;  %v245_v51 = vld [vmem:[%s6167_s20 + $0xe4] sm:$0xf] }
  0x52   : > { %308 = vst.msk [vmem:[#allocation2 + $0x140] sm:$0xf] %vm267_vm3, %v239_v34  ;;  %v656_v52 = vrot.slane %v654_v36, 4  ;;  %v660_v53 = vrot.slane %v394_v40, 5  ;;  %314 = vst.msk [vmem:[#allocation2 + $0x170] sm:$0xf] %vm267_vm3, %v245_v51 }
  0x53   : > { %794 = vrot.lane.b32.xlu0 %v616_v42, %s6119_s21  ;;  %v242_v42 = vld [vmem:[%s6167_s20 + $0xd4] sm:$0xf]  ;;  %v246_v54 = vld [vmem:[%s6167_s20 + $0xe8] sm:$0xf]  ;;  %v247_v57 = vld [vmem:[%s6167_s20 + $0xf0] sm:$0xf] }
  0x54   : > { %311 = vst.msk [vmem:[#allocation2 + $0x158] sm:$0xf] %vm267_vm3, %v242_v42  ;;  %315 = vst.msk [vmem:[#allocation2 + $0x178] sm:$0xf] %vm267_vm3, %v246_v54  ;;  %v663_v60 = vrot.slane %v395_v50, 5 }
  0x55   : > { %796 = vrot.lane.b32.xlu1 %v619_v49, %s6119_s21  ;;  %v657_v49 = vrot.slane %v393_v37, 5  ;;  %316 = vst.msk [vmem:[#allocation2 + $0x180] sm:$0xf] %vm267_vm3, %v247_v57  ;;  %v248_v61 = vld [vmem:[%s6167_s20 + $0xf4] sm:$0xf] }
  0x56   : > { %v396_v62 = vld [vmem:[%s6167_s20 + $0xf0] sm:$0xe]  ;;  %v398_v63 = vld [vmem:[%s6167_s20 + $0xf8] sm:$0xf]  ;;  %317 = vst.msk [vmem:[#allocation2 + $0x188] sm:$0xf] %vm267_vm3, %v248_v61 }
  0x57   : > { %798 = vrot.lane.b32.xlu0 %v622_v56, %s6119_s21  ;;  %v397_v56 = vld [vmem:[%s6167_s20 + $0xf4] sm:$0xf]  ;;  %v659_v59 = vrot.slane %v657_v49, 4  ;;  %v249_v4 = vld [vmem:[%s6167_s20 + $0xf8] sm:$0xf]  ;;  %v658_v5 = vsel %vm6160_vm2, %v656_v52, %v657_v49  ;;  %v670_v10 = vrot.slane %v398_v63, 5 }
  0x58   : > { %v667_v3 = vrot.slane %v397_v56, 5  ;;  %v399_v6 = vld [vmem:[%s6167_s20 + $0xfc] sm:$0xf]  ;;  %318 = vst.msk [vmem:[#allocation2 + $0x190] sm:$0xf] %vm267_vm3, %v249_v4 }
  0x59   : > { %800 = vrot.lane.b32.xlu1 %v625_v2, %s6119_s21  ;;  %v662_v2 = vrot.slane %v660_v53, 4  ;;  %v250_v7 = vld [vmem:[%s6167_s20 + $0xfc] sm:$0xf]  ;;  %v661_v8 = vsel %vm6160_vm2, %v659_v59, %v660_v53  ;;  %v251_v11 = vld [vmem:[%s6167_s20 + $0x104] sm:$0xf]  ;;  %v673_v14 = vrot.slane %v399_v6, 5 }
  0x5a   : > { %319 = vst.msk [vmem:[#allocation2 + $0x198] sm:$0xf] %vm267_vm3, %v250_v7  ;;  %v669_v13 = vrot.slane %v667_v3, 4  ;;  %320 = vst.msk [vmem:[#allocation2 + $0x1a0] sm:$0xf] %vm267_vm3, %v251_v11  ;;  %v672_v19 = vrot.slane %v670_v10, 4 }
  0x5b   : > { %802 = vrot.lane.b32.xlu0 %v629_v9, %s6119_s21  ;;  %v5347_v9 = vrot.slane %v396_v62, 9  ;;  %v664_v12 = vsel %vm6160_vm2, %v662_v2, %v663_v60  ;;  %v400_v16 = vld [vmem:[%s6167_s20 + $0x100] sm:$0x1]  ;;  %v402_v17 = vld [vmem:[%s6167_s20 + $0x108] sm:$0xf] }
  0x5c   : > { %v401_v20 = vld [vmem:[%s6167_s20 + $0x104] sm:$0xe]  ;;  %v403_v21 = vld [vmem:[%s6167_s20 + $0x10c] sm:$0xf]  ;;  %v671_v23 = vsel %vm6160_vm2, %v669_v13, %v670_v10  ;;  %v676_v25 = vrot.slane %v400_v16, 5  ;;  %v680_v26 = vrot.slane %v402_v17, 5  ;;  %v674_v29 = vsel %vm6160_vm2, %v672_v19, %v673_v14 }
  0x5d   : > { %804 = vrot.lane.b32.xlu1 %v632_v15, %s6119_s21  ;;  %v252_v15 = vld [vmem:[%s6167_s20 + $0x108] sm:$0xf]  ;;  %v668_v18 = vsel %vm6160_vm2, %v5347_v9, %v667_v3  ;;  %v253_v22 = vld [vmem:[%s6167_s20 + $0x10c] sm:$0xf]  ;;  %v254_v27 = vld [vmem:[%s6167_s20 + $0x110] sm:$0xf] }
  0x5e   : > { %321 = vst.msk [vmem:[#allocation2 + $0x1a8] sm:$0xf] %vm267_vm3, %v252_v15  ;;  %322 = vst.msk [vmem:[#allocation2 + $0x1b0] sm:$0xf] %vm267_vm3, %v253_v22  ;;  %v404_v28 = vld [vmem:[%s6167_s20 + $0x110] sm:$0xf] }
  0x5f   : > { %806 = vrot.lane.b32.xlu0 %v635_v24, %s6119_s21  ;;  %v675_v24 = vrot.slane %v673_v14, 4  ;;  %323 = vst.msk [vmem:[#allocation2 + $0x1b8] sm:$0xf] %vm267_vm3, %v254_v27  ;;  %v5348_v30 = vrot.slane %v401_v20, 9  ;;  %v255_v32 = vld [vmem:[%s6167_s20 + $0x118] sm:$0xf] }
  0x60   : > { %v682_v34 = vrot.slane %v680_v26, 4  ;;  %v686_v35 = vrot.slane %v404_v28, 5  ;;  %324 = vst.msk [vmem:[#allocation2 + $0x1c0] sm:$0xf] %vm267_vm3, %v255_v32  ;;  %v256_v36 = vld [vmem:[%s6167_s20 + $0x11c] sm:$0xf] }
  0x61   : > { %808 = vrot.lane.b32.xlu1 %v638_v31, %s6119_s21  ;;  %v683_v31 = vrot.slane %v403_v21, 5  ;;  %v677_v33 = vsel %vm6160_vm2, %v675_v24, %v676_v25  ;;  %v405_v37 = vld [vmem:[%s6167_s20 + $0x114] sm:$0x1]  ;;  %v407_v38 = vld [vmem:[%s6167_s20 + $0x11c] sm:$0xf] }
  0x62   : > { %325 = vst.msk [vmem:[#allocation2 + $0x1c8] sm:$0xf] %vm267_vm3, %v256_v36  ;;  %v406_v41 = vld [vmem:[%s6167_s20 + $0x118] sm:$0xe]  ;;  %v408_v42 = vld [vmem:[%s6167_s20 + $0x120] sm:$0xf] }
  0x63   : > { %810 = vrot.lane.b32.xlu0 %v642_v39, %s6119_s21  ;;  %v681_v39 = vsel %vm6160_vm2, %v5348_v30, %v680_v26  ;;  %v685_v40 = vrot.slane %v683_v31, 4  ;;  %v257_v43 = vld [vmem:[%s6167_s20 + $0x120] sm:$0xf]  ;;  %v684_v44 = vsel %vm6160_vm2, %v682_v34, %v683_v31  ;;  %v688_v45 = vrot.slane %v686_v35, 4  ;;  %v258_v48 = vld [vmem:[%s6167_s20 + $0x124] sm:$0xf] }
  0x64   : > { %v689_v46 = vrot.slane %v405_v37, 5  ;;  %326 = vst.msk [vmem:[#allocation2 + $0x1d0] sm:$0xf] %vm267_vm3, %v257_v43  ;;  %v409_v49 = vld [vmem:[%s6167_s20 + $0x124] sm:$0xf]  ;;  %v5349_v51 = vrot.slane %v406_v41, 9 }
  0x65   : > { %812 = vrot.lane.b32.xlu1 %v645_v47, %s6119_s21  ;;  %v693_v47 = vrot.slane %v407_v38, 5  ;;  %327 = vst.msk [vmem:[#allocation2 + $0x1d8] sm:$0xf] %vm267_vm3, %v258_v48  ;;  %v687_v50 = vsel %vm6160_vm2, %v685_v40, %v686_v35  ;;  %v696_v52 = vrot.slane %v408_v42, 5  ;;  %v259_v53 = vld [vmem:[%s6167_s20 + $0x12c] sm:$0xf] }
  0x66   : > { %v690_v54 = vsel %vm6160_vm2, %v688_v45, %v689_v46  ;;  %v699_v56 = vrot.slane %v409_v49, 5  ;;  %328 = vst.msk [vmem:[#allocation2 + $0x1e0] sm:$0xf] %vm267_vm3, %v259_v53  ;;  %v260_v57 = vld [vmem:[%s6167_s20 + $0x130] sm:$0xf] }
  0x67   : > { %814 = vrot.lane.b32.xlu0 %v648_v55, %s6119_s21  ;;  %v695_v55 = vrot.slane %v693_v47, 4  ;;  %v412_v59 = vld [vmem:[%s6167_s20 + $0x130] sm:$0xf]  ;;  %329 = vst.msk [vmem:[#allocation2 + $0x1e8] sm:$0xf] %vm267_vm3, %v260_v57  ;;  %v694_v60 = vsel %vm6160_vm2, %v5349_v51, %v693_v47  ;;  %v698_v61 = vrot.slane %v696_v52, 4 }
  0x68   : > { %v411_v62 = vld [vmem:[%s6167_s20 + $0x12c] sm:$0xe]  ;;  %v413_v63 = vld [vmem:[%s6167_s20 + $0x134] sm:$0xf]  ;;  %v701_v3 = vrot.slane %v699_v56, 4 }
  0x69   : > { %816 = vrot.lane.b32.xlu1 %v651_v58, %s6119_s21  ;;  %v410_v58 = vld [vmem:[%s6167_s20 + $0x128] sm:$0x1]  ;;  %v697_v2 = vsel %vm6160_vm2, %v695_v55, %v696_v52  ;;  %v262_v6 = vld [vmem:[%s6167_s20 + $0x138] sm:$0xf]  ;;  %v5350_v9 = vrot.slane %v411_v62, 9  ;;  %v709_v10 = vrot.slane %v413_v63, 5 }
  0x6a   : > { %v702_v4 = vrot.slane %v410_v58, 5  ;;  %v414_v7 = vld [vmem:[%s6167_s20 + $0x138] sm:$0xf]  ;;  %331 = vst.msk [vmem:[#allocation2 + $0x1f8] sm:$0xf] %vm267_vm3, %v262_v6 }
  0x6b   : > { %818 = vrot.lane.b32.xlu0 %v655_v1, %s6119_s21  ;;  %v261_v1 = vld [vmem:[%s6167_s20 + $0x134] sm:$0xf]  ;;  %v712_v15 = vrot.slane %v414_v7, 5  ;;  %v264_v16 = vld [vmem:[%s6167_s20 + $0x144] sm:$0xf]  ;;  %v711_v21 = vrot.slane %v709_v10, 4 }
  0x6c   : > { %330 = vst.msk [vmem:[#allocation2 + $0x1f0] sm:$0xf] %vm267_vm3, %v261_v1  ;;  %v703_v13 = vsel %vm6160_vm2, %v701_v3, %v702_v4  ;;  %v417_v19 = vld [vmem:[%s6167_s20 + $0x144] sm:$0xf]  ;;  %333 = vst.msk [vmem:[#allocation2 + $0x208] sm:$0xf] %vm267_vm3, %v264_v16 }
  0x6d   : > { %820 = vrot.lane.b32.xlu1 %v658_v5, %s6119_s21  ;;  %v706_v5 = vrot.slane %v412_v59, 5  ;;  %v418_v24 = vld [vmem:[%s6167_s20 + $0x148] sm:$0xf]  ;;  %v714_v27 = vrot.slane %v712_v15, 4  ;;  %v266_v30 = vld [vmem:[%s6167_s20 + $0x14c] sm:$0xf] }
  0x6e   : > { %v265_v25 = vld [vmem:[%s6167_s20 + $0x148] sm:$0xf]  ;;  %v419_v32 = vld [vmem:[%s6167_s20 + $0x14c] sm:$0xf]  ;;  %335 = vst.msk [vmem:[#allocation2 + $0x218] sm:$0xf] %vm267_vm3, %v266_v30 }
  0x6f   : > { %822 = vrot.lane.b32.xlu0 %v661_v8, %s6119_s21  ;;  %v700_v8 = vsel %vm6160_vm2, %v698_v61, %v699_v56  ;;  %v708_v14 = vrot.slane %v706_v5, 4  ;;  %v707_v20 = vsel %vm6160_vm2, %v5350_v9, %v706_v5  ;;  %334 = vst.msk [vmem:[#allocation2 + $0x210] sm:$0xf] %vm267_vm3, %v265_v25  ;;  %v722_v35 = vrot.slane %v418_v24, 5  ;;  %v420_v41 = vld [vmem:[%s6167_s20 + $0x150] sm:$0x1] }
  0x70   : > { %v728_v47 = vrot.slane %v420_v41, 5  ;;  %v5352_v53 = vld [vmem:[%s6167_s20 + $0x14] sm:$0xf]  ;;  %v5353_v55 = vld [vmem:[%s6167_s20 + $0x18] sm:$0xf] }
  0x71   : > { %824 = vrot.lane.b32.xlu1 %v664_v12, %s6119_s21  ;;  %v263_v12 = vld [vmem:[%s6167_s20 + $0x140] sm:$0xf]  ;;  %v710_v26 = vsel %vm6160_vm2, %v708_v14, %v709_v10  ;;  %v724_v43 = vrot.slane %v722_v35, 4  ;;  %v5354_v57 = vld [vmem:[%s6167_s20 + $0x1c] sm:$0xf] }
  0x72   : > { %332 = vst.msk [vmem:[#allocation2 + $0x200] sm:$0xf] %vm267_vm3, %v263_v12  ;;  %v5355_v59 = vld [vmem:[%s6167_s20 + $0x20] sm:$0xf]  ;;  %v5356_v61 = vld [vmem:[%s6167_s20 + $0x28] sm:$0xf] }
  0x73   : > { %826 = vrot.lane.b32.xlu0 %v668_v18, %s6119_s21  ;;  %v415_v18 = vld [vmem:[%s6167_s20 + $0x13c] sm:$0x1]  ;;  %v5357_v63 = vld [vmem:[%s6167_s20 + $0x2c] sm:$0xf]  ;;  %v5359_v4 = vld [vmem:[%s6167_s20 + $0x34] sm:$0xf] }
  0x74   : > { %v715_v28 = vrot.slane %v415_v18, 5  ;;  %v5360_v6 = vld [vmem:[%s6167_s20 + $0x3c] sm:$0xf]  ;;  %v5362_v10 = vld [vmem:[%s6167_s20 + $0x44] sm:$0xf] }
  0x75   : > { %828 = vrot.lane.b32.xlu1 %v671_v23, %s6119_s21  ;;  %v416_v23 = vld [vmem:[%s6167_s20 + $0x140] sm:$0xe]  ;;  %v5363_v12 = vld [vmem:[%s6167_s20 + $0x48] sm:$0xf]  ;;  %v5364_v14 = vld [vmem:[%s6167_s20 + $0x50] sm:$0xf] }
  0x76   : > { %v5351_v34 = vrot.slane %v416_v23, 9  ;;  %v716_v37 = vsel %vm6160_vm2, %v714_v27, %v715_v28  ;;  %v5365_v16 = vld [vmem:[%s6167_s20 + $0x54] sm:$0xf]  ;;  %v5366_v18 = vld [vmem:[%s6167_s20 + $0x58] sm:$0xf] }
  0x77   : > { %830 = vrot.lane.b32.xlu0 %v674_v29, %s6119_s21  ;;  %v719_v29 = vrot.slane %v417_v19, 5  ;;  %v5369_v24 = vld [vmem:[%s6167_s20 + $0x68] sm:$0xf]  ;;  %v5371_v28 = vld [vmem:[%s6167_s20 + $0x70] sm:$0xf] }
  0x78   : > { %v5372_v30 = vld [vmem:[%s6167_s20 + $0x78] sm:$0xf] }
  0x79   : > { %832 = vrot.lane.b32.xlu1 %v677_v33, %s6119_s21  ;;  %v713_v33 = vsel %vm6160_vm2, %v711_v21, %v712_v15  ;;  %v721_v38 = vrot.slane %v719_v29, 4  ;;  %v720_v42 = vsel %vm6160_vm2, %v5351_v34, %v719_v29  ;;  %v5374_v34 = vld [vmem:[%s6167_s20 + $0x80] sm:$0xf] }
  0x7b   : > { %834 = vrot.lane.b32.xlu0 %v681_v39, %s6119_s21  ;;  %v725_v39 = vrot.slane %v419_v32, 5  ;;  %v723_v45 = vsel %vm6160_vm2, %v721_v38, %v722_v35  ;;  %v5373_v32 = vld [vmem:[%s6167_s20 + $0x7c] sm:$0xf]  ;;  %v5376_v38 = vld [vmem:[%s6167_s20 + $0x8c] sm:$0xf] }
  0x7d   : > { %836 = vrot.lane.b32.xlu1 %v684_v44, %s6119_s21  ;;  %v727_v46 = vrot.slane %v725_v39, 4  ;;  %v726_v49 = vsel %vm6160_vm2, %v724_v43, %v725_v39 }
  0x7f   : > { %838 = vrot.lane.b32.xlu0 %v687_v50, %s6119_s21  ;;  %v729_v51 = vsel %vm6160_vm2, %v727_v46, %v728_v47  ;;  %v5380_v46 = vld [vmem:[%s6167_s20 + $0xa0] sm:$0xf] }
  0x81   : > { %840 = vrot.lane.b32.xlu1 %v690_v54, %s6119_s21 }
  0x83   : > { %842 = vrot.lane.b32.xlu0 %v694_v60, %s6119_s21 }
  0x85   : > { %844 = vrot.lane.b32.xlu1 %v697_v2, %s6119_s21  ;;  %v731_v11 = vpop.permute.xlu0 %730  ;;  %v5358_v2 = vld [vmem:[%s6167_s20 + $0x30] sm:$0xf] }
  0x86   : > { %935 = vst.msk [vmem:[#allocation2] sm:$0xf] %vm934_vm4, %v731_v11 }
  0x87   : > { %v735_v17 = vpop.permute.xlu1 %734  ;;  %846 = vrot.lane.b32.xlu0 %v700_v8, %s6119_s21  ;;  %v5361_v8 = vld [vmem:[%s6167_s20 + $0x40] sm:$0xf] }
  0x88   : > { %937 = vst.msk [vmem:[#allocation2 + $0x10] sm:$0xf] %vm934_vm4, %v735_v17 }
  0x89   : > { %848 = vrot.lane.b32.xlu1 %v703_v13, %s6119_s21  ;;  %v739_v22 = vpop.permute.xlu0 %738 }
  0x8a   : > { %939 = vst.msk [vmem:[#allocation2 + $0x20] sm:$0xf] %vm934_vm4, %v739_v22  ;;  %v5368_v22 = vld [vmem:[%s6167_s20 + $0x64] sm:$0xf] }
  0x8b   : > { %v737_v31 = vpop.permute.xlu1 %736  ;;  %850 = vrot.lane.b32.xlu0 %v707_v20, %s6119_s21  ;;  %v5367_v20 = vld [vmem:[%s6167_s20 + $0x5c] sm:$0xf] }
  0x8c   : > { %938 = vst.msk [vmem:[#allocation2 + $0x18] sm:$0xf] %vm934_vm4, %v737_v31 }
  0x8d   : > { %852 = vrot.lane.b32.xlu1 %v710_v26, %s6119_s21  ;;  %v733_v36 = vpop.permute.xlu0 %732  ;;  %v5370_v26 = vld [vmem:[%s6167_s20 + $0x6c] sm:$0xf] }
  0x8e   : > { %936 = vst.msk [vmem:[#allocation2 + $0x8] sm:$0xf] %vm934_vm4, %v733_v36  ;;  %v5375_v36 = vld [vmem:[%s6167_s20 + $0x84] sm:$0xf] }
  0x8f   : > { %v741_v40 = vpop.permute.xlu1 %740  ;;  %854 = vrot.lane.b32.xlu0 %v713_v33, %s6119_s21 }
  0x90   : > { %940 = vst.msk [vmem:[#allocation2 + $0x28] sm:$0xf] %vm934_vm4, %v741_v40  ;;  %v5377_v40 = vld [vmem:[%s6167_s20 + $0x90] sm:$0xf] }
  0x91   : > { %856 = vrot.lane.b32.xlu1 %v716_v37, %s6119_s21  ;;  %v743_v44 = vpop.permute.xlu0 %742 }
  0x92   : > { %941 = vst.msk [vmem:[#allocation2 + $0x30] sm:$0xf] %vm934_vm4, %v743_v44  ;;  %v5379_v44 = vld [vmem:[%s6167_s20 + $0x98] sm:$0xf] }
  0x93   : > { %v745_v48 = vpop.permute.xlu1 %744  ;;  %858 = vrot.lane.b32.xlu0 %v720_v42, %s6119_s21  ;;  %v5378_v42 = vld [vmem:[%s6167_s20 + $0x94] sm:$0xf] }
  0x94   : > { %942 = vst.msk [vmem:[#allocation2 + $0x38] sm:$0xf] %vm934_vm4, %v745_v48  ;;  %v5381_v48 = vld [vmem:[%s6167_s20 + $0xa4] sm:$0xf] }
  0x95   : > { %860 = vrot.lane.b32.xlu1 %v723_v45, %s6119_s21  ;;  %v747_v50 = vpop.permute.xlu0 %746 }
  0x96   : > { %943 = vst.msk [vmem:[#allocation2 + $0x40] sm:$0xf] %vm934_vm4, %v747_v50  ;;  %v5382_v50 = vld [vmem:[%s6167_s20 + $0xa8] sm:$0xf] }
  0x97   : > { %v749_v52 = vpop.permute.xlu1 %748  ;;  %862 = vrot.lane.b32.xlu0 %v726_v49, %s6119_s21 }
  0x98   : > { %944 = vst.msk [vmem:[#allocation2 + $0x48] sm:$0xf] %vm934_vm4, %v749_v52  ;;  %v5383_v52 = vld [vmem:[%s6167_s20 + $0xac] sm:$0xf] }
  0x99   : > { %864 = vrot.lane.b32.xlu1 %v729_v51, %s6119_s21  ;;  %v751_v54 = vpop.permute.xlu0 %750 }
  0x9a   : > { %945 = vst.msk [vmem:[#allocation2 + $0x50] sm:$0xf] %vm934_vm4, %v751_v54  ;;  %v5384_v54 = vld [vmem:[%s6167_s20 + $0xb4] sm:$0xf] }
  0x9b   : > { %v753_v56 = vpop.permute.xlu1 %752  ;;  %1140 = vrot.lane.b32.xlu0 %v5352_v53, %s6120_s22 }
  0x9c   : > { %946 = vst.msk [vmem:[#allocation2 + $0x58] sm:$0xf] %vm934_vm4, %v753_v56  ;;  %v5385_v56 = vld [vmem:[%s6167_s20 + $0xb8] sm:$0xf] }
  0x9d   : > { %1142 = vrot.lane.b32.xlu1 %v5353_v55, %s6120_s22  ;;  %v755_v58 = vpop.permute.xlu0 %754 }
  0x9e   : > { %947 = vst.msk [vmem:[#allocation2 + $0x60] sm:$0xf] %vm934_vm4, %v755_v58  ;;  %v5386_v58 = vld [vmem:[%s6167_s20 + $0xbc] sm:$0xf] }
  0x9f   : > { %v757_v60 = vpop.permute.xlu1 %756  ;;  %1144 = vrot.lane.b32.xlu0 %v5354_v57, %s6120_s22 }
  0xa0   : > { %948 = vst.msk [vmem:[#allocation2 + $0x68] sm:$0xf] %vm934_vm4, %v757_v60  ;;  %v5387_v60 = vld [vmem:[%s6167_s20 + $0xc0] sm:$0xf] }
  0xa1   : > { %1146 = vrot.lane.b32.xlu1 %v5355_v59, %s6120_s22  ;;  %v759_v62 = vpop.permute.xlu0 %758 }
  0xa2   : > { %949 = vst.msk [vmem:[#allocation2 + $0x70] sm:$0xf] %vm934_vm4, %v759_v62  ;;  %v5388_v62 = vld [vmem:[%s6167_s20 + $0xc8] sm:$0xf] }
  0xa3   : > { %v761_v1 = vpop.permute.xlu1 %760  ;;  %1148 = vrot.lane.b32.xlu0 %v5356_v61, %s6120_s22 }
  0xa4   : > { %950 = vst.msk [vmem:[#allocation2 + $0x78] sm:$0xf] %vm934_vm4, %v761_v1  ;;  %v5389_v1 = vld [vmem:[%s6167_s20 + $0xcc] sm:$0xf] }
  0xa5   : > { %1150 = vrot.lane.b32.xlu1 %v5357_v63, %s6120_s22  ;;  %v763_v3 = vpop.permute.xlu0 %762 }
  0xa6   : > { %951 = vst.msk [vmem:[#allocation2 + $0x80] sm:$0xf] %vm934_vm4, %v763_v3  ;;  %v5390_v3 = vld [vmem:[%s6167_s20 + $0xd0] sm:$0xf] }
  0xa7   : > { %v765_v5 = vpop.permute.xlu1 %764  ;;  %1152 = vrot.lane.b32.xlu0 %v5358_v2, %s6120_s22 }
  0xa8   : > { %952 = vst.msk [vmem:[#allocation2 + $0x88] sm:$0xf] %vm934_vm4, %v765_v5  ;;  %v5391_v5 = vld [vmem:[%s6167_s20 + $0xd4] sm:$0xf] }
  0xa9   : > { %1154 = vrot.lane.b32.xlu1 %v5359_v4, %s6120_s22  ;;  %v767_v7 = vpop.permute.xlu0 %766 }
  0xaa   : > { %953 = vst.msk [vmem:[#allocation2 + $0x90] sm:$0xf] %vm934_vm4, %v767_v7  ;;  %v5392_v7 = vld [vmem:[%s6167_s20 + $0xdc] sm:$0xf] }
  0xab   : > { %v769_v9 = vpop.permute.xlu1 %768  ;;  %1156 = vrot.lane.b32.xlu0 %v5360_v6, %s6120_s22 }
  0xac   : > { %954 = vst.msk [vmem:[#allocation2 + $0x98] sm:$0xf] %vm934_vm4, %v769_v9  ;;  %v5393_v9 = vld [vmem:[%s6167_s20 + $0xe0] sm:$0xf] }
  0xad   : > { %1158 = vrot.lane.b32.xlu1 %v5361_v8, %s6120_s22  ;;  %v771_v11 = vpop.permute.xlu0 %770 }
  0xae   : > { %955 = vst.msk [vmem:[#allocation2 + $0xa0] sm:$0xf] %vm934_vm4, %v771_v11  ;;  %v5394_v11 = vld [vmem:[%s6167_s20 + $0xe4] sm:$0xf] }
  0xaf   : > { %v773_v13 = vpop.permute.xlu1 %772  ;;  %1160 = vrot.lane.b32.xlu0 %v5362_v10, %s6120_s22 }
  0xb0   : > { %956 = vst.msk [vmem:[#allocation2 + $0xa8] sm:$0xf] %vm934_vm4, %v773_v13  ;;  %v5395_v13 = vld [vmem:[%s6167_s20 + $0xe8] sm:$0xf] }
  0xb1   : > { %1162 = vrot.lane.b32.xlu1 %v5363_v12, %s6120_s22  ;;  %v775_v15 = vpop.permute.xlu0 %774 }
  0xb2   : > { %957 = vst.msk [vmem:[#allocation2 + $0xb0] sm:$0xf] %vm934_vm4, %v775_v15  ;;  %v5396_v15 = vld [vmem:[%s6167_s20 + $0xf0] sm:$0xf] }
  0xb3   : > { %v777_v17 = vpop.permute.xlu1 %776  ;;  %1164 = vrot.lane.b32.xlu0 %v5364_v14, %s6120_s22 }
  0xb4   : > { %958 = vst.msk [vmem:[#allocation2 + $0xb8] sm:$0xf] %vm934_vm4, %v777_v17  ;;  %v5397_v17 = vld [vmem:[%s6167_s20 + $0xf4] sm:$0xf] }
  0xb5   : > { %1166 = vrot.lane.b32.xlu1 %v5365_v16, %s6120_s22  ;;  %v779_v19 = vpop.permute.xlu0 %778 }
  0xb6   : > { %959 = vst.msk [vmem:[#allocation2 + $0xc0] sm:$0xf] %vm934_vm4, %v779_v19  ;;  %v5398_v19 = vld [vmem:[%s6167_s20 + $0xf8] sm:$0xf] }
  0xb7   : > { %v781_v21 = vpop.permute.xlu1 %780  ;;  %1168 = vrot.lane.b32.xlu0 %v5366_v18, %s6120_s22 }
  0xb8   : > { %960 = vst.msk [vmem:[#allocation2 + $0xc8] sm:$0xf] %vm934_vm4, %v781_v21  ;;  %v5399_v21 = vld [vmem:[%s6167_s20 + $0xfc] sm:$0xf] }
  0xb9   : > { %1170 = vrot.lane.b32.xlu1 %v5367_v20, %s6120_s22  ;;  %v783_v23 = vpop.permute.xlu0 %782 }
  0xba   : > { %961 = vst.msk [vmem:[#allocation2 + $0xd0] sm:$0xf] %vm934_vm4, %v783_v23  ;;  %v5400_v23 = vld [vmem:[%s6167_s20 + $0x104] sm:$0xf] }
  0xbb   : > { %v785_v25 = vpop.permute.xlu1 %784  ;;  %1172 = vrot.lane.b32.xlu0 %v5368_v22, %s6120_s22 }
  0xbc   : > { %962 = vst.msk [vmem:[#allocation2 + $0xd8] sm:$0xf] %vm934_vm4, %v785_v25  ;;  %v5401_v25 = vld [vmem:[%s6167_s20 + $0x108] sm:$0xf] }
  0xbd   : > { %1174 = vrot.lane.b32.xlu1 %v5369_v24, %s6120_s22  ;;  %v787_v27 = vpop.permute.xlu0 %786 }
  0xbe   : > { %963 = vst.msk [vmem:[#allocation2 + $0xe0] sm:$0xf] %vm934_vm4, %v787_v27  ;;  %v5402_v27 = vld [vmem:[%s6167_s20 + $0x10c] sm:$0xf] }
  0xbf   : > { %v789_v29 = vpop.permute.xlu1 %788  ;;  %1176 = vrot.lane.b32.xlu0 %v5370_v26, %s6120_s22 }
  0xc0   : > { %964 = vst.msk [vmem:[#allocation2 + $0xe8] sm:$0xf] %vm934_vm4, %v789_v29  ;;  %v5403_v29 = vld [vmem:[%s6167_s20 + $0x110] sm:$0xf] }
  0xc1   : > { %1178 = vrot.lane.b32.xlu1 %v5371_v28, %s6120_s22  ;;  %v791_v31 = vpop.permute.xlu0 %790 }
  0xc2   : > { %965 = vst.msk [vmem:[#allocation2 + $0xf0] sm:$0xf] %vm934_vm4, %v791_v31  ;;  %v5404_v31 = vld [vmem:[%s6167_s20 + $0x118] sm:$0xf] }
  0xc3   : > { %v793_v33 = vpop.permute.xlu1 %792  ;;  %1180 = vrot.lane.b32.xlu0 %v5372_v30, %s6120_s22 }
  0xc4   : > { %966 = vst.msk [vmem:[#allocation2 + $0xf8] sm:$0xf] %vm934_vm4, %v793_v33  ;;  %v5405_v33 = vld [vmem:[%s6167_s20 + $0x11c] sm:$0xf] }
  0xc5   : > { %1182 = vrot.lane.b32.xlu1 %v5373_v32, %s6120_s22  ;;  %v795_v35 = vpop.permute.xlu0 %794 }
  0xc6   : > { %967 = vst.msk [vmem:[#allocation2 + $0x100] sm:$0xf] %vm934_vm4, %v795_v35  ;;  %v5406_v35 = vld [vmem:[%s6167_s20 + $0x120] sm:$0xf] }
  0xc7   : > { %v797_v37 = vpop.permute.xlu1 %796  ;;  %1184 = vrot.lane.b32.xlu0 %v5374_v34, %s6120_s22 }
  0xc8   : > { %968 = vst.msk [vmem:[#allocation2 + $0x108] sm:$0xf] %vm934_vm4, %v797_v37  ;;  %v5407_v37 = vld [vmem:[%s6167_s20 + $0x124] sm:$0xf] }
  0xc9   : > { %1186 = vrot.lane.b32.xlu1 %v5375_v36, %s6120_s22  ;;  %v799_v39 = vpop.permute.xlu0 %798 }
  0xca   : > { %969 = vst.msk [vmem:[#allocation2 + $0x110] sm:$0xf] %vm934_vm4, %v799_v39  ;;  %v5408_v39 = vld [vmem:[%s6167_s20 + $0x12c] sm:$0xf] }
  0xcb   : > { %v801_v41 = vpop.permute.xlu1 %800  ;;  %1188 = vrot.lane.b32.xlu0 %v5376_v38, %s6120_s22 }
  0xcc   : > { %970 = vst.msk [vmem:[#allocation2 + $0x118] sm:$0xf] %vm934_vm4, %v801_v41  ;;  %v5409_v41 = vld [vmem:[%s6167_s20 + $0x130] sm:$0xf] }
  0xcd   : > { %1190 = vrot.lane.b32.xlu1 %v5377_v40, %s6120_s22  ;;  %v803_v43 = vpop.permute.xlu0 %802 }
  0xce   : > { %971 = vst.msk [vmem:[#allocation2 + $0x120] sm:$0xf] %vm934_vm4, %v803_v43  ;;  %v5410_v43 = vld [vmem:[%s6167_s20 + $0x134] sm:$0xf] }
  0xcf   : > { %v805_v45 = vpop.permute.xlu1 %804  ;;  %1192 = vrot.lane.b32.xlu0 %v5378_v42, %s6120_s22 }
  0xd0   : > { %972 = vst.msk [vmem:[#allocation2 + $0x128] sm:$0xf] %vm934_vm4, %v805_v45  ;;  %v5411_v45 = vld [vmem:[%s6167_s20 + $0x138] sm:$0xf] }
  0xd1   : > { %1194 = vrot.lane.b32.xlu1 %v5379_v44, %s6120_s22  ;;  %v807_v47 = vpop.permute.xlu0 %806 }
  0xd2   : > { %973 = vst.msk [vmem:[#allocation2 + $0x130] sm:$0xf] %vm934_vm4, %v807_v47  ;;  %v5412_v47 = vld [vmem:[%s6167_s20 + $0x140] sm:$0xf] }
  0xd3   : > { %v809_v49 = vpop.permute.xlu1 %808  ;;  %1196 = vrot.lane.b32.xlu0 %v5380_v46, %s6120_s22 }
  0xd4   : > { %974 = vst.msk [vmem:[#allocation2 + $0x138] sm:$0xf] %vm934_vm4, %v809_v49  ;;  %v5413_v49 = vld [vmem:[%s6167_s20 + $0x144] sm:$0xf] }
  0xd5   : > { %1198 = vrot.lane.b32.xlu1 %v5381_v48, %s6120_s22  ;;  %v811_v51 = vpop.permute.xlu0 %810 }
  0xd6   : > { %975 = vst.msk [vmem:[#allocation2 + $0x140] sm:$0xf] %vm934_vm4, %v811_v51  ;;  %v5414_v51 = vld [vmem:[%s6167_s20 + $0x148] sm:$0xf] }
  0xd7   : > { %v813_v53 = vpop.permute.xlu1 %812  ;;  %1200 = vrot.lane.b32.xlu0 %v5382_v50, %s6120_s22 }
  0xd8   : > { %976 = vst.msk [vmem:[#allocation2 + $0x148] sm:$0xf] %vm934_vm4, %v813_v53  ;;  %v5415_v53 = vld [vmem:[%s6167_s20 + $0x14c] sm:$0xf] }
  0xd9   : > { %1202 = vrot.lane.b32.xlu1 %v5383_v52, %s6120_s22  ;;  %v815_v55 = vpop.permute.xlu0 %814 }
  0xda   : > { %977 = vst.msk [vmem:[#allocation2 + $0x150] sm:$0xf] %vm934_vm4, %v815_v55  ;;  %v5421_v55 = vld [vmem:[%s6167_s20 + $0x18] sm:$0xf] }
  0xdb   : > { %v817_v57 = vpop.permute.xlu1 %816  ;;  %1204 = vrot.lane.b32.xlu0 %v5384_v54, %s6120_s22 }
  0xdc   : > { %978 = vst.msk [vmem:[#allocation2 + $0x158] sm:$0xf] %vm934_vm4, %v817_v57 }
  0xdd   : > { %1206 = vrot.lane.b32.xlu1 %v5385_v56, %s6120_s22  ;;  %v819_v59 = vpop.permute.xlu0 %818  ;;  %v5416_v56 = vld [vmem:[%s6167_s20 + $0x154] sm:$0xf] }
  0xde   : > { %979 = vst.msk [vmem:[#allocation2 + $0x160] sm:$0xf] %vm934_vm4, %v819_v59  ;;  %v5422_v59 = vld [vmem:[%s6167_s20 + $0x1c] sm:$0xf] }
  0xdf   : > { %v821_v61 = vpop.permute.xlu1 %820  ;;  %1208 = vrot.lane.b32.xlu0 %v5386_v58, %s6120_s22  ;;  %v5420_v58 = vld [vmem:[%s6167_s20 + $0x14] sm:$0xe] }
  0xe0   : > { %980 = vst.msk [vmem:[#allocation2 + $0x168] sm:$0xf] %vm934_vm4, %v821_v61  ;;  %v1585_v61 = vrot.slane %v5421_v55, 5 }
  0xe1   : > { %1210 = vrot.lane.b32.xlu1 %v5387_v60, %s6120_s22  ;;  %v823_v63 = vpop.permute.xlu0 %822  ;;  %v5417_v60 = vld [vmem:[%s6167_s20 + $0x158] sm:$0xf] }
  0xe2   : > { %981 = vst.msk [vmem:[#allocation2 + $0x170] sm:$0xf] %vm934_vm4, %v823_v63  ;;  %v5423_v63 = vld [vmem:[%s6167_s20 + $0x20] sm:$0xf] }
  0xe3   : > { %v825_v2 = vpop.permute.xlu1 %824  ;;  %1212 = vrot.lane.b32.xlu0 %v5388_v62, %s6120_s22 }
  0xe4   : > { %982 = vst.msk [vmem:[#allocation2 + $0x178] sm:$0xf] %vm934_vm4, %v825_v2  ;;  %v5505_v2 = vrot.slane %v5420_v58, 9 }
  0xe5   : > { %1214 = vrot.lane.b32.xlu1 %v5389_v1, %s6120_s22  ;;  %v827_v4 = vpop.permute.xlu0 %826  ;;  %v5418_v1 = vld [vmem:[%s6167_s20 + $0x15c] sm:$0xf] }
  0xe6   : > { %983 = vst.msk [vmem:[#allocation2 + $0x180] sm:$0xf] %vm934_vm4, %v827_v4 }
  0xe7   : > { %v829_v6 = vpop.permute.xlu1 %828  ;;  %1216 = vrot.lane.b32.xlu0 %v5390_v3, %s6120_s22  ;;  %v1588_v3 = vrot.slane %v5422_v59, 5 }
  0xe8   : > { %984 = vst.msk [vmem:[#allocation2 + $0x188] sm:$0xf] %vm934_vm4, %v829_v6  ;;  %v1587_v6 = vrot.slane %v1585_v61, 4 }
  0xe9   : > { %1218 = vrot.lane.b32.xlu1 %v5391_v5, %s6120_s22  ;;  %v831_v8 = vpop.permute.xlu0 %830  ;;  %v5419_v5 = vld [vmem:[%s6167_s20 + $0x160] sm:$0xf] }
  0xea   : > { %985 = vst.msk [vmem:[#allocation2 + $0x190] sm:$0xf] %vm934_vm4, %v831_v8 }
  0xeb   : > { %v833_v10 = vpop.permute.xlu1 %832  ;;  %1220 = vrot.lane.b32.xlu0 %v5392_v7, %s6120_s22  ;;  %v1591_v7 = vrot.slane %v5423_v63, 5  ;;  %v5438_v63 = vld [vmem:[%s6167_s20 + $0x5c] sm:$0xf] }
  0xec   : > { %986 = vst.msk [vmem:[#allocation2 + $0x198] sm:$0xf] %vm934_vm4, %v833_v10  ;;  %v5426_v10 = vld [vmem:[%s6167_s20 + $0x2c] sm:$0xf] }
  0xed   : > { %1222 = vrot.lane.b32.xlu1 %v5393_v9, %s6120_s22  ;;  %v835_v12 = vpop.permute.xlu0 %834  ;;  %v5424_v9 = vld [vmem:[%s6167_s20 + $0x24] sm:$0x1] }
  0xee   : > { %987 = vst.msk [vmem:[#allocation2 + $0x1a0] sm:$0xf] %vm934_vm4, %v835_v12  ;;  %v1590_v12 = vrot.slane %v1588_v3, 4 }
  0xef   : > { %v837_v14 = vpop.permute.xlu1 %836  ;;  %1224 = vrot.lane.b32.xlu0 %v5394_v11, %s6120_s22  ;;  %v1586_v11 = vsel %vm6160_vm2, %v5505_v2, %v1585_v61 }
  0xf0   : > { %988 = vst.msk [vmem:[#allocation2 + $0x1a8] sm:$0xf] %vm934_vm4, %v837_v14  ;;  %v5425_v14 = vld [vmem:[%s6167_s20 + $0x28] sm:$0xe] }
  0xf1   : > { %1226 = vrot.lane.b32.xlu1 %v5395_v13, %s6120_s22  ;;  %v839_v16 = vpop.permute.xlu0 %838 }
  0xf2   : > { %989 = vst.msk [vmem:[#allocation2 + $0x1b0] sm:$0xf] %vm934_vm4, %v839_v16  ;;  %v1589_v16 = vsel %vm6160_vm2, %v1587_v6, %v1588_v3 }
  0xf3   : > { %v841_v18 = vpop.permute.xlu1 %840  ;;  %1228 = vrot.lane.b32.xlu0 %v5396_v15, %s6120_s22  ;;  %v5427_v15 = vld [vmem:[%s6167_s20 + $0x30] sm:$0xf] }
  0xf4   : > { %990 = vst.msk [vmem:[#allocation2 + $0x1b8] sm:$0xf] %vm934_vm4, %v841_v18  ;;  %v1594_v18 = vrot.slane %v5424_v9, 5  ;;  %v5439_v9 = vld [vmem:[%s6167_s20 + $0x60] sm:$0x1] }
  0xf5   : > { %1230 = vrot.lane.b32.xlu1 %v5397_v17, %s6120_s22  ;;  %v843_v20 = vpop.permute.xlu0 %842  ;;  %v1593_v17 = vrot.slane %v1591_v7, 4 }
  0xf6   : > { %991 = vst.msk [vmem:[#allocation2 + $0x1c0] sm:$0xf] %vm934_vm4, %v843_v20 }
  0xf7   : > { %v845_v22 = vpop.permute.xlu1 %844  ;;  %1232 = vrot.lane.b32.xlu0 %v5398_v19, %s6120_s22  ;;  %v1598_v19 = vrot.slane %v5426_v10, 5  ;;  %v5441_v10 = vld [vmem:[%s6167_s20 + $0x68] sm:$0xf] }
  0xf8   : > { %992 = vst.msk [vmem:[#allocation2 + $0x1c8] sm:$0xf] %vm934_vm4, %v845_v22  ;;  %v1592_v22 = vsel %vm6160_vm2, %v1590_v12, %v1591_v7  ;;  %v1630_v7 = vrot.slane %v5438_v63, 5  ;;  %v5453_v63 = vld [vmem:[%s6167_s20 + $0x98] sm:$0xf] }
  0xf9   : > { %1234 = vrot.lane.b32.xlu1 %v5399_v21, %s6120_s22  ;;  %v847_v24 = vpop.permute.xlu0 %846  ;;  %v5428_v21 = vld [vmem:[%s6167_s20 + $0x34] sm:$0xf] }
  0xfa   : > { %993 = vst.msk [vmem:[#allocation2 + $0x1d0] sm:$0xf] %vm934_vm4, %v847_v24  ;;  %v1601_v24 = vrot.slane %v5427_v15, 5  ;;  %v5442_v15 = vld [vmem:[%s6167_s20 + $0x6c] sm:$0xf] }
  0xfb   : > { %v849_v26 = vpop.permute.xlu1 %848  ;;  %1236 = vrot.lane.b32.xlu0 %v5400_v23, %s6120_s22  ;;  %v5506_v23 = vrot.slane %v5425_v14, 9  ;;  %v5440_v14 = vld [vmem:[%s6167_s20 + $0x64] sm:$0xe] }
  0xfc   : > { %994 = vst.msk [vmem:[#allocation2 + $0x1d8] sm:$0xf] %vm934_vm4, %v849_v26  ;;  %v1595_v26 = vsel %vm6160_vm2, %v1593_v17, %v1594_v18  ;;  %v1632_v17 = vrot.slane %v1630_v7, 4  ;;  %v1633_v18 = vrot.slane %v5439_v9, 5  ;;  %v5454_v9 = vld [vmem:[%s6167_s20 + $0x9c] sm:$0x1] }
  0xfd   : > { %1238 = vrot.lane.b32.xlu1 %v5401_v25, %s6120_s22  ;;  %v851_v28 = vpop.permute.xlu0 %850 }
  0xfe   : > { %995 = vst.msk [vmem:[#allocation2 + $0x1e0] sm:$0xf] %vm934_vm4, %v851_v28  ;;  %v1604_v28 = vrot.slane %v5428_v21, 5  ;;  %v5443_v21 = vld [vmem:[%s6167_s20 + $0x70] sm:$0xf] }
  0xff   : > { %v853_v30 = vpop.permute.xlu1 %852  ;;  %1240 = vrot.lane.b32.xlu0 %v5402_v27, %s6120_s22  ;;  %v1600_v27 = vrot.slane %v1598_v19, 4 }
 0x100   : > { %996 = vst.msk [vmem:[#allocation2 + $0x1e8] sm:$0xf] %vm934_vm4, %v853_v30  ;;  %v5429_v30 = vld [vmem:[%s6167_s20 + $0x38] sm:$0x1] }
 0x101   : > { %1242 = vrot.lane.b32.xlu1 %v5403_v29, %s6120_s22  ;;  %v855_v32 = vpop.permute.xlu0 %854 }
 0x102   : > { %997 = vst.msk [vmem:[#allocation2 + $0x1f0] sm:$0xf] %vm934_vm4, %v855_v32  ;;  %v1599_v32 = vsel %vm6160_vm2, %v5506_v23, %v1598_v19  ;;  %v1637_v19 = vrot.slane %v5441_v10, 5  ;;  %v5509_v23 = vrot.slane %v5440_v14, 9  ;;  %v5456_v10 = vld [vmem:[%s6167_s20 + $0xa4] sm:$0xf] }
 0x103   : > { %v857_v34 = vpop.permute.xlu1 %856  ;;  %1244 = vrot.lane.b32.xlu0 %v5404_v31, %s6120_s22  ;;  %v5431_v31 = vld [vmem:[%s6167_s20 + $0x40] sm:$0xf] }
 0x104   : > { %998 = vst.msk [vmem:[#allocation2 + $0x1f8] sm:$0xf] %vm934_vm4, %v857_v34  ;;  %v5455_v14 = vld [vmem:[%s6167_s20 + $0xa0] sm:$0xe] }
 0x105   : > { %1246 = vrot.lane.b32.xlu1 %v5405_v33, %s6120_s22  ;;  %v859_v36 = vpop.permute.xlu0 %858  ;;  %v1603_v33 = vrot.slane %v1601_v24, 4 }
 0x106   : > { %999 = vst.msk [vmem:[#allocation2 + $0x200] sm:$0xf] %vm934_vm4, %v859_v36  ;;  %v5432_v36 = vld [vmem:[%s6167_s20 + $0x44] sm:$0xf] }
 0x107   : > { %v861_v38 = vpop.permute.xlu1 %860  ;;  %1248 = vrot.lane.b32.xlu0 %v5406_v35, %s6120_s22  ;;  %v5430_v35 = vld [vmem:[%s6167_s20 + $0x3c] sm:$0xe] }
 0x108   : > { %1000 = vst.msk [vmem:[#allocation2 + $0x208] sm:$0xf] %vm934_vm4, %v861_v38  ;;  %v1606_v38 = vrot.slane %v1604_v28, 4 }
 0x109   : > { %1250 = vrot.lane.b32.xlu1 %v5407_v37, %s6120_s22  ;;  %v863_v40 = vpop.permute.xlu0 %862  ;;  %v1602_v37 = vsel %vm6160_vm2, %v1600_v27, %v1601_v24  ;;  %v1640_v24 = vrot.slane %v5442_v15, 5  ;;  %v1639_v27 = vrot.slane %v1637_v19, 4  ;;  %v5457_v15 = vld [vmem:[%s6167_s20 + $0xa8] sm:$0xf] }
 0x10a   : > { %1001 = vst.msk [vmem:[#allocation2 + $0x210] sm:$0xf] %vm934_vm4, %v863_v40  ;;  %v1611_v40 = vrot.slane %v5431_v31, 5  ;;  %v5446_v31 = vld [vmem:[%s6167_s20 + $0x7c] sm:$0xf] }
 0x10b   : > { %v865_v42 = vpop.permute.xlu1 %864  ;;  %1252 = vrot.lane.b32.xlu0 %v5408_v39, %s6120_s22  ;;  %v1607_v39 = vrot.slane %v5429_v30, 5  ;;  %v5444_v30 = vld [vmem:[%s6167_s20 + $0x74] sm:$0x1] }
 0x10c   : > { %1002 = vst.msk [vmem:[#allocation2 + $0x218] sm:$0xf] %vm934_vm4, %v865_v42  ;;  %v5433_v42 = vld [vmem:[%s6167_s20 + $0x48] sm:$0xf] }
 0x10d   : > { %1254 = vrot.lane.b32.xlu1 %v5409_v41, %s6120_s22  ;;  %v1141_v44 = vpop.permute.xlu0 %1140 }
 0x10e   : > { %1345 = vst.msk [vmem:[#allocation2] sm:$0xf] %vm1344_vm5, %v1141_v44  ;;  %v5507_v44 = vrot.slane %v5430_v35, 9  ;;  %v5445_v35 = vld [vmem:[%s6167_s20 + $0x78] sm:$0xe] }
 0x10f   : > { %v1143_v46 = vpop.permute.xlu1 %1142  ;;  %1256 = vrot.lane.b32.xlu0 %v5410_v43, %s6120_s22  ;;  %v1605_v43 = vsel %vm6160_vm2, %v1603_v33, %v1604_v28  ;;  %v1643_v28 = vrot.slane %v5443_v21, 5  ;;  %v1642_v33 = vrot.slane %v1640_v24, 4  ;;  %v5458_v21 = vld [vmem:[%s6167_s20 + $0xac] sm:$0xf] }
 0x110   : > { %1346 = vst.msk [vmem:[#allocation2 + $0x8] sm:$0xf] %vm1344_vm5, %v1143_v46 }
 0x111   : > { %1258 = vrot.lane.b32.xlu1 %v5411_v45, %s6120_s22  ;;  %v1145_v48 = vpop.permute.xlu0 %1144  ;;  %v1614_v45 = vrot.slane %v5432_v36, 5  ;;  %v5447_v36 = vld [vmem:[%s6167_s20 + $0x80] sm:$0xf] }
 0x112   : > { %1347 = vst.msk [vmem:[#allocation2 + $0x10] sm:$0xf] %vm1344_vm5, %v1145_v48  ;;  %v1613_v48 = vrot.slane %v1611_v40, 4 }
 0x113   : > { %v1147_v50 = vpop.permute.xlu1 %1146  ;;  %1260 = vrot.lane.b32.xlu0 %v5412_v47, %s6120_s22  ;;  %v1608_v47 = vsel %vm6160_vm2, %v1606_v38, %v1607_v39  ;;  %v1645_v38 = vrot.slane %v1643_v28, 4  ;;  %v1646_v39 = vrot.slane %v5444_v30, 5  ;;  %v5459_v30 = vld [vmem:[%s6167_s20 + $0xb0] sm:$0x1] }
 0x114   : > { %1348 = vst.msk [vmem:[#allocation2 + $0x18] sm:$0xf] %vm1344_vm5, %v1147_v50  ;;  %v1615_v58 = vsel %vm6160_vm2, %v1613_v48, %v1614_v45 }
 0x115   : > { %1262 = vrot.lane.b32.xlu1 %v5413_v49, %s6120_s22  ;;  %v1149_v52 = vpop.permute.xlu0 %1148  ;;  %v1617_v49 = vrot.slane %v5433_v42, 5  ;;  %v5448_v42 = vld [vmem:[%s6167_s20 + $0x84] sm:$0xf] }
 0x116   : > { %1349 = vst.msk [vmem:[#allocation2 + $0x20] sm:$0xf] %vm1344_vm5, %v1149_v52  ;;  %v5436_v52 = vld [vmem:[%s6167_s20 + $0x54] sm:$0xf] }
 0x117   : > { %v1151_v54 = vpop.permute.xlu1 %1150  ;;  %1264 = vrot.lane.b32.xlu0 %v5414_v51, %s6120_s22  ;;  %v5434_v51 = vld [vmem:[%s6167_s20 + $0x4c] sm:$0x1]  ;;  %v1619_v59 = vrot.slane %v1617_v49, 4  ;;  %v1624_v61 = vrot.slane %v5436_v52, 5  ;;  %v5451_v52 = vld [vmem:[%s6167_s20 + $0x90] sm:$0xf] }
 0x118   : > { %1350 = vst.msk [vmem:[#allocation2 + $0x28] sm:$0xf] %vm1344_vm5, %v1151_v54  ;;  %v1616_v54 = vrot.slane %v1614_v45, 4  ;;  %v1653_v45 = vrot.slane %v5447_v36, 5  ;;  %v5462_v36 = vld [vmem:[%s6167_s20 + $0xbc] sm:$0xf] }
 0x119   : > { %1266 = vrot.lane.b32.xlu1 %v5415_v53, %s6120_s22  ;;  %v1153_v57 = vpop.permute.xlu0 %1152  ;;  %v1612_v53 = vsel %vm6160_vm2, %v5507_v44, %v1611_v40  ;;  %v1626_v6 = vrot.slane %v1624_v61, 4  ;;  %v1650_v40 = vrot.slane %v5446_v31, 5  ;;  %v5510_v44 = vrot.slane %v5445_v35, 9  ;;  %v5461_v31 = vld [vmem:[%s6167_s20 + $0xb8] sm:$0xf] }
 0x11a   : > { %1351 = vst.msk [vmem:[#allocation2 + $0x30] sm:$0xf] %vm1344_vm5, %v1153_v57  ;;  %v5437_v57 = vld [vmem:[%s6167_s20 + $0x58] sm:$0xf]  ;;  %v5460_v35 = vld [vmem:[%s6167_s20 + $0xb4] sm:$0xe] }
 0x11b   : > { %v1155_v62 = vpop.permute.xlu1 %1154  ;;  %1268 = vrot.lane.b32.xlu0 %v5416_v56, %s6120_s22  ;;  %v5435_v56 = vld [vmem:[%s6167_s20 + $0x50] sm:$0xe]  ;;  %v1627_v3 = vrot.slane %v5437_v57, 5  ;;  %v1652_v48 = vrot.slane %v1650_v40, 4  ;;  %v5452_v57 = vld [vmem:[%s6167_s20 + $0x94] sm:$0xf] }
 0x11c   : > { %1352 = vst.msk [vmem:[#allocation2 + $0x38] sm:$0xf] %vm1344_vm5, %v1155_v62  ;;  %v5508_v2 = vrot.slane %v5435_v56, 9  ;;  %v5450_v56 = vld [vmem:[%s6167_s20 + $0x8c] sm:$0xe] }
 0x11d   : > { %1270 = vrot.lane.b32.xlu1 %v5417_v60, %s6120_s22  ;;  %v1157_v4 = vpop.permute.xlu0 %1156  ;;  %v1620_v60 = vrot.slane %v5434_v51, 5  ;;  %v1629_v12 = vrot.slane %v1627_v3, 4  ;;  %v5449_v51 = vld [vmem:[%s6167_s20 + $0x88] sm:$0x1] }
 0x11e   : > { %1353 = vst.msk [vmem:[#allocation2 + $0x40] sm:$0xf] %vm1344_vm5, %v1157_v4 }
 0x11f   : > { %v1159_v8 = vpop.permute.xlu1 %1158  ;;  %1272 = vrot.lane.b32.xlu0 %v5418_v1, %s6120_s22  ;;  %v1618_v1 = vsel %vm6160_vm2, %v1616_v54, %v1617_v49  ;;  %v1656_v49 = vrot.slane %v5448_v42, 5  ;;  %v1655_v54 = vrot.slane %v1653_v45, 4  ;;  %v5463_v42 = vld [vmem:[%s6167_s20 + $0xc0] sm:$0xf] }
 0x120   : > { %1354 = vst.msk [vmem:[#allocation2 + $0x48] sm:$0xf] %vm1344_vm5, %v1159_v8 }
 0x121   : > { %1274 = vrot.lane.b32.xlu1 %v5419_v5, %s6120_s22  ;;  %v1161_v13 = vpop.permute.xlu0 %1160  ;;  %v1621_v5 = vsel %vm6160_vm2, %v1619_v59, %v1620_v60  ;;  %v1658_v59 = vrot.slane %v1656_v49, 4  ;;  %v1659_v60 = vrot.slane %v5449_v51, 5  ;;  %v5464_v51 = vld [vmem:[%s6167_s20 + $0xc4] sm:$0x1] }
 0x122   : > { %1355 = vst.msk [vmem:[#allocation2 + $0x50] sm:$0xf] %vm1344_vm5, %v1161_v13 }
 0x123   : > { %v1163_v20 = vpop.permute.xlu1 %1162  ;;  %1804 = vrot.lane.b32.xlu0 %v1586_v11, %s6121_s23  ;;  %v1625_v11 = vsel %vm6160_vm2, %v5508_v2, %v1624_v61  ;;  %v1663_v61 = vrot.slane %v5451_v52, 5  ;;  %v5511_v2 = vrot.slane %v5450_v56, 9  ;;  %v5466_v52 = vld [vmem:[%s6167_s20 + $0xcc] sm:$0xf]  ;;  %v5465_v56 = vld [vmem:[%s6167_s20 + $0xc8] sm:$0xe] }
 0x124   : > { %1356 = vst.msk [vmem:[#allocation2 + $0x58] sm:$0xf] %vm1344_vm5, %v1163_v20 }
 0x125   : > { %1806 = vrot.lane.b32.xlu1 %v1589_v16, %s6121_s23  ;;  %v1165_v25 = vpop.permute.xlu0 %1164  ;;  %v1628_v16 = vsel %vm6160_vm2, %v1626_v6, %v1627_v3  ;;  %v1666_v3 = vrot.slane %v5452_v57, 5  ;;  %v1665_v6 = vrot.slane %v1663_v61, 4  ;;  %v5467_v57 = vld [vmem:[%s6167_s20 + $0xd0] sm:$0xf] }
 0x126   : > { %1357 = vst.msk [vmem:[#allocation2 + $0x60] sm:$0xf] %vm1344_vm5, %v1165_v25 }
 0x127   : > { %v1167_v29 = vpop.permute.xlu1 %1166  ;;  %1808 = vrot.lane.b32.xlu0 %v1592_v22, %s6121_s23  ;;  %v1631_v22 = vsel %vm6160_vm2, %v1629_v12, %v1630_v7  ;;  %v1669_v7 = vrot.slane %v5453_v63, 5  ;;  %v1668_v12 = vrot.slane %v1666_v3, 4  ;;  %v5468_v63 = vld [vmem:[%s6167_s20 + $0xd4] sm:$0xf] }
 0x128   : > { %1358 = vst.msk [vmem:[#allocation2 + $0x68] sm:$0xf] %vm1344_vm5, %v1167_v29 }
 0x129   : > { %1810 = vrot.lane.b32.xlu1 %v1595_v26, %s6121_s23  ;;  %v1169_v34 = vpop.permute.xlu0 %1168  ;;  %v1634_v26 = vsel %vm6160_vm2, %v1632_v17, %v1633_v18  ;;  %v1671_v17 = vrot.slane %v1669_v7, 4  ;;  %v1672_v18 = vrot.slane %v5454_v9, 5  ;;  %v6122_v9 = vmov 0  }
 0x12a   : > { %1359 = vst.msk [vmem:[#allocation2 + $0x70] sm:$0xf] %vm1344_vm5, %v1169_v34  ;;  %4485 = vmatprep.subr.bf16.mxu0 %v6122_v9  ;;  %5974 = vmatprep.subr.bf16.mxu1 %v6122_v9 }
 0x12b   : > { %v1171_v41 = vpop.permute.xlu1 %1170  ;;  %1812 = vrot.lane.b32.xlu0 %v1599_v32, %s6121_s23  ;;  %v1638_v32 = vsel %vm6160_vm2, %v5509_v23, %v1637_v19  ;;  %v1676_v19 = vrot.slane %v5456_v10, 5  ;;  %v5512_v23 = vrot.slane %v5455_v14, 9 }
 0x12c   : > { %1360 = vst.msk [vmem:[#allocation2 + $0x78] sm:$0xf] %vm1344_vm5, %v1171_v41 }
 0x12d   : > { %1814 = vrot.lane.b32.xlu1 %v1602_v37, %s6121_s23  ;;  %v1173_v46 = vpop.permute.xlu0 %1172  ;;  %v1641_v37 = vsel %vm6160_vm2, %v1639_v27, %v1640_v24  ;;  %v1679_v24 = vrot.slane %v5457_v15, 5  ;;  %v1678_v27 = vrot.slane %v1676_v19, 4 }
 0x12e   : > { %1361 = vst.msk [vmem:[#allocation2 + $0x80] sm:$0xf] %vm1344_vm5, %v1173_v46 }
 0x12f   : > { %v1175_v50 = vpop.permute.xlu1 %1174  ;;  %1816 = vrot.lane.b32.xlu0 %v1605_v43, %s6121_s23  ;;  %v1644_v43 = vsel %vm6160_vm2, %v1642_v33, %v1643_v28  ;;  %v1682_v28 = vrot.slane %v5458_v21, 5  ;;  %v1681_v33 = vrot.slane %v1679_v24, 4 }
 0x130   : > { %1362 = vst.msk [vmem:[#allocation2 + $0x88] sm:$0xf] %vm1344_vm5, %v1175_v50 }
 0x131   : > { %1818 = vrot.lane.b32.xlu1 %v1608_v47, %s6121_s23  ;;  %v1177_v55 = vpop.permute.xlu0 %1176  ;;  %v1647_v47 = vsel %vm6160_vm2, %v1645_v38, %v1646_v39  ;;  %v1684_v38 = vrot.slane %v1682_v28, 4  ;;  %v1685_v39 = vrot.slane %v5459_v30, 5 }
 0x132   : > { %1363 = vst.msk [vmem:[#allocation2 + $0x90] sm:$0xf] %vm1344_vm5, %v1177_v55 }
 0x133   : > { %v1179_v62 = vpop.permute.xlu1 %1178  ;;  %1820 = vrot.lane.b32.xlu0 %v1612_v53, %s6121_s23  ;;  %v1651_v53 = vsel %vm6160_vm2, %v5510_v44, %v1650_v40  ;;  %v1689_v40 = vrot.slane %v5461_v31, 5  ;;  %v5513_v44 = vrot.slane %v5460_v35, 9  ;;  %v5476_v35 = vld [vmem:[%s6167_s20 + $0xf4] sm:$0xf] }
 0x134   : > { %1364 = vst.msk [vmem:[#allocation2 + $0x98] sm:$0xf] %vm1344_vm5, %v1179_v62 }
 0x135   : > { %1822 = vrot.lane.b32.xlu1 %v1615_v58, %s6121_s23  ;;  %v1181_v4 = vpop.permute.xlu0 %1180  ;;  %v1654_v58 = vsel %vm6160_vm2, %v1652_v48, %v1653_v45  ;;  %v1692_v45 = vrot.slane %v5462_v36, 5  ;;  %v1691_v48 = vrot.slane %v1689_v40, 4 }
 0x136   : > { %1365 = vst.msk [vmem:[#allocation2 + $0xa0] sm:$0xf] %vm1344_vm5, %v1181_v4 }
 0x137   : > { %v1183_v8 = vpop.permute.xlu1 %1182  ;;  %1824 = vrot.lane.b32.xlu0 %v1618_v1, %s6121_s23  ;;  %v1657_v1 = vsel %vm6160_vm2, %v1655_v54, %v1656_v49  ;;  %v1695_v49 = vrot.slane %v5463_v42, 5  ;;  %v1694_v54 = vrot.slane %v1692_v45, 4 }
 0x138   : > { %1366 = vst.msk [vmem:[#allocation2 + $0xa8] sm:$0xf] %vm1344_vm5, %v1183_v8 }
 0x139   : > { %1826 = vrot.lane.b32.xlu1 %v1621_v5, %s6121_s23  ;;  %v1185_v13 = vpop.permute.xlu0 %1184  ;;  %v1660_v5 = vsel %vm6160_vm2, %v1658_v59, %v1659_v60  ;;  %v1697_v59 = vrot.slane %v1695_v49, 4  ;;  %v1698_v60 = vrot.slane %v5464_v51, 5 }
 0x13a   : > { %1367 = vst.msk [vmem:[#allocation2 + $0xb0] sm:$0xf] %vm1344_vm5, %v1185_v13 }
 0x13b   : > { %v1187_v20 = vpop.permute.xlu1 %1186  ;;  %1828 = vrot.lane.b32.xlu0 %v1625_v11, %s6121_s23  ;;  %v1664_v11 = vsel %vm6160_vm2, %v5511_v2, %v1663_v61  ;;  %v1702_v61 = vrot.slane %v5466_v52, 5  ;;  %v5514_v2 = vrot.slane %v5465_v56, 9  ;;  %v6024_v52 = vld [vmem:[%s8779_s1 + $0x18] sm:$0xff]  }
 0x13c   : > { %1368 = vst.msk [vmem:[#allocation2 + $0xb8] sm:$0xf] %vm1344_vm5, %v1187_v20 }
 0x13d   : > { %1830 = vrot.lane.b32.xlu1 %v1628_v16, %s6121_s23  ;;  %v1189_v25 = vpop.permute.xlu0 %1188  ;;  %v1667_v16 = vsel %vm6160_vm2, %v1665_v6, %v1666_v3  ;;  %v1705_v3 = vrot.slane %v5467_v57, 5  ;;  %v1699_v6 = vsel %vm6160_vm2, %v1697_v59, %v1698_v60  ;;  %v5479_v57 = vld [vmem:[%s6167_s20 + $0x100] sm:$0x1] }
 0x13e   : > { %1369 = vst.msk [vmem:[#allocation2 + $0xc0] sm:$0xf] %vm1344_vm5, %v1189_v25 }
 0x13f   : > { %v1191_v29 = vpop.permute.xlu1 %1190  ;;  %1832 = vrot.lane.b32.xlu0 %v1631_v22, %s6121_s23  ;;  %v1670_v22 = vsel %vm6160_vm2, %v1668_v12, %v1669_v7  ;;  %v1704_v7 = vrot.slane %v1702_v61, 4  ;;  %v5471_v12 = vld [vmem:[%s6167_s20 + $0xe0] sm:$0xf]  ;;  %v1707_v14 = vrot.slane %v1705_v3, 4 }
 0x140   : > { %1370 = vst.msk [vmem:[#allocation2 + $0xc8] sm:$0xf] %vm1344_vm5, %v1191_v29 }
 0x141   : > { %1834 = vrot.lane.b32.xlu1 %v1634_v26, %s6121_s23  ;;  %v1193_v34 = vpop.permute.xlu0 %1192  ;;  %v1673_v26 = vsel %vm6160_vm2, %v1671_v17, %v1672_v18  ;;  %v5472_v17 = vld [vmem:[%s6167_s20 + $0xe4] sm:$0xf]  ;;  %v6021_v18 = vld [vmem:[%s8779_s1 + $0x30] sm:$0xff]  }
 0x142   : > { %1371 = vst.msk [vmem:[#allocation2 + $0xd0] sm:$0xf] %vm1344_vm5, %v1193_v34 }
 0x143   : > { %v1195_v41 = vpop.permute.xlu1 %1194  ;;  %1836 = vrot.lane.b32.xlu0 %v1638_v32, %s6121_s23  ;;  %v1677_v32 = vsel %vm6160_vm2, %v5512_v23, %v1676_v19  ;;  %v1706_v19 = vsel %vm6160_vm2, %v1704_v7, %v1705_v3  ;;  %v5483_v7 = vld [vmem:[%s6167_s20 + $0x110] sm:$0xf] }
 0x144   : > { %1372 = vst.msk [vmem:[#allocation2 + $0xd8] sm:$0xf] %vm1344_vm5, %v1195_v41 }
 0x145   : > { %1838 = vrot.lane.b32.xlu1 %v1641_v37, %s6121_s23  ;;  %v1197_v46 = vpop.permute.xlu0 %1196  ;;  %v1680_v37 = vsel %vm6160_vm2, %v1678_v27, %v1679_v24  ;;  %v5473_v24 = vld [vmem:[%s6167_s20 + $0xe8] sm:$0xf]  ;;  %v1718_v27 = vrot.slane %v5472_v17, 5 }
 0x146   : > { %1373 = vst.msk [vmem:[#allocation2 + $0xe0] sm:$0xf] %vm1344_vm5, %v1197_v46 }
 0x147   : > { %v1199_v50 = vpop.permute.xlu1 %1198  ;;  %1840 = vrot.lane.b32.xlu0 %v1644_v43, %s6121_s23  ;;  %v1683_v43 = vsel %vm6160_vm2, %v1681_v33, %v1682_v28 }
 0x148   : > { %1374 = vst.msk [vmem:[#allocation2 + $0xe8] sm:$0xf] %vm1344_vm5, %v1199_v50 }
 0x149   : > { %1842 = vrot.lane.b32.xlu1 %v1647_v47, %s6121_s23  ;;  %v1201_v55 = vpop.permute.xlu0 %1200  ;;  %v1686_v47 = vsel %vm6160_vm2, %v1684_v38, %v1685_v39  ;;  %v5475_v39 = vld [vmem:[%s6167_s20 + $0xf0] sm:$0xe] }
 0x14a   : > { %1375 = vst.msk [vmem:[#allocation2 + $0xf0] sm:$0xf] %vm1344_vm5, %v1201_v55 }
 0x14b   : > { %v1203_v62 = vpop.permute.xlu1 %1202  ;;  %1844 = vrot.lane.b32.xlu0 %v1651_v53, %s6121_s23  ;;  %v1690_v53 = vsel %vm6160_vm2, %v5513_v44, %v1689_v40  ;;  %v5477_v40 = vld [vmem:[%s6167_s20 + $0xf8] sm:$0xf] }
 0x14c   : > { %1376 = vst.msk [vmem:[#allocation2 + $0xf8] sm:$0xf] %vm1344_vm5, %v1203_v62 }
 0x14d   : > { %1846 = vrot.lane.b32.xlu1 %v1654_v58, %s6121_s23  ;;  %v1205_v4 = vpop.permute.xlu0 %1204  ;;  %v1693_v58 = vsel %vm6160_vm2, %v1691_v48, %v1692_v45  ;;  %v1728_v45 = vrot.slane %v5476_v35, 5 }
 0x14e   : > { %1377 = vst.msk [vmem:[#allocation2 + $0x100] sm:$0xf] %vm1344_vm5, %v1205_v4 }
 0x14f   : > { %v1207_v8 = vpop.permute.xlu1 %1206  ;;  %1848 = vrot.lane.b32.xlu0 %v1657_v1, %s6121_s23  ;;  %v1696_v1 = vsel %vm6160_vm2, %v1694_v54, %v1695_v49  ;;  %v5516_v49 = vrot.slane %v5475_v39, 9  ;;  %v1730_v54 = vrot.slane %v1728_v45, 4 }
 0x150   : > { %1378 = vst.msk [vmem:[#allocation2 + $0x108] sm:$0xf] %vm1344_vm5, %v1207_v8  ;;  %v1708_v8 = vrot.slane %v5468_v63, 5  ;;  %v5482_v63 = vld [vmem:[%s6167_s20 + $0x10c] sm:$0xf] }
 0x151   : > { %1850 = vrot.lane.b32.xlu1 %v1660_v5, %s6121_s23  ;;  %v1209_v13 = vpop.permute.xlu0 %1208  ;;  %v6020_v5 = vld [vmem:[%s8779_s1 + $0x38] sm:$0xff]   ;;  %v1729_v59 = vsel %vm6160_vm2, %v5516_v49, %v1728_v45 }
 0x152   : > { %1379 = vst.msk [vmem:[#allocation2 + $0x110] sm:$0xf] %vm1344_vm5, %v1209_v13  ;;  %4486 = vmatpush1.bf16.msra.mxu0 %v6020_v5  ;;  %v1703_v13 = vsel %vm6160_vm2, %v5514_v2, %v1702_v61  ;;  %5990 = vmatpush1.bf16.msra.mxu1 %v6020_v5 }
 0x153   : > { %v1211_v20 = vpop.permute.xlu1 %1210  ;;  %1852 = vrot.lane.b32.xlu0 %v1664_v11, %s6121_s23  ;;  %v5469_v11 = vld [vmem:[%s6167_s20 + $0xd8] sm:$0x1]  ;;  %4487 = vmatprep.subr.bf16.mxu0 %v6122_v9 }
 0x154   : > { %1380 = vst.msk [vmem:[#allocation2 + $0x118] sm:$0xf] %vm1344_vm5, %v1211_v20  ;;  %5975 = vmatprep.subr.bf16.mxu1 %v6122_v9  ;;  %v1710_v20 = vrot.slane %v1708_v8, 4  ;;  %v1711_v21 = vrot.slane %v5469_v11, 5  ;;  %v1744_v11 = vrot.slane %v5482_v63, 5 }
 0x155   : > { %1854 = vrot.lane.b32.xlu1 %v1667_v16, %s6121_s23  ;;  %v1213_v25 = vpop.permute.xlu0 %1212  ;;  %v5470_v16 = vld [vmem:[%s6167_s20 + $0xdc] sm:$0xe] }
 0x156   : > { %1381 = vst.msk [vmem:[#allocation2 + $0x120] sm:$0xf] %vm1344_vm5, %v1213_v25  ;;  %4488 = vmatpush1.bf16.msra.mxu0 %v6021_v18  ;;  %v1709_v25 = vsel %vm6160_vm2, %v1707_v14, %v1708_v8  ;;  %5991 = vmatpush1.bf16.msra.mxu1 %v6021_v18  ;;  %v1712_v30 = vsel %vm6160_vm2, %v1710_v20, %v1711_v21  ;;  %v5484_v18 = vld [vmem:[%s6167_s20 + $0x114] sm:$0x1]  ;;  %v1746_v21 = vrot.slane %v1744_v11, 4 }
 0x157   : > { %v1215_v29 = vpop.permute.xlu1 %1214  ;;  %1856 = vrot.lane.b32.xlu0 %v1670_v22, %s6121_s23  ;;  %v1715_v22 = vrot.slane %v5471_v12, 5  ;;  %4489 = vmatprep.subr.bf16.mxu0 %v6122_v9 }
 0x158   : > { %1382 = vst.msk [vmem:[#allocation2 + $0x128] sm:$0xf] %vm1344_vm5, %v1215_v29  ;;  %v6022_v29 = vld [vmem:[%s8779_s1 + $0x28] sm:$0xff]   ;;  %5976 = vmatprep.subr.bf16.mxu1 %v6122_v9 }
 0x159   : > { %1858 = vrot.lane.b32.xlu1 %v1673_v26, %s6121_s23  ;;  %v1217_v34 = vpop.permute.xlu0 %1216  ;;  %v5515_v26 = vrot.slane %v5470_v16, 9  ;;  %v1717_v31 = vrot.slane %v1715_v22, 4  ;;  %v1747_v16 = vrot.slane %v5483_v7, 5  ;;  %v5522_v7 = vld [vmem:[%s6167_s20 + $0x28] sm:$0xf] }
 0x15a   : > { %1383 = vst.msk [vmem:[#allocation2 + $0x130] sm:$0xf] %vm1344_vm5, %v1217_v34  ;;  %v5474_v34 = vld [vmem:[%s6167_s20 + $0xec] sm:$0x1]  ;;  %4490 = vmatpush1.bf16.msra.mxu0 %v6022_v29  ;;  %5992 = vmatpush1.bf16.msra.mxu1 %v6022_v29 }
 0x15b   : > { %v1219_v41 = vpop.permute.xlu1 %1218  ;;  %1860 = vrot.lane.b32.xlu0 %v1677_v32, %s6121_s23  ;;  %v1721_v32 = vrot.slane %v5473_v24, 5  ;;  %v1716_v36 = vsel %vm6160_vm2, %v5515_v26, %v1715_v22  ;;  %4491 = vmatprep.subr.bf16.mxu0 %v6122_v9  ;;  %v1719_v42 = vsel %vm6160_vm2, %v1717_v31, %v1718_v27  ;;  %v1724_v44 = vrot.slane %v5474_v34, 5  ;;  %v5487_v24 = vld [vmem:[%s6167_s20 + $0x120] sm:$0xf]  ;;  %v5488_v31 = vld [vmem:[%s6167_s20 + $0x124] sm:$0xf] }
 0x15c   : > { %1384 = vst.msk [vmem:[#allocation2 + $0x138] sm:$0xf] %vm1344_vm5, %v1219_v41  ;;  %v6023_v41 = vld [vmem:[%s8779_s1 + $0x20] sm:$0xff]   ;;  %5977 = vmatprep.subr.bf16.mxu1 %v6122_v9  ;;  %v1757_v34 = vrot.slane %v5487_v24, 5  ;;  %v1760_v39 = vrot.slane %v5488_v31, 5 }
 0x15d   : > { %1862 = vrot.lane.b32.xlu1 %v1680_v37, %s6121_s23  ;;  %v1221_v46 = vpop.permute.xlu0 %1220  ;;  %v1720_v37 = vrot.slane %v1718_v27, 4  ;;  %v1749_v27 = vrot.slane %v1747_v16, 4  ;;  %2146 = vst.msk [vmem:[#allocation2 + $0x4] sm:$0xf] %vm267_vm3, %v5522_v7 }
 0x15e   : > { %1385 = vst.msk [vmem:[#allocation2 + $0x140] sm:$0xf] %vm1344_vm5, %v1221_v46  ;;  %4492 = vmatpush1.bf16.msra.mxu0 %v6023_v41  ;;  %5993 = vmatpush1.bf16.msra.mxu1 %v6023_v41  ;;  %v5489_v41 = vld [vmem:[%s6167_s20 + $0x128] sm:$0x1] }
 0x15f   : > { %v1223_v50 = vpop.permute.xlu1 %1222  ;;  %1864 = vrot.lane.b32.xlu0 %v1683_v43, %s6121_s23  ;;  %v1723_v43 = vrot.slane %v1721_v32, 4  ;;  %v1722_v48 = vsel %vm6160_vm2, %v1720_v37, %v1721_v32  ;;  %4493 = vmatprep.subr.bf16.mxu0 %v6122_v9  ;;  %v1748_v32 = vsel %vm6160_vm2, %v1746_v21, %v1747_v16  ;;  %v7185_v16 = vld [vmem:[%s6167_s20 + $0x148] sm:$0xf] }
 0x160   : > { %1386 = vst.msk [vmem:[#allocation2 + $0x148] sm:$0xf] %vm1344_vm5, %v1223_v50  ;;  %v1731_v50 = vrot.slane %v5477_v40, 5  ;;  %5978 = vmatprep.subr.bf16.mxu1 %v6122_v9  ;;  %v5590_v21 = vld [vmem:[%s6167_s20 + $0x28] sm:$0xe] }
 0x161   : > { %1866 = vrot.lane.b32.xlu1 %v1686_v47, %s6121_s23  ;;  %v1225_v55 = vpop.permute.xlu0 %1224  ;;  %v5478_v47 = vld [vmem:[%s6167_s20 + $0xfc] sm:$0xf] }
 0x162   : > { %1387 = vst.msk [vmem:[#allocation2 + $0x150] sm:$0xf] %vm1344_vm5, %v1225_v55  ;;  %v1734_v55 = vrot.slane %v5478_v47, 5  ;;  %4494 = vmatpush1.bf16.msra.mxu0 %v6024_v52  ;;  %v1733_v60 = vrot.slane %v1731_v50, 4  ;;  %5994 = vmatpush1.bf16.msra.mxu1 %v6024_v52  ;;  %v1732_v2 = vsel %vm6160_vm2, %v1730_v54, %v1731_v50  ;;  %v5492_v47 = vld [vmem:[%s6167_s20 + $0x134] sm:$0xf] }
 0x163   : > { %v1227_v62 = vpop.permute.xlu1 %1226  ;;  %1868 = vrot.lane.b32.xlu0 %v1690_v53, %s6121_s23  ;;  %v1725_v53 = vsel %vm6160_vm2, %v1723_v43, %v1724_v44  ;;  %4495 = vmatprep.subr.bf16.mxu0 %v6122_v9  ;;  %v1759_v44 = vrot.slane %v1757_v34, 4  ;;  %v1762_v50 = vrot.slane %v1760_v39, 4  ;;  %v5493_v54 = vld [vmem:[%s6167_s20 + $0x138] sm:$0xf] }
 0x164   : > { %1388 = vst.msk [vmem:[#allocation2 + $0x158] sm:$0xf] %vm1344_vm5, %v1227_v62  ;;  %v5480_v62 = vld [vmem:[%s6167_s20 + $0x104] sm:$0xe]  ;;  %5979 = vmatprep.subr.bf16.mxu1 %v6122_v9  ;;  %v1736_v3 = vrot.slane %v1734_v55, 4  ;;  %v1735_v8 = vsel %vm6160_vm2, %v1733_v60, %v1734_v55 }
 0x165   : > { %1870 = vrot.lane.b32.xlu1 %v1693_v58, %s6121_s23  ;;  %v1229_v4 = vpop.permute.xlu0 %1228  ;;  %v5481_v58 = vld [vmem:[%s6167_s20 + $0x108] sm:$0xf]  ;;  %v1761_v55 = vsel %vm6160_vm2, %v1759_v44, %v1760_v39  ;;  %v5760_v39 = vld [vmem:[%s6167_s20 + $0x3c] sm:$0xe] }
 0x166   : > { %1389 = vst.msk [vmem:[#allocation2 + $0x160] sm:$0xf] %vm1344_vm5, %v1229_v4  ;;  %v1737_v4 = vrot.slane %v5479_v57, 5  ;;  %v1741_v5 = vrot.slane %v5481_v58, 5  ;;  %v1770_v57 = vrot.slane %v5492_v47, 5 }
 0x167   : > { %v1231_v10 = vpop.permute.xlu1 %1230  ;;  %1872 = vrot.lane.b32.xlu0 %v1696_v1, %s6121_s23  ;;  %v6025_v1 = vld [vmem:[%s8779_s1 + $0x10] sm:$0xff]  }
 0x168   : > { %1390 = vst.msk [vmem:[#allocation2 + $0x168] sm:$0xf] %vm1344_vm5, %v1231_v10  ;;  %4496 = vmatpush1.bf16.msra.mxu0 %v6025_v1  ;;  %v5517_v10 = vrot.slane %v5480_v62, 9  ;;  %5995 = vmatpush1.bf16.msra.mxu1 %v6025_v1  ;;  %v1738_v14 = vsel %vm6160_vm2, %v1736_v3, %v1737_v4  ;;  %v1773_v62 = vrot.slane %v5493_v54, 5  ;;  %v5494_v1 = vld [vmem:[%s6167_s20 + $0x13c] sm:$0x1] }
 0x169   : > { %1874 = vrot.lane.b32.xlu1 %v1699_v6, %s6121_s23  ;;  %v1233_v15 = vpop.permute.xlu0 %1232  ;;  %4497 = vmatprep.subr.bf16.mxu0 %v6122_v9  ;;  %v1772_v4 = vrot.slane %v1770_v57, 4  ;;  %v6035_v54 = vld [vmem:[%s8779_s1 + $0x40] sm:$0xff]  }
 0x16a   : > { %1391 = vst.msk [vmem:[#allocation2 + $0x170] sm:$0xf] %vm1344_vm5, %v1233_v15  ;;  %5980 = vmatprep.subr.bf16.mxu1 %v6122_v9  ;;  %v1743_v15 = vrot.slane %v1741_v5, 4  ;;  %v1742_v20 = vsel %vm6160_vm2, %v5517_v10, %v1741_v5 }
 0x16b   : > { %v1235_v23 = vpop.permute.xlu1 %1234  ;;  %1876 = vrot.lane.b32.xlu0 %v1703_v13, %s6121_s23  ;;  %v6026_v13 = vld [vmem:[%s8779_s1 + $0x8] sm:$0xff]  }
 0x16c   : > { %1392 = vst.msk [vmem:[#allocation2 + $0x178] sm:$0xf] %vm1344_vm5, %v1235_v23  ;;  %4498 = vmatpush1.bf16.msra.mxu0 %v6026_v13  ;;  %5996 = vmatpush1.bf16.msra.mxu1 %v6026_v13  ;;  %v5485_v23 = vld [vmem:[%s6167_s20 + $0x118] sm:$0xe]  ;;  %v1745_v26 = vsel %vm6160_vm2, %v1743_v15, %v1744_v11  ;;  %v1775_v11 = vrot.slane %v1773_v62, 4 }
 0x16d   : > { %1878 = vrot.lane.b32.xlu1 %v1706_v19, %s6121_s23  ;;  %v1237_v28 = vpop.permute.xlu0 %1236  ;;  %v5486_v19 = vld [vmem:[%s6167_s20 + $0x11c] sm:$0xf]  ;;  %4499 = vmatprep.subr.bf16.mxu0 %v6122_v9 }
 0x16e   : > { %1393 = vst.msk [vmem:[#allocation2 + $0x180] sm:$0xf] %vm1344_vm5, %v1237_v28  ;;  %5981 = vmatprep.subr.bf16.mxu1 %v6122_v9  ;;  %v1750_v28 = vrot.slane %v5484_v18, 5  ;;  %v1754_v29 = vrot.slane %v5486_v19, 5  ;;  %v1774_v18 = vsel %vm6160_vm2, %v1772_v4, %v1773_v62  ;;  %v5525_v4 = vld [vmem:[%s6167_s20 + $0x34] sm:$0xf] }
 0x16f   : > { %v1239_v33 = vpop.permute.xlu1 %1238  ;;  %1880 = vrot.lane.b32.xlu0 %v1709_v25, %s6121_s23  ;;  %v6027_v25 = vld [vmem:[%s8779_s1] sm:$0xff]   ;;  %2149 = vst.msk [vmem:[#allocation2 + $0x1c] sm:$0xf] %vm267_vm3, %v5525_v4 }
 0x170   : > { %1394 = vst.msk [vmem:[#allocation2 + $0x188] sm:$0xf] %vm1344_vm5, %v1239_v33  ;;  %4500 = vmatpush1.bf16.msra.mxu0 %v6027_v25  ;;  %v5518_v33 = vrot.slane %v5485_v23, 9  ;;  %5997 = vmatpush1.bf16.msra.mxu1 %v6027_v25  ;;  %v1751_v37 = vsel %vm6160_vm2, %v1749_v27, %v1750_v28  ;;  %v1783_v25 = vrot.slane %v7185_v16, 5  ;;  %v7205_v28 = vld [vmem:[%s6167_s20 + $0x30] sm:$0xf] }
 0x171   : > { %1882 = vrot.lane.b32.xlu1 %v1712_v30, %s6121_s23  ;;  %v1241_v38 = vpop.permute.xlu0 %1240  ;;  %4501 = vmatprep.subr.bf16.mxu0 %v6122_v9  ;;  %v5838_v16 = vld [vmem:[%s6167_s20 + $0x174] sm:$0xf] }
 0x172   : > { %1395 = vst.msk [vmem:[#allocation2 + $0x190] sm:$0xf] %vm1344_vm5, %v1241_v38  ;;  %5982 = vmatprep.subr.bf16.mxu1 %v6122_v9  ;;  %v1756_v38 = vrot.slane %v1754_v29, 4  ;;  %v1755_v43 = vsel %vm6160_vm2, %v5518_v33, %v1754_v29 }
 0x173   : > { %v1243_v46 = vpop.permute.xlu1 %1242  ;;  %1884 = vrot.lane.b32.xlu0 %v1716_v36, %s6121_s23  ;;  %v6028_v36 = vld [vmem:[%s8779_s1 + $0x78] sm:$0xff]  }
 0x174   : > { %1396 = vst.msk [vmem:[#allocation2 + $0x198] sm:$0xf] %vm1344_vm5, %v1243_v46  ;;  %4502 = vmatpush2.bf16.msra.mxu0 %v6028_v36  ;;  %5998 = vmatpush2.bf16.msra.mxu1 %v6028_v36  ;;  %v5490_v46 = vld [vmem:[%s6167_s20 + $0x12c] sm:$0xe]  ;;  %v1758_v49 = vsel %vm6160_vm2, %v1756_v38, %v1757_v34 }
 0x175   : > { %1886 = vrot.lane.b32.xlu1 %v1719_v42, %s6121_s23  ;;  %v1245_v51 = vpop.permute.xlu0 %1244  ;;  %v5491_v42 = vld [vmem:[%s6167_s20 + $0x130] sm:$0xf]  ;;  %4503 = vmatprep.subr.bf16.mxu0 %v6122_v9 }
 0x176   : > { %1397 = vst.msk [vmem:[#allocation2 + $0x1a0] sm:$0xf] %vm1344_vm5, %v1245_v51  ;;  %5983 = vmatprep.subr.bf16.mxu1 %v6122_v9  ;;  %v1763_v51 = vrot.slane %v5489_v41, 5  ;;  %v1767_v52 = vrot.slane %v5491_v42, 5  ;;  %v7231_v41 = vld [vmem:[%s6167_s20 + $0xd0] sm:$0xf] }
 0x177   : > { %v1247_v56 = vpop.permute.xlu1 %1246  ;;  %1888 = vrot.lane.b32.xlu0 %v1722_v48, %s6121_s23  ;;  %v6029_v48 = vld [vmem:[%s8779_s1 + $0x70] sm:$0xff]  }
 0x178   : > { %1398 = vst.msk [vmem:[#allocation2 + $0x1a8] sm:$0xf] %vm1344_vm5, %v1247_v56  ;;  %4504 = vmatpush2.bf16.msra.mxu0 %v6029_v48  ;;  %v5519_v56 = vrot.slane %v5490_v46, 9  ;;  %5999 = vmatpush2.bf16.msra.mxu1 %v6029_v48  ;;  %v1764_v60 = vsel %vm6160_vm2, %v1762_v50, %v1763_v51  ;;  %v5556_v42 = vld [vmem:[%s6167_s20 + $0xd0] sm:$0xf]  ;;  %v5845_v51 = vrot.slane %v5760_v39, 9 }
 0x179   : > { %1890 = vrot.lane.b32.xlu1 %v1725_v53, %s6121_s23  ;;  %v1249_v61 = vpop.permute.xlu0 %1248  ;;  %4505 = vmatprep.subr.bf16.mxu0 %v6122_v9  ;;  %2180 = vst.msk [vmem:[#allocation2 + $0x114] sm:$0xf] %vm267_vm3, %v5556_v42  ;;  %v5557_v46 = vld [vmem:[%s6167_s20 + $0xd4] sm:$0xf]  ;;  %v7247_v48 = vld [vmem:[%s6167_s20 + $0x44] sm:$0xf] }
 0x17a   : > { %1399 = vst.msk [vmem:[#allocation2 + $0x1b0] sm:$0xf] %vm1344_vm5, %v1249_v61  ;;  %5984 = vmatprep.subr.bf16.mxu1 %v6122_v9  ;;  %v1769_v61 = vrot.slane %v1767_v52, 4  ;;  %v1768_v3 = vsel %vm6160_vm2, %v5519_v56, %v1767_v52  ;;  %v5692_v50 = vld [vmem:[%s6167_s20 + $0x3c] sm:$0xf]  ;;  %v2493_v52 = vrot.slane %v7231_v41, 5 }
 0x17b   : > { %v1251_v6 = vpop.permute.xlu1 %1250  ;;  %1892 = vrot.lane.b32.xlu0 %v1729_v59, %s6121_s23  ;;  %v6030_v59 = vld [vmem:[%s8779_s1 + $0x68] sm:$0xff]   ;;  %2181 = vst.msk [vmem:[#allocation2 + $0x11c] sm:$0xf] %vm267_vm3, %v5557_v46  ;;  %v5559_v42 = vld [vmem:[%s6167_s20 + $0xe0] sm:$0xf] }
 0x17c   : > { %1400 = vst.msk [vmem:[#allocation2 + $0x1b8] sm:$0xf] %vm1344_vm5, %v1251_v6  ;;  %4506 = vmatpush2.bf16.msra.mxu0 %v6030_v59  ;;  %6000 = vmatpush2.bf16.msra.mxu1 %v6030_v59  ;;  %v5495_v6 = vld [vmem:[%s6167_s20 + $0x140] sm:$0xe]  ;;  %v1771_v10 = vsel %vm6160_vm2, %v1769_v61, %v1770_v57  ;;  %v3461_v57 = vrot.slane %v7247_v48, 5  ;;  %v2495_v61 = vrot.slane %v2493_v52, 4 }
 0x17d   : > { %1894 = vrot.lane.b32.xlu1 %v1732_v2, %s6121_s23  ;;  %v1253_v12 = vpop.permute.xlu0 %1252  ;;  %v5496_v2 = vld [vmem:[%s6167_s20 + $0x144] sm:$0xf]  ;;  %4507 = vmatprep.subr.bf16.mxu0 %v6122_v9  ;;  %v5520_v19 = vrot.slane %v5495_v6, 9  ;;  %v5593_v6 = vld [vmem:[%s6167_s20 + $0x34] sm:$0xf] }
 0x17e   : > { %1401 = vst.msk [vmem:[#allocation2 + $0x1c0] sm:$0xf] %vm1344_vm5, %v1253_v12  ;;  %5985 = vmatprep.subr.bf16.mxu1 %v6122_v9  ;;  %v1776_v12 = vrot.slane %v5494_v1, 5  ;;  %v1780_v13 = vrot.slane %v5496_v2, 5  ;;  %v5694_v46 = vld [vmem:[%s6167_s20 + $0x44] sm:$0xf] }
 0x17f   : > { %v1255_v17 = vpop.permute.xlu1 %1254  ;;  %1896 = vrot.lane.b32.xlu0 %v1735_v8, %s6121_s23  ;;  %v6031_v8 = vld [vmem:[%s8779_s1 + $0x60] sm:$0xff]   ;;  %2183 = vst.msk [vmem:[#allocation2 + $0x12c] sm:$0xf] %vm267_vm3, %v5559_v42 }
 0x180   : > { %1402 = vst.msk [vmem:[#allocation2 + $0x1c8] sm:$0xf] %vm1344_vm5, %v1255_v17  ;;  %v5591_v17 = vld [vmem:[%s6167_s20 + $0x2c] sm:$0xf]  ;;  %4508 = vmatpush2.bf16.msra.mxu0 %v6031_v8  ;;  %6001 = vmatpush2.bf16.msra.mxu1 %v6031_v8  ;;  %v1777_v23 = vsel %vm6160_vm2, %v1775_v11, %v1776_v12  ;;  %v1782_v24 = vrot.slane %v1780_v13, 4  ;;  %v1781_v29 = vsel %vm6160_vm2, %v5520_v19, %v1780_v13  ;;  %v2392_v12 = vrot.slane %v5593_v6, 5 }
 0x181   : > { %1898 = vrot.lane.b32.xlu1 %v1738_v14, %s6121_s23  ;;  %v1257_v22 = vpop.permute.xlu0 %1256  ;;  %v5523_v14 = vld [vmem:[%s6167_s20 + $0x2c] sm:$0xf]  ;;  %4509 = vmatprep.subr.bf16.mxu0 %v6122_v9 }
 0x182   : > { %1403 = vst.msk [vmem:[#allocation2 + $0x1d0] sm:$0xf] %vm1344_vm5, %v1257_v22  ;;  %v6032_v22 = vld [vmem:[%s8779_s1 + $0x58] sm:$0xff]   ;;  %5986 = vmatprep.subr.bf16.mxu1 %v6122_v9  ;;  %v1784_v33 = vsel %vm6160_vm2, %v1782_v24, %v1783_v25 }
 0x183   : > { %v1259_v30 = vpop.permute.xlu1 %1258  ;;  %1900 = vrot.lane.b32.xlu0 %v1742_v20, %s6121_s23  ;;  %2147 = vst.msk [vmem:[#allocation2 + $0xc] sm:$0xf] %vm267_vm3, %v5523_v14  ;;  %v5594_v14 = vld [vmem:[%s6167_s20 + $0x38] sm:$0x1] }
 0x184   : > { %1404 = vst.msk [vmem:[#allocation2 + $0x1d8] sm:$0xf] %vm1344_vm5, %v1259_v30  ;;  %4510 = vmatpush2.bf16.msra.mxu0 %v6032_v22  ;;  %v5675_v30 = vrot.slane %v5590_v21, 9  ;;  %6002 = vmatpush2.bf16.msra.mxu1 %v6032_v22  ;;  %v5727_v21 = vld [vmem:[%s6167_s20 + $0xe8] sm:$0xf]  ;;  %v2394_v22 = vrot.slane %v2392_v12, 4 }
 0x185   : > { %1902 = vrot.lane.b32.xlu1 %v1745_v26, %s6121_s23  ;;  %v1261_v35 = vpop.permute.xlu0 %1260  ;;  %v2386_v26 = vrot.slane %v5591_v17, 5  ;;  %4511 = vmatprep.subr.bf16.mxu0 %v6122_v9  ;;  %v5726_v17 = vld [vmem:[%s6167_s20 + $0xe4] sm:$0xf] }
 0x186   : > { %1405 = vst.msk [vmem:[#allocation2 + $0x1e0] sm:$0xf] %vm1344_vm5, %v1261_v35  ;;  %5987 = vmatprep.subr.bf16.mxu1 %v6122_v9  ;;  %v2389_v35 = vrot.slane %v7205_v28, 5 }
 0x187   : > { %v1263_v40 = vpop.permute.xlu1 %1262  ;;  %1904 = vrot.lane.b32.xlu0 %v1748_v32, %s6121_s23  ;;  %v6033_v32 = vld [vmem:[%s8779_s1 + $0x50] sm:$0xff]   ;;  %v2388_v34 = vrot.slane %v2386_v26, 4  ;;  %v2387_v38 = vsel %vm6160_vm2, %v5675_v30, %v2386_v26 }
 0x188   : > { %1406 = vst.msk [vmem:[#allocation2 + $0x1e8] sm:$0xf] %vm1344_vm5, %v1263_v40  ;;  %4512 = vmatpush2.bf16.msra.mxu0 %v6033_v32  ;;  %6003 = vmatpush2.bf16.msra.mxu1 %v6033_v32 }
 0x189   : > { %1906 = vrot.lane.b32.xlu1 %v1751_v37, %s6121_s23  ;;  %v1265_v45 = vpop.permute.xlu0 %1264  ;;  %v5761_v37 = vld [vmem:[%s6167_s20 + $0x40] sm:$0xf]  ;;  %4513 = vmatprep.subr.bf16.mxu0 %v6122_v9  ;;  %v2390_v44 = vsel %vm6160_vm2, %v2388_v34, %v2389_v35 }
 0x18a   : > { %1407 = vst.msk [vmem:[#allocation2 + $0x1f0] sm:$0xf] %vm1344_vm5, %v1265_v45  ;;  %5988 = vmatprep.subr.bf16.mxu1 %v6122_v9  ;;  %v3458_v45 = vrot.slane %v5761_v37, 5 }
 0x18b   : > { %v1267_v53 = vpop.permute.xlu1 %1266  ;;  %1908 = vrot.lane.b32.xlu0 %v1755_v43, %s6121_s23  ;;  %v6034_v43 = vld [vmem:[%s8779_s1 + $0x48] sm:$0xff]  }
 0x18c   : > { %1408 = vst.msk [vmem:[#allocation2 + $0x1f8] sm:$0xf] %vm1344_vm5, %v1267_v53  ;;  %4514 = vmatpush2.bf16.msra.mxu0 %v6034_v43  ;;  %6004 = vmatpush2.bf16.msra.mxu1 %v6034_v43  ;;  %v3460_v56 = vrot.slane %v3458_v45, 4 }
 0x18d   : > { %1910 = vrot.lane.b32.xlu1 %v1758_v49, %s6121_s23  ;;  %v1269_v58 = vpop.permute.xlu0 %1268  ;;  %v5633_v49 = vld [vmem:[%s6167_s20 + $0xd4] sm:$0xf]  ;;  %4515 = vmatprep.subr.bf16.mxu0 %v6122_v9 }
 0x18e   : > { %1409 = vst.msk [vmem:[#allocation2 + $0x200] sm:$0xf] %vm1344_vm5, %v1269_v58  ;;  %5989 = vmatprep.subr.bf16.mxu1 %v6122_v9  ;;  %v2496_v58 = vrot.slane %v5633_v49, 5  ;;  %v3459_v9 = vsel %vm6160_vm2, %v5845_v51, %v3458_v45  ;;  %v3462_v1 = vsel %vm6160_vm2, %v3460_v56, %v3461_v57  ;;  %v5636_v45 = vld [vmem:[%s6167_s20 + $0xe0] sm:$0xf] }
 0x18f   : > { %v1271_v63 = vpop.permute.xlu1 %1270  ;;  %1912 = vrot.lane.b32.xlu0 %v1761_v55, %s6121_s23  ;;  %v5693_v55 = vld [vmem:[%s6167_s20 + $0x40] sm:$0xf]  ;;  %v5695_v51 = vld [vmem:[%s6167_s20 + $0x48] sm:$0xf] }
 0x190   : > { %1410 = vst.msk [vmem:[#allocation2 + $0x208] sm:$0xf] %vm1344_vm5, %v1271_v63  ;;  %4516 = vmatpush2.bf16.msra.mxu0 %v6035_v54  ;;  %6005 = vmatpush2.bf16.msra.mxu1 %v6035_v54  ;;  %v5524_v63 = vld [vmem:[%s6167_s20 + $0x30] sm:$0xf]  ;;  %v2498_v2 = vrot.slane %v2496_v58, 4  ;;  %v2497_v7 = vsel %vm6160_vm2, %v2495_v61, %v2496_v58 }
 0x191   : > { %1914 = vrot.lane.b32.xlu1 %v1764_v60, %s6121_s23  ;;  %v1273_v5 = vpop.permute.xlu0 %1272  ;;  %v5634_v60 = vld [vmem:[%s6167_s20 + $0xd8] sm:$0x1]  ;;  %2148 = vst.msk [vmem:[#allocation2 + $0x14] sm:$0xf] %vm267_vm3, %v5524_v63  ;;  %v7340_v58 = vld [vmem:[%s6167_s20 + $0xe4] sm:$0xf] }
 0x192   : > { %1411 = vst.msk [vmem:[#allocation2 + $0x210] sm:$0xf] %vm1344_vm5, %v1273_v5  ;;  %v5527_v63 = vld [vmem:[%s6167_s20 + $0x40] sm:$0xf] }
 0x193   : > { %v1275_v15 = vpop.permute.xlu1 %1274  ;;  %1916 = vrot.lane.b32.xlu0 %v1768_v3, %s6121_s23  ;;  %v2499_v3 = vrot.slane %v5634_v60, 5  ;;  %v5526_v60 = vld [vmem:[%s6167_s20 + $0x3c] sm:$0xf]  ;;  %2151 = vst.msk [vmem:[#allocation2 + $0x2c] sm:$0xf] %vm267_vm3, %v5527_v63 }
 0x194   : > { %1412 = vst.msk [vmem:[#allocation2 + $0x218] sm:$0xf] %vm1344_vm5, %v1275_v15  ;;  %v5803_v15 = vld [vmem:[%s6167_s20 + $0xe8] sm:$0xf] }
 0x195   : > { %1918 = vrot.lane.b32.xlu1 %v1771_v10, %s6121_s23  ;;  %v1805_v20 = vpop.permute.xlu0 %1804  ;;  %v7287_v10 = vld [vmem:[%s6167_s20 + $0xe4] sm:$0xf]  ;;  %v2500_v11 = vsel %vm6160_vm2, %v2498_v2, %v2499_v3  ;;  %v3568_v24 = vrot.slane %v5803_v15, 5  ;;  %2150 = vst.msk [vmem:[#allocation2 + $0x24] sm:$0xf] %vm267_vm3, %v5526_v60 }
 0x196   : > { %2009 = vst.msk [vmem:[#allocation2] sm:$0xf] %vm2008_vm6, %v1805_v20  ;;  %v3565_v19 = vrot.slane %v7287_v10, 5  ;;  %v5596_v2 = vld [vmem:[%s6167_s20 + $0x40] sm:$0xf] }
 0x197   : > { %v1807_v27 = vpop.permute.xlu1 %1806  ;;  %1920 = vrot.lane.b32.xlu0 %v1774_v18, %s6121_s23  ;;  %v2391_v18 = vrot.slane %v2389_v35, 4  ;;  %v3570_v32 = vrot.slane %v3568_v24, 4  ;;  %v5763_v35 = vld [vmem:[%s6167_s20 + $0x48] sm:$0xf] }
 0x198   : > { %2010 = vst.msk [vmem:[#allocation2 + $0x8] sm:$0xf] %vm2008_vm6, %v1807_v27  ;;  %v5804_v27 = vld [vmem:[%s6167_s20 + $0xec] sm:$0x1]  ;;  %v5529_v63 = vld [vmem:[%s6167_s20 + $0x48] sm:$0xf] }
 0x199   : > { %1922 = vrot.lane.b32.xlu1 %v1777_v23, %s6121_s23  ;;  %v1809_v31 = vpop.permute.xlu0 %1808  ;;  %v2395_v23 = vrot.slane %v5594_v14, 5  ;;  %v2393_v28 = vsel %vm6160_vm2, %v2391_v18, %v2392_v12  ;;  %v5806_v12 = vld [vmem:[%s6167_s20 + $0xf4] sm:$0xf]  ;;  %2153 = vst.msk [vmem:[#allocation2 + $0x3c] sm:$0xf] %vm267_vm3, %v5529_v63 }
 0x19a   : > { %2011 = vst.msk [vmem:[#allocation2 + $0x10] sm:$0xf] %vm2008_vm6, %v1809_v31  ;;  %v5729_v18 = vld [vmem:[%s6167_s20 + $0xf4] sm:$0xf] }
 0x19b   : > { %v1811_v36 = vpop.permute.xlu1 %1810  ;;  %1924 = vrot.lane.b32.xlu0 %v1781_v29, %s6121_s23  ;;  %v3567_v29 = vrot.slane %v3565_v19, 4  ;;  %v2396_v31 = vsel %vm6160_vm2, %v2394_v22, %v2395_v23  ;;  %v3575_v22 = vrot.slane %v5806_v12, 5 }
 0x19c   : > { %2012 = vst.msk [vmem:[#allocation2 + $0x18] sm:$0xf] %vm2008_vm6, %v1811_v36 }
 0x19d   : > { %1926 = vrot.lane.b32.xlu1 %v1784_v33, %s6121_s23  ;;  %v1813_v40 = vpop.permute.xlu0 %1812  ;;  %v3571_v33 = vrot.slane %v5804_v27, 5  ;;  %v3569_v36 = vsel %vm6160_vm2, %v3567_v29, %v3568_v24  ;;  %v7380_v24 = vld [vmem:[%s6167_s20 + $0xf8] sm:$0xf] }
 0x19e   : > { %2013 = vst.msk [vmem:[#allocation2 + $0x20] sm:$0xf] %vm2008_vm6, %v1813_v40  ;;  %v3464_v40 = vrot.slane %v5763_v35, 5 }
 0x19f   : > { %v1815_v47 = vpop.permute.xlu1 %1814  ;;  %2605 = vrot.lane.b32.xlu0 %v2387_v38, %s6119_s21  ;;  %v5558_v38 = vld [vmem:[%s6167_s20 + $0xdc] sm:$0xf]  ;;  %v3572_v39 = vsel %vm6160_vm2, %v3570_v32, %v3571_v33  ;;  %v5766_v33 = vld [vmem:[%s6167_s20 + $0x54] sm:$0xf] }
 0x1a0   : > { %2014 = vst.msk [vmem:[#allocation2 + $0x28] sm:$0xf] %vm2008_vm6, %v1815_v47  ;;  %v3463_v47 = vrot.slane %v3461_v57, 4 }
 0x1a1   : > { %2607 = vrot.lane.b32.xlu1 %v2390_v44, %s6119_s21  ;;  %v1817_v53 = vpop.permute.xlu0 %1816  ;;  %2182 = vst.msk [vmem:[#allocation2 + $0x124] sm:$0xf] %vm267_vm3, %v5558_v38  ;;  %v5764_v44 = vld [vmem:[%s6167_s20 + $0x4c] sm:$0x1] }
 0x1a2   : > { %2015 = vst.msk [vmem:[#allocation2 + $0x30] sm:$0xf] %vm2008_vm6, %v1817_v53  ;;  %v3466_v53 = vrot.slane %v3464_v40, 4  ;;  %v3467_v54 = vrot.slane %v5764_v44, 5  ;;  %v3465_v48 = vsel %vm6160_vm2, %v3463_v47, %v3464_v40  ;;  %v5561_v40 = vld [vmem:[%s6167_s20 + $0xe8] sm:$0xf] }
 0x1a3   : > { %v1819_v59 = vpop.permute.xlu1 %1818  ;;  %3014 = vrot.lane.b32.xlu0 %v5692_v50, %s6120_s22  ;;  %v5635_v50 = vld [vmem:[%s6167_s20 + $0xdc] sm:$0xe]  ;;  %v5638_v44 = vld [vmem:[%s6167_s20 + $0xe8] sm:$0xf]  ;;  %2185 = vst.msk [vmem:[#allocation2 + $0x13c] sm:$0xf] %vm267_vm3, %v5561_v40 }
 0x1a4   : > { %2016 = vst.msk [vmem:[#allocation2 + $0x38] sm:$0xf] %vm2008_vm6, %v1819_v59  ;;  %v5684_v57 = vrot.slane %v5635_v50, 9 }
 0x1a5   : > { %3016 = vrot.lane.b32.xlu1 %v5693_v55, %s6120_s22  ;;  %v1821_v62 = vpop.permute.xlu0 %1820  ;;  %v2503_v55 = vrot.slane %v5636_v45, 5  ;;  %v5696_v45 = vld [vmem:[%s6167_s20 + $0x50] sm:$0xf] }
 0x1a6   : > { %2017 = vst.msk [vmem:[#allocation2 + $0x40] sm:$0xf] %vm2008_vm6, %v1821_v62  ;;  %v2506_v62 = vrot.slane %v7340_v58, 5 }
 0x1a7   : > { %v1823_v5 = vpop.permute.xlu1 %1822  ;;  %3677 = vrot.lane.b32.xlu0 %v3459_v9, %s6121_s23  ;;  %v3468_v9 = vsel %vm6160_vm2, %v3466_v53, %v3467_v54  ;;  %v2505_v61 = vrot.slane %v2503_v55, 4  ;;  %v2504_v3 = vsel %vm6160_vm2, %v5684_v57, %v2503_v55  ;;  %v2509_v53 = vrot.slane %v5638_v44, 5  ;;  %v5639_v55 = vld [vmem:[%s6167_s20 + $0xec] sm:$0x1]  ;;  %v5640_v44 = vld [vmem:[%s6167_s20 + $0xf0] sm:$0xe] }
 0x1a8   : > { %2018 = vst.msk [vmem:[#allocation2 + $0x48] sm:$0xf] %vm2008_vm6, %v1823_v5  ;;  %v5595_v5 = vld [vmem:[%s6167_s20 + $0x3c] sm:$0xe] }
 0x1a9   : > { %3679 = vrot.lane.b32.xlu1 %v3462_v1, %s6121_s23  ;;  %v1825_v8 = vpop.permute.xlu0 %1824  ;;  %v2507_v6 = vsel %vm6160_vm2, %v2505_v61, %v2506_v62  ;;  %v5676_v14 = vrot.slane %v5595_v5, 9  ;;  %v2512_v61 = vrot.slane %v5639_v55, 5  ;;  %v5530_v55 = vld [vmem:[%s6167_s20 + $0x50] sm:$0xf] }
 0x1aa   : > { %2019 = vst.msk [vmem:[#allocation2 + $0x50] sm:$0xf] %vm2008_vm6, %v1825_v8 }
 0x1ab   : > { %v1827_v13 = vpop.permute.xlu1 %1826  ;;  %2673 = vrot.lane.b32.xlu0 %v2497_v7, %s6119_s21  ;;  %v2399_v7 = vrot.slane %v5596_v2, 5  ;;  %2154 = vst.msk [vmem:[#allocation2 + $0x44] sm:$0xf] %vm267_vm3, %v5530_v55 }
 0x1ac   : > { %2020 = vst.msk [vmem:[#allocation2 + $0x58] sm:$0xf] %vm2008_vm6, %v1827_v13  ;;  %v5728_v13 = vld [vmem:[%s6167_s20 + $0xf0] sm:$0xf] }
 0x1ad   : > { %2675 = vrot.lane.b32.xlu1 %v2500_v11, %s6119_s21  ;;  %v1829_v20 = vpop.permute.xlu0 %1828  ;;  %v7368_v11 = vld [vmem:[%s6167_s20 + $0x44] sm:$0xf] }
 0x1ae   : > { %2021 = vst.msk [vmem:[#allocation2 + $0x60] sm:$0xf] %vm2008_vm6, %v1829_v20  ;;  %v2401_v20 = vrot.slane %v2399_v7, 4 }
 0x1af   : > { %v1831_v26 = vpop.permute.xlu1 %1830  ;;  %3082 = vrot.lane.b32.xlu0 %v5726_v17, %s6120_s22  ;;  %v5805_v17 = vld [vmem:[%s6167_s20 + $0xf0] sm:$0xe] }
 0x1b0   : > { %2022 = vst.msk [vmem:[#allocation2 + $0x68] sm:$0xf] %vm2008_vm6, %v1831_v26  ;;  %v2400_v26 = vsel %vm6160_vm2, %v5676_v14, %v2399_v7  ;;  %v5854_v27 = vrot.slane %v5805_v17, 9  ;;  %v5808_v7 = vld [vmem:[%s6167_s20 + $0xfc] sm:$0xf] }
 0x1b1   : > { %3084 = vrot.lane.b32.xlu1 %v5727_v21, %s6120_s22  ;;  %v1833_v30 = vpop.permute.xlu0 %1832  ;;  %v2402_v21 = vrot.slane %v7368_v11, 5  ;;  %v5731_v14 = vld [vmem:[%s6167_s20 + $0xfc] sm:$0xf] }
 0x1b2   : > { %2023 = vst.msk [vmem:[#allocation2 + $0x70] sm:$0xf] %vm2008_vm6, %v1833_v30  ;;  %v3577_v30 = vrot.slane %v3575_v22, 4 }
 0x1b3   : > { %v1835_v34 = vpop.permute.xlu1 %1834  ;;  %2609 = vrot.lane.b32.xlu0 %v2393_v28, %s6119_s21  ;;  %v2403_v29 = vsel %vm6160_vm2, %v2401_v20, %v2402_v21  ;;  %v2404_v12 = vrot.slane %v2402_v21, 4 }
 0x1b4   : > { %2024 = vst.msk [vmem:[#allocation2 + $0x78] sm:$0xf] %vm2008_vm6, %v1835_v34  ;;  %v3576_v34 = vsel %vm6160_vm2, %v5854_v27, %v3575_v22  ;;  %v5809_v22 = vld [vmem:[%s6167_s20 + $0x100] sm:$0x1] }
 0x1b5   : > { %2611 = vrot.lane.b32.xlu1 %v2396_v31, %s6119_s21  ;;  %v1837_v37 = vpop.permute.xlu0 %1836  ;;  %v3578_v31 = vrot.slane %v7380_v24, 5 }
 0x1b6   : > { %2025 = vst.msk [vmem:[#allocation2 + $0x80] sm:$0xf] %vm2008_vm6, %v1837_v37  ;;  %v5560_v37 = vld [vmem:[%s6167_s20 + $0xe4] sm:$0xf] }
 0x1b7   : > { %v1839_v43 = vpop.permute.xlu1 %1838  ;;  %3745 = vrot.lane.b32.xlu0 %v3569_v36, %s6121_s23  ;;  %v5765_v36 = vld [vmem:[%s6167_s20 + $0x50] sm:$0xe]  ;;  %v3579_v38 = vsel %vm6160_vm2, %v3577_v30, %v3578_v31  ;;  %2184 = vst.msk [vmem:[#allocation2 + $0x134] sm:$0xf] %vm267_vm3, %v5560_v37  ;;  %v3580_v21 = vrot.slane %v3578_v31, 4 }
 0x1b8   : > { %2026 = vst.msk [vmem:[#allocation2 + $0x88] sm:$0xf] %vm2008_vm6, %v1839_v43  ;;  %v7409_v43 = vld [vmem:[%s6167_s20 + $0x58] sm:$0xf]  ;;  %v5768_v30 = vld [vmem:[%s6167_s20 + $0x5c] sm:$0xf] }
 0x1b9   : > { %3747 = vrot.lane.b32.xlu1 %v3572_v39, %s6121_s23  ;;  %v1841_v49 = vpop.permute.xlu0 %1840  ;;  %v3471_v39 = vrot.slane %v5766_v33, 5  ;;  %v5769_v37 = vld [vmem:[%s6167_s20 + $0x60] sm:$0x1] }
 0x1ba   : > { %2027 = vst.msk [vmem:[#allocation2 + $0x90] sm:$0xf] %vm2008_vm6, %v1841_v49  ;;  %v5697_v49 = vld [vmem:[%s6167_s20 + $0x54] sm:$0xf] }
 0x1bb   : > { %v1843_v56 = vpop.permute.xlu1 %1842  ;;  %3018 = vrot.lane.b32.xlu0 %v5694_v46, %s6120_s22  ;;  %v5846_v46 = vrot.slane %v5765_v36, 9  ;;  %v3473_v50 = vrot.slane %v3471_v39, 4 }
 0x1bc   : > { %2028 = vst.msk [vmem:[#allocation2 + $0x98] sm:$0xf] %vm2008_vm6, %v1843_v56 }
 0x1bd   : > { %3020 = vrot.lane.b32.xlu1 %v5695_v51, %s6120_s22  ;;  %v1845_v59 = vpop.permute.xlu0 %1844  ;;  %v3474_v51 = vrot.slane %v7409_v43, 5  ;;  %v3472_v56 = vsel %vm6160_vm2, %v5846_v46, %v3471_v39  ;;  %v5698_v39 = vld [vmem:[%s6167_s20 + $0x58] sm:$0xf] }
 0x1be   : > { %2029 = vst.msk [vmem:[#allocation2 + $0xa0] sm:$0xf] %vm2008_vm6, %v1845_v59  ;;  %v5528_v59 = vld [vmem:[%s6167_s20 + $0x44] sm:$0xf] }
 0x1bf   : > { %v1847_v1 = vpop.permute.xlu1 %1846  ;;  %3681 = vrot.lane.b32.xlu0 %v3465_v48, %s6121_s23  ;;  %v2508_v48 = vrot.slane %v2506_v62, 4  ;;  %v3475_v60 = vsel %vm6160_vm2, %v3473_v50, %v3474_v51  ;;  %2152 = vst.msk [vmem:[#allocation2 + $0x34] sm:$0xf] %vm267_vm3, %v5528_v59  ;;  %v5598_v62 = vld [vmem:[%s6167_s20 + $0x48] sm:$0xf]  ;;  %v3476_v40 = vrot.slane %v3474_v51, 4 }
 0x1c0   : > { %2030 = vst.msk [vmem:[#allocation2 + $0xa8] sm:$0xf] %vm2008_vm6, %v1847_v1  ;;  %v5685_v51 = vrot.slane %v5640_v44, 9  ;;  %v5531_v59 = vld [vmem:[%s6167_s20 + $0x54] sm:$0xf] }
 0x1c1   : > { %3683 = vrot.lane.b32.xlu1 %v3468_v9, %s6121_s23  ;;  %v1849_v4 = vpop.permute.xlu0 %1848  ;;  %v2511_v9 = vrot.slane %v2509_v53, 4  ;;  %v2510_v1 = vsel %vm6160_vm2, %v2508_v48, %v2509_v53  ;;  %v7492_v53 = vld [vmem:[%s6167_s20 + $0xf8] sm:$0xf]  ;;  %2155 = vst.msk [vmem:[#allocation2 + $0x4c] sm:$0xf] %vm267_vm3, %v5531_v59 }
 0x1c2   : > { %2031 = vst.msk [vmem:[#allocation2 + $0xb0] sm:$0xf] %vm2008_vm6, %v1849_v4  ;;  %v2405_v4 = vrot.slane %v5598_v62, 5  ;;  %v5533_v59 = vld [vmem:[%s6167_s20 + $0x5c] sm:$0xf] }
 0x1c3   : > { %v1851_v8 = vpop.permute.xlu1 %1850  ;;  %2677 = vrot.lane.b32.xlu0 %v2504_v3, %s6119_s21  ;;  %v2513_v3 = vsel %vm6160_vm2, %v2511_v9, %v2512_v61  ;;  %v5601_v9 = vld [vmem:[%s6167_s20 + $0x54] sm:$0xf]  ;;  %2157 = vst.msk [vmem:[#allocation2 + $0x5c] sm:$0xf] %vm267_vm3, %v5533_v59 }
 0x1c4   : > { %2032 = vst.msk [vmem:[#allocation2 + $0xb8] sm:$0xf] %vm2008_vm6, %v1851_v8  ;;  %v5730_v8 = vld [vmem:[%s6167_s20 + $0xf8] sm:$0xf]  ;;  %v2406_v11 = vsel %vm6160_vm2, %v2404_v12, %v2405_v4  ;;  %v5733_v12 = vld [vmem:[%s6167_s20 + $0x108] sm:$0xf] }
 0x1c5   : > { %2679 = vrot.lane.b32.xlu1 %v2507_v6, %s6119_s21  ;;  %v1853_v15 = vpop.permute.xlu0 %1852  ;;  %v5599_v6 = vld [vmem:[%s6167_s20 + $0x4c] sm:$0x1] }
 0x1c6   : > { %2033 = vst.msk [vmem:[#allocation2 + $0xc0] sm:$0xf] %vm2008_vm6, %v1853_v15  ;;  %v2407_v15 = vrot.slane %v2405_v4, 4  ;;  %v2408_v17 = vrot.slane %v5599_v6, 5  ;;  %v5811_v4 = vld [vmem:[%s6167_s20 + $0x108] sm:$0xf] }
 0x1c7   : > { %v1855_v23 = vpop.permute.xlu1 %1854  ;;  %3086 = vrot.lane.b32.xlu0 %v5728_v13, %s6120_s22 }
 0x1c8   : > { %2034 = vst.msk [vmem:[#allocation2 + $0xc8] sm:$0xf] %vm2008_vm6, %v1855_v23 }
 0x1c9   : > { %3088 = vrot.lane.b32.xlu1 %v5729_v18, %s6120_s22  ;;  %v1857_v28 = vpop.permute.xlu0 %1856  ;;  %v3581_v18 = vrot.slane %v5808_v7, 5 }
 0x1ca   : > { %2035 = vst.msk [vmem:[#allocation2 + $0xd0] sm:$0xf] %vm2008_vm6, %v1857_v28  ;;  %v3584_v28 = vrot.slane %v5809_v22, 5 }
 0x1cb   : > { %v1859_v32 = vpop.permute.xlu1 %1858  ;;  %2613 = vrot.lane.b32.xlu0 %v2400_v26, %s6119_s21  ;;  %v2409_v26 = vsel %vm6160_vm2, %v2407_v15, %v2408_v17  ;;  %v3583_v27 = vrot.slane %v3581_v18, 4  ;;  %v3582_v24 = vsel %vm6160_vm2, %v3580_v21, %v3581_v18  ;;  %v3588_v15 = vrot.slane %v5811_v4, 5  ;;  %v7532_v18 = vld [vmem:[%s6167_s20 + $0x10c] sm:$0xf] }
 0x1cc   : > { %2036 = vst.msk [vmem:[#allocation2 + $0xd8] sm:$0xf] %vm2008_vm6, %v1859_v32  ;;  %v5562_v32 = vld [vmem:[%s6167_s20 + $0xf0] sm:$0xf] }
 0x1cd   : > { %2615 = vrot.lane.b32.xlu1 %v2403_v29, %s6119_s21  ;;  %v1861_v35 = vpop.permute.xlu0 %1860  ;;  %v3585_v33 = vsel %vm6160_vm2, %v3583_v27, %v3584_v28  ;;  %2186 = vst.msk [vmem:[#allocation2 + $0x144] sm:$0xf] %vm267_vm3, %v5562_v32  ;;  %v5771_v28 = vld [vmem:[%s6167_s20 + $0x68] sm:$0xf] }
 0x1ce   : > { %2037 = vst.msk [vmem:[#allocation2 + $0xe0] sm:$0xf] %vm2008_vm6, %v1861_v35  ;;  %v5563_v35 = vld [vmem:[%s6167_s20 + $0xf4] sm:$0xf] }
 0x1cf   : > { %v1863_v42 = vpop.permute.xlu1 %1862  ;;  %3749 = vrot.lane.b32.xlu0 %v3576_v34, %s6121_s23  ;;  %v3477_v34 = vrot.slane %v5768_v30, 5  ;;  %2187 = vst.msk [vmem:[#allocation2 + $0x14c] sm:$0xf] %vm267_vm3, %v5563_v35 }
 0x1d0   : > { %2038 = vst.msk [vmem:[#allocation2 + $0xe8] sm:$0xf] %vm2008_vm6, %v1863_v42 }
 0x1d1   : > { %3751 = vrot.lane.b32.xlu1 %v3579_v38, %s6121_s23  ;;  %v1865_v47 = vpop.permute.xlu0 %1864  ;;  %v5641_v38 = vld [vmem:[%s6167_s20 + $0xf4] sm:$0xf]  ;;  %v3479_v46 = vrot.slane %v3477_v34, 4  ;;  %v3478_v43 = vsel %vm6160_vm2, %v3476_v40, %v3477_v34  ;;  %v5565_v34 = vld [vmem:[%s6167_s20 + $0xfc] sm:$0xf] }
 0x1d2   : > { %2039 = vst.msk [vmem:[#allocation2 + $0xf0] sm:$0xf] %vm2008_vm6, %v1865_v47  ;;  %v3480_v47 = vrot.slane %v5769_v37, 5  ;;  %v5643_v37 = vld [vmem:[%s6167_s20 + $0xfc] sm:$0xf] }
 0x1d3   : > { %v1867_v54 = vpop.permute.xlu1 %1866  ;;  %3022 = vrot.lane.b32.xlu0 %v5696_v45, %s6120_s22  ;;  %v5699_v45 = vld [vmem:[%s6167_s20 + $0x5c] sm:$0xf]  ;;  %2189 = vst.msk [vmem:[#allocation2 + $0x15c] sm:$0xf] %vm267_vm3, %v5565_v34 }
 0x1d4   : > { %2040 = vst.msk [vmem:[#allocation2 + $0xf8] sm:$0xf] %vm2008_vm6, %v1867_v54 }
 0x1d5   : > { %3024 = vrot.lane.b32.xlu1 %v5697_v49, %s6120_s22  ;;  %v1869_v57 = vpop.permute.xlu0 %1868  ;;  %v2516_v49 = vrot.slane %v5641_v38, 5  ;;  %v5700_v38 = vld [vmem:[%s6167_s20 + $0x64] sm:$0xf] }
 0x1d6   : > { %2041 = vst.msk [vmem:[#allocation2 + $0x100] sm:$0xf] %vm2008_vm6, %v1869_v57  ;;  %v2519_v57 = vrot.slane %v7492_v53, 5 }
 0x1d7   : > { %v1871_v58 = vpop.permute.xlu1 %1870  ;;  %3685 = vrot.lane.b32.xlu0 %v3472_v56, %s6121_s23  ;;  %v3481_v56 = vsel %vm6160_vm2, %v3479_v46, %v3480_v47  ;;  %v2518_v48 = vrot.slane %v2516_v49, 4  ;;  %v2517_v61 = vsel %vm6160_vm2, %v5685_v51, %v2516_v49  ;;  %v2522_v46 = vrot.slane %v5643_v37, 5  ;;  %v5644_v49 = vld [vmem:[%s6167_s20 + $0x100] sm:$0x1]  ;;  %v5645_v37 = vld [vmem:[%s6167_s20 + $0x104] sm:$0xe] }
 0x1d8   : > { %2042 = vst.msk [vmem:[#allocation2 + $0x108] sm:$0xf] %vm2008_vm6, %v1871_v58  ;;  %v5600_v58 = vld [vmem:[%s6167_s20 + $0x50] sm:$0xe] }
 0x1d9   : > { %3687 = vrot.lane.b32.xlu1 %v3475_v60, %s6121_s23  ;;  %v1873_v2 = vpop.permute.xlu0 %1872  ;;  %v2520_v62 = vsel %vm6160_vm2, %v2518_v48, %v2519_v57  ;;  %v5677_v6 = vrot.slane %v5600_v58, 9  ;;  %v2525_v48 = vrot.slane %v5644_v49, 5  ;;  %v5534_v49 = vld [vmem:[%s6167_s20 + $0x64] sm:$0xf] }
 0x1da   : > { %2043 = vst.msk [vmem:[#allocation2 + $0x110] sm:$0xf] %vm2008_vm6, %v1873_v2 }
 0x1db   : > { %v1875_v5 = vpop.permute.xlu1 %1874  ;;  %2681 = vrot.lane.b32.xlu0 %v2510_v1, %s6119_s21  ;;  %v2412_v1 = vrot.slane %v5601_v9, 5  ;;  %2158 = vst.msk [vmem:[#allocation2 + $0x64] sm:$0xf] %vm267_vm3, %v5534_v49 }
 0x1dc   : > { %2044 = vst.msk [vmem:[#allocation2 + $0x118] sm:$0xf] %vm2008_vm6, %v1875_v5  ;;  %v5732_v5 = vld [vmem:[%s6167_s20 + $0x104] sm:$0xf] }
 0x1dd   : > { %2683 = vrot.lane.b32.xlu1 %v2513_v3, %s6119_s21  ;;  %v1877_v13 = vpop.permute.xlu0 %1876  ;;  %v7520_v3 = vld [vmem:[%s6167_s20 + $0x58] sm:$0xf] }
 0x1de   : > { %2045 = vst.msk [vmem:[#allocation2 + $0x120] sm:$0xf] %vm2008_vm6, %v1877_v13  ;;  %v2414_v13 = vrot.slane %v2412_v1, 4 }
 0x1df   : > { %v1879_v20 = vpop.permute.xlu1 %1878  ;;  %3090 = vrot.lane.b32.xlu0 %v5730_v8, %s6120_s22  ;;  %v5810_v8 = vld [vmem:[%s6167_s20 + $0x104] sm:$0xe] }
 0x1e0   : > { %2046 = vst.msk [vmem:[#allocation2 + $0x128] sm:$0xf] %vm2008_vm6, %v1879_v20  ;;  %v2413_v20 = vsel %vm6160_vm2, %v5677_v6, %v2412_v1  ;;  %v5855_v22 = vrot.slane %v5810_v8, 9  ;;  %v5813_v1 = vld [vmem:[%s6167_s20 + $0x110] sm:$0xf] }
 0x1e1   : > { %3092 = vrot.lane.b32.xlu1 %v5731_v14, %s6120_s22  ;;  %v1881_v23 = vpop.permute.xlu0 %1880  ;;  %v2415_v14 = vrot.slane %v7520_v3, 5  ;;  %v5735_v6 = vld [vmem:[%s6167_s20 + $0x110] sm:$0xf] }
 0x1e2   : > { %2047 = vst.msk [vmem:[#allocation2 + $0x130] sm:$0xf] %vm2008_vm6, %v1881_v23  ;;  %v3590_v23 = vrot.slane %v3588_v15, 4 }
 0x1e3   : > { %v1883_v29 = vpop.permute.xlu1 %1882  ;;  %2617 = vrot.lane.b32.xlu0 %v2406_v11, %s6119_s21  ;;  %v2416_v21 = vsel %vm6160_vm2, %v2414_v13, %v2415_v14  ;;  %v2417_v4 = vrot.slane %v2415_v14, 4 }
 0x1e4   : > { %2048 = vst.msk [vmem:[#allocation2 + $0x138] sm:$0xf] %vm2008_vm6, %v1883_v29  ;;  %v3589_v29 = vsel %vm6160_vm2, %v5855_v22, %v3588_v15  ;;  %v5814_v15 = vld [vmem:[%s6167_s20 + $0x114] sm:$0x1] }
 0x1e5   : > { %2619 = vrot.lane.b32.xlu1 %v2409_v26, %s6119_s21  ;;  %v1885_v31 = vpop.permute.xlu0 %1884  ;;  %v3591_v26 = vrot.slane %v7532_v18, 5 }
 0x1e6   : > { %2049 = vst.msk [vmem:[#allocation2 + $0x140] sm:$0xf] %vm2008_vm6, %v1885_v31  ;;  %v5564_v31 = vld [vmem:[%s6167_s20 + $0xf8] sm:$0xf] }
 0x1e7   : > { %v1887_v36 = vpop.permute.xlu1 %1886  ;;  %3753 = vrot.lane.b32.xlu0 %v3582_v24, %s6121_s23  ;;  %v5770_v24 = vld [vmem:[%s6167_s20 + $0x64] sm:$0xe]  ;;  %v3592_v32 = vsel %vm6160_vm2, %v3590_v23, %v3591_v26  ;;  %2188 = vst.msk [vmem:[#allocation2 + $0x154] sm:$0xf] %vm267_vm3, %v5564_v31  ;;  %v3593_v14 = vrot.slane %v3591_v26, 4 }
 0x1e8   : > { %2050 = vst.msk [vmem:[#allocation2 + $0x148] sm:$0xf] %vm2008_vm6, %v1887_v36  ;;  %v7561_v36 = vld [vmem:[%s6167_s20 + $0x6c] sm:$0xf]  ;;  %v5773_v23 = vld [vmem:[%s6167_s20 + $0x70] sm:$0xf] }
 0x1e9   : > { %3755 = vrot.lane.b32.xlu1 %v3585_v33, %s6121_s23  ;;  %v1889_v42 = vpop.permute.xlu0 %1888  ;;  %v3484_v33 = vrot.slane %v5771_v28, 5  ;;  %v5774_v31 = vld [vmem:[%s6167_s20 + $0x74] sm:$0x1] }
 0x1ea   : > { %2051 = vst.msk [vmem:[#allocation2 + $0x150] sm:$0xf] %vm2008_vm6, %v1889_v42  ;;  %v5701_v42 = vld [vmem:[%s6167_s20 + $0x68] sm:$0xf] }
 0x1eb   : > { %v1891_v50 = vpop.permute.xlu1 %1890  ;;  %3026 = vrot.lane.b32.xlu0 %v5698_v39, %s6120_s22  ;;  %v5847_v39 = vrot.slane %v5770_v24, 9  ;;  %v3486_v44 = vrot.slane %v3484_v33, 4 }
 0x1ec   : > { %2052 = vst.msk [vmem:[#allocation2 + $0x158] sm:$0xf] %vm2008_vm6, %v1891_v50 }
 0x1ed   : > { %3028 = vrot.lane.b32.xlu1 %v5699_v45, %s6120_s22  ;;  %v1893_v54 = vpop.permute.xlu0 %1892  ;;  %v3487_v45 = vrot.slane %v7561_v36, 5  ;;  %v3485_v50 = vsel %vm6160_vm2, %v5847_v39, %v3484_v33  ;;  %v5702_v33 = vld [vmem:[%s6167_s20 + $0x6c] sm:$0xf] }
 0x1ee   : > { %2053 = vst.msk [vmem:[#allocation2 + $0x160] sm:$0xf] %vm2008_vm6, %v1893_v54  ;;  %v5532_v54 = vld [vmem:[%s6167_s20 + $0x58] sm:$0xf] }
 0x1ef   : > { %v1895_v60 = vpop.permute.xlu1 %1894  ;;  %3689 = vrot.lane.b32.xlu0 %v3478_v43, %s6121_s23  ;;  %v2521_v43 = vrot.slane %v2519_v57, 4  ;;  %v3488_v55 = vsel %vm6160_vm2, %v3486_v44, %v3487_v45  ;;  %2156 = vst.msk [vmem:[#allocation2 + $0x54] sm:$0xf] %vm267_vm3, %v5532_v54  ;;  %v5603_v57 = vld [vmem:[%s6167_s20 + $0x5c] sm:$0xf]  ;;  %v3489_v34 = vrot.slane %v3487_v45, 4 }
 0x1f0   : > { %2054 = vst.msk [vmem:[#allocation2 + $0x168] sm:$0xf] %vm2008_vm6, %v1895_v60  ;;  %v5686_v45 = vrot.slane %v5645_v37, 9  ;;  %v5535_v54 = vld [vmem:[%s6167_s20 + $0x68] sm:$0xf] }
 0x1f1   : > { %3691 = vrot.lane.b32.xlu1 %v3481_v56, %s6121_s23  ;;  %v1897_v63 = vpop.permute.xlu0 %1896  ;;  %v2524_v56 = vrot.slane %v2522_v46, 4  ;;  %v2523_v60 = vsel %vm6160_vm2, %v2521_v43, %v2522_v46  ;;  %v7644_v46 = vld [vmem:[%s6167_s20 + $0x10c] sm:$0xf]  ;;  %2159 = vst.msk [vmem:[#allocation2 + $0x6c] sm:$0xf] %vm267_vm3, %v5535_v54 }
 0x1f2   : > { %2055 = vst.msk [vmem:[#allocation2 + $0x170] sm:$0xf] %vm2008_vm6, %v1897_v63  ;;  %v2418_v63 = vrot.slane %v5603_v57, 5  ;;  %v5536_v54 = vld [vmem:[%s6167_s20 + $0x6c] sm:$0xf] }
 0x1f3   : > { %v1899_v2 = vpop.permute.xlu1 %1898  ;;  %2685 = vrot.lane.b32.xlu0 %v2517_v61, %s6119_s21  ;;  %v2526_v61 = vsel %vm6160_vm2, %v2524_v56, %v2525_v48  ;;  %v5606_v56 = vld [vmem:[%s6167_s20 + $0x68] sm:$0xf]  ;;  %2160 = vst.msk [vmem:[#allocation2 + $0x74] sm:$0xf] %vm267_vm3, %v5536_v54 }
 0x1f4   : > { %2056 = vst.msk [vmem:[#allocation2 + $0x178] sm:$0xf] %vm2008_vm6, %v1899_v2  ;;  %v5734_v2 = vld [vmem:[%s6167_s20 + $0x10c] sm:$0xf]  ;;  %v2419_v3 = vsel %vm6160_vm2, %v2417_v4, %v2418_v63 }
 0x1f5   : > { %2687 = vrot.lane.b32.xlu1 %v2520_v62, %s6119_s21  ;;  %v1901_v7 = vpop.permute.xlu0 %1900  ;;  %v5604_v62 = vld [vmem:[%s6167_s20 + $0x60] sm:$0x1] }
 0x1f6   : > { %2057 = vst.msk [vmem:[#allocation2 + $0x180] sm:$0xf] %vm2008_vm6, %v1901_v7  ;;  %v2420_v7 = vrot.slane %v2418_v63, 4  ;;  %v2421_v8 = vrot.slane %v5604_v62, 5 }
 0x1f7   : > { %v1903_v17 = vpop.permute.xlu1 %1902  ;;  %3094 = vrot.lane.b32.xlu0 %v5732_v5, %s6120_s22 }
 0x1f8   : > { %2058 = vst.msk [vmem:[#allocation2 + $0x188] sm:$0xf] %vm2008_vm6, %v1903_v17 }
 0x1f9   : > { %3096 = vrot.lane.b32.xlu1 %v5733_v12, %s6120_s22  ;;  %v1905_v11 = vpop.permute.xlu0 %1904  ;;  %v3594_v12 = vrot.slane %v5813_v1, 5  ;;  %v5736_v1 = vld [vmem:[%s6167_s20 + $0x118] sm:$0xf] }
 0x1fa   : > { %2059 = vst.msk [vmem:[#allocation2 + $0x190] sm:$0xf] %vm2008_vm6, %v1905_v11  ;;  %v3597_v11 = vrot.slane %v5814_v15, 5  ;;  %v7684_v15 = vld [vmem:[%s6167_s20 + $0x120] sm:$0xf] }
 0x1fb   : > { %v1907_v27 = vpop.permute.xlu1 %1906  ;;  %2621 = vrot.lane.b32.xlu0 %v2413_v20, %s6119_s21  ;;  %v2422_v20 = vsel %vm6160_vm2, %v2420_v7, %v2421_v8  ;;  %v3596_v22 = vrot.slane %v3594_v12, 4  ;;  %v3595_v18 = vsel %vm6160_vm2, %v3593_v14, %v3594_v12 }
 0x1fc   : > { %2060 = vst.msk [vmem:[#allocation2 + $0x198] sm:$0xf] %vm2008_vm6, %v1907_v27  ;;  %v5566_v27 = vld [vmem:[%s6167_s20 + $0x104] sm:$0xf] }
 0x1fd   : > { %2623 = vrot.lane.b32.xlu1 %v2416_v21, %s6119_s21  ;;  %v1909_v30 = vpop.permute.xlu0 %1908  ;;  %v3598_v28 = vsel %vm6160_vm2, %v3596_v22, %v3597_v11  ;;  %2190 = vst.msk [vmem:[#allocation2 + $0x164] sm:$0xf] %vm267_vm3, %v5566_v27  ;;  %v3604_v11 = vrot.slane %v7684_v15, 5  ;;  %v5775_v27 = vld [vmem:[%s6167_s20 + $0x78] sm:$0xe] }
 0x1fe   : > { %2061 = vst.msk [vmem:[#allocation2 + $0x1a0] sm:$0xf] %vm2008_vm6, %v1909_v30  ;;  %v5567_v30 = vld [vmem:[%s6167_s20 + $0x108] sm:$0xf] }
 0x1ff   : > { %v1911_v35 = vpop.permute.xlu1 %1910  ;;  %3757 = vrot.lane.b32.xlu0 %v3589_v29, %s6121_s23  ;;  %v3490_v29 = vrot.slane %v5773_v23, 5  ;;  %2191 = vst.msk [vmem:[#allocation2 + $0x16c] sm:$0xf] %vm267_vm3, %v5567_v30  ;;  %v5776_v23 = vld [vmem:[%s6167_s20 + $0x7c] sm:$0xf] }
 0x200   : > { %2062 = vst.msk [vmem:[#allocation2 + $0x1a8] sm:$0xf] %vm2008_vm6, %v1911_v35  ;;  %v3497_v30 = vrot.slane %v5776_v23, 5 }
 0x201   : > { %3759 = vrot.lane.b32.xlu1 %v3592_v32, %s6121_s23  ;;  %v1913_v40 = vpop.permute.xlu0 %1912  ;;  %v5646_v32 = vld [vmem:[%s6167_s20 + $0x108] sm:$0xf]  ;;  %v3492_v39 = vrot.slane %v3490_v29, 4  ;;  %v3491_v36 = vsel %vm6160_vm2, %v3489_v34, %v3490_v29  ;;  %v5704_v34 = vld [vmem:[%s6167_s20 + $0x78] sm:$0xf] }
 0x202   : > { %2063 = vst.msk [vmem:[#allocation2 + $0x1b0] sm:$0xf] %vm2008_vm6, %v1913_v40  ;;  %v3493_v40 = vrot.slane %v5774_v31, 5 }
 0x203   : > { %v1915_v47 = vpop.permute.xlu1 %1914  ;;  %3030 = vrot.lane.b32.xlu0 %v5700_v38, %s6120_s22  ;;  %v5703_v38 = vld [vmem:[%s6167_s20 + $0x70] sm:$0xf] }
 0x204   : > { %2064 = vst.msk [vmem:[#allocation2 + $0x1b8] sm:$0xf] %vm2008_vm6, %v1915_v47 }
 0x205   : > { %3032 = vrot.lane.b32.xlu1 %v5701_v42, %s6120_s22  ;;  %v1917_v51 = vpop.permute.xlu0 %1916  ;;  %v2529_v42 = vrot.slane %v5646_v32, 5  ;;  %v7713_v32 = vld [vmem:[%s6167_s20 + $0x80] sm:$0xf] }
 0x206   : > { %2065 = vst.msk [vmem:[#allocation2 + $0x1c0] sm:$0xf] %vm2008_vm6, %v1917_v51  ;;  %v2532_v51 = vrot.slane %v7644_v46, 5  ;;  %v5537_v46 = vld [vmem:[%s6167_s20 + $0x70] sm:$0xf] }
 0x207   : > { %v1919_v53 = vpop.permute.xlu1 %1918  ;;  %3693 = vrot.lane.b32.xlu0 %v3485_v50, %s6121_s23  ;;  %v3494_v50 = vsel %vm6160_vm2, %v3492_v39, %v3493_v40  ;;  %v2531_v43 = vrot.slane %v2529_v42, 4  ;;  %v2530_v48 = vsel %vm6160_vm2, %v5686_v45, %v2529_v42  ;;  %v3499_v39 = vrot.slane %v3497_v30, 4  ;;  %v6039_v45 = vld [vmem:[#allocation2 + $0x110] ss:$8 sps:$4 sm:$0xff]   ;;  %2161 = vst.msk [vmem:[#allocation2 + $0x7c] sm:$0xf] %vm267_vm3, %v5537_v46 }
 0x208   : > { %2066 = vst.msk [vmem:[#allocation2 + $0x1c8] sm:$0xf] %vm2008_vm6, %v1919_v53  ;;  %v5605_v53 = vld [vmem:[%s6167_s20 + $0x64] sm:$0xe]  ;;  %v3500_v40 = vrot.slane %v7713_v32, 5 }
 0x209   : > { %3695 = vrot.lane.b32.xlu1 %v3488_v55, %s6121_s23  ;;  %v1921_v9 = vpop.permute.xlu0 %1920  ;;  %v2533_v57 = vsel %vm6160_vm2, %v2531_v43, %v2532_v51  ;;  %v5538_v46 = vld [vmem:[%s6167_s20 + $0x78] sm:$0xf] }
 0x20a   : > { %2067 = vst.msk [vmem:[#allocation2 + $0x1d0] sm:$0xf] %vm2008_vm6, %v1921_v9  ;;  %v7671_v9 = vld [vmem:[%s6167_s20 + $0x6c] sm:$0xf] }
 0x20b   : > { %v1923_v58 = vpop.permute.xlu1 %1922  ;;  %2689 = vrot.lane.b32.xlu0 %v2523_v60, %s6119_s21  ;;  %v2425_v60 = vrot.slane %v5606_v56, 5  ;;  %v2428_v8 = vrot.slane %v7671_v9, 5  ;;  %2162 = vst.msk [vmem:[#allocation2 + $0x84] sm:$0xf] %vm267_vm3, %v5538_v46 }
 0x20c   : > { %2068 = vst.msk [vmem:[#allocation2 + $0x1d8] sm:$0xf] %vm2008_vm6, %v1923_v58  ;;  %v6036_v58 = vld [vmem:[#allocation2] ss:$8 sps:$4 sm:$0xff]  }
 0x20d   : > { %2691 = vrot.lane.b32.xlu1 %v2526_v61, %s6119_s21  ;;  %v1925_v5 = vpop.permute.xlu0 %1924  ;;  %v5816_v61 = vld [vmem:[%s6167_s20 + $0x11c] sm:$0xf]  ;;  %v2427_v7 = vrot.slane %v2425_v60, 4 }
 0x20e   : > { %2069 = vst.msk [vmem:[#allocation2 + $0x1e0] sm:$0xf] %vm2008_vm6, %v1925_v5  ;;  %v5815_v5 = vld [vmem:[%s6167_s20 + $0x118] sm:$0xe]  ;;  %v3601_v12 = vrot.slane %v5816_v61, 5 }
 0x20f   : > { %v1927_v13 = vpop.permute.xlu1 %1926  ;;  %3098 = vrot.lane.b32.xlu0 %v5734_v2, %s6120_s22  ;;  %v5678_v2 = vrot.slane %v5605_v53, 9  ;;  %v5856_v14 = vrot.slane %v5815_v5, 9  ;;  %v5738_v5 = vld [vmem:[%s6167_s20 + $0x120] sm:$0xf] }
 0x210   : > { %2070 = vst.msk [vmem:[#allocation2 + $0x1e8] sm:$0xf] %vm2008_vm6, %v1927_v13  ;;  %v3603_v22 = vrot.slane %v3601_v12, 4 }
 0x211   : > { %3100 = vrot.lane.b32.xlu1 %v5735_v6, %s6120_s22  ;;  %v2606_v17 = vpop.permute.xlu0 %2605  ;;  %v5737_v6 = vld [vmem:[%s6167_s20 + $0x11c] sm:$0xf] }
 0x212   : > { %2809 = vst.msk [vmem:[#allocation2 + $0x4] sm:$0xf] %vm934_vm4, %v2606_v17  ;;  %v3605_v29 = vsel %vm6160_vm2, %v3603_v22, %v3604_v11  ;;  %v5819_v22 = vld [vmem:[%s6167_s20 + $0x128] sm:$0x1] }
 0x213   : > { %v2608_v21 = vpop.permute.xlu1 %2607  ;;  %2625 = vrot.lane.b32.xlu0 %v2419_v3, %s6119_s21  ;;  %v2426_v3 = vsel %vm6160_vm2, %v5678_v2, %v2425_v60 }
 0x214   : > { %2810 = vst.msk [vmem:[#allocation2 + $0xc] sm:$0xf] %vm934_vm4, %v2608_v21 }
 0x215   : > { %2627 = vrot.lane.b32.xlu1 %v2422_v20, %s6119_s21  ;;  %v3015_v26 = vpop.permute.xlu0 %3014  ;;  %v2429_v20 = vsel %vm6160_vm2, %v2427_v7, %v2428_v8  ;;  %v2430_v7 = vrot.slane %v2428_v8, 4  ;;  %v3606_v8 = vrot.slane %v3604_v11, 4 }
 0x216   : > { %3218 = vst.msk [vmem:[#allocation2 + $0x4] sm:$0xf] %vm1344_vm5, %v3015_v26 }
 0x217   : > { %v3017_v24 = vpop.permute.xlu1 %3016  ;;  %3761 = vrot.lane.b32.xlu0 %v3595_v18, %s6121_s23  ;;  %v3602_v18 = vsel %vm6160_vm2, %v5856_v14, %v3601_v12 }
 0x218   : > { %3219 = vst.msk [vmem:[#allocation2 + $0xc] sm:$0xf] %vm1344_vm5, %v3017_v24  ;;  %v5569_v24 = vld [vmem:[%s6167_s20 + $0x110] sm:$0xf] }
 0x219   : > { %3763 = vrot.lane.b32.xlu1 %v3598_v28, %s6121_s23  ;;  %v3678_v35 = vpop.permute.xlu0 %3677  ;;  %v5568_v28 = vld [vmem:[%s6167_s20 + $0x10c] sm:$0xf]  ;;  %2193 = vst.msk [vmem:[#allocation2 + $0x17c] sm:$0xf] %vm267_vm3, %v5569_v24 }
 0x21a   : > { %3881 = vst.msk [vmem:[#allocation2 + $0x4] sm:$0xf] %vm2008_vm6, %v3678_v35  ;;  %v5848_v35 = vrot.slane %v5775_v27, 9 }
 0x21b   : > { %v3680_v44 = vpop.permute.xlu1 %3679  ;;  %3034 = vrot.lane.b32.xlu0 %v5702_v33, %s6120_s22  ;;  %2192 = vst.msk [vmem:[#allocation2 + $0x174] sm:$0xf] %vm267_vm3, %v5568_v28  ;;  %v5648_v33 = vld [vmem:[%s6167_s20 + $0x110] sm:$0xf]  ;;  %v5778_v28 = vld [vmem:[%s6167_s20 + $0x84] sm:$0xf] }
 0x21c   : > { %3882 = vst.msk [vmem:[#allocation2 + $0xc] sm:$0xf] %vm2008_vm6, %v3680_v44  ;;  %v2535_v42 = vrot.slane %v5648_v33, 5  ;;  %v5649_v44 = vld [vmem:[%s6167_s20 + $0x114] sm:$0x1]  ;;  %v3498_v49 = vsel %vm6160_vm2, %v5848_v35, %v3497_v30  ;;  %v3503_v24 = vrot.slane %v5778_v28, 5 }
 0x21d   : > { %3036 = vrot.lane.b32.xlu1 %v5703_v38, %s6120_s22  ;;  %v2674_v47 = vpop.permute.xlu0 %2673  ;;  %v5705_v38 = vld [vmem:[%s6167_s20 + $0x7c] sm:$0xf] }
 0x21e   : > { %2843 = vst.msk [vmem:[#allocation2 + $0x114] sm:$0xf] %vm934_vm4, %v2674_v47  ;;  %v2537_v56 = vrot.slane %v2535_v42, 4  ;;  %v5651_v35 = vld [vmem:[%s6167_s20 + $0x11c] sm:$0xf] }
 0x21f   : > { %v2676_v55 = vpop.permute.xlu1 %2675  ;;  %3697 = vrot.lane.b32.xlu0 %v3491_v36, %s6121_s23 }
 0x220   : > { %2844 = vst.msk [vmem:[#allocation2 + $0x11c] sm:$0xf] %vm934_vm4, %v2676_v55  ;;  %v3501_v55 = vsel %vm6160_vm2, %v3499_v39, %v3500_v40 }
 0x221   : > { %3699 = vrot.lane.b32.xlu1 %v3494_v50, %s6121_s23  ;;  %v3083_v59 = vpop.permute.xlu0 %3082  ;;  %v2534_v50 = vrot.slane %v2532_v51, 4 }
 0x222   : > { %3252 = vst.msk [vmem:[#allocation2 + $0x114] sm:$0xf] %vm1344_vm5, %v3083_v59  ;;  %v5608_v59 = vld [vmem:[%s6167_s20 + $0x70] sm:$0xf] }
 0x223   : > { %v3085_v63 = vpop.permute.xlu1 %3084  ;;  %2693 = vrot.lane.b32.xlu0 %v2530_v48, %s6119_s21  ;;  %v6038_v62 = vld [vmem:[#allocation2 + $0x4] ss:$8 sps:$4 sm:$0xff]   ;;  %v2538_v48 = vrot.slane %v5649_v44, 5  ;;  %v2536_v53 = vsel %vm6160_vm2, %v2534_v50, %v2535_v42  ;;  %v2431_v61 = vrot.slane %v5608_v59, 5  ;;  %v5650_v44 = vld [vmem:[%s6167_s20 + $0x118] sm:$0xe] }
 0x224   : > { %3253 = vst.msk [vmem:[#allocation2 + $0x11c] sm:$0xf] %vm1344_vm5, %v3085_v63  ;;  %4517 = vmatprep.mubr.bf16.mxu0 %v6038_v62  ;;  %v5609_v63 = vld [vmem:[%s6167_s20 + $0x74] sm:$0x1]  ;;  %v5707_v42 = vld [vmem:[%s6167_s20 + $0x84] sm:$0xf] }
 0x225   : > { %2695 = vrot.lane.b32.xlu1 %v2533_v57, %s6119_s21  ;;  %v2610_v4 = vpop.permute.xlu0 %2609  ;;  %4518 = vmatmul.mubr.bf16.vlgmr.msra.gmra.mxu0 %v6036_v58  ;;  %v2539_v60 = vsel %vm6160_vm2, %v2537_v56, %v2538_v48  ;;  %v5818_v58 = vld [vmem:[%s6167_s20 + $0x124] sm:$0xf]  ;;  %v2434_v14 = vrot.slane %v5609_v63, 5  ;;  %v2432_v9 = vsel %vm6160_vm2, %v2430_v7, %v2431_v61  ;;  %v5687_v56 = vrot.slane %v5650_v44, 9 }
 0x226   : > { %2811 = vst.msk [vmem:[#allocation2 + $0x14] sm:$0xf] %vm934_vm4, %v2610_v4 }
 0x227   : > { %v2612_v13 = vpop.permute.xlu1 %2611  ;;  %3102 = vrot.lane.b32.xlu0 %v5736_v1, %s6120_s22 }
 0x228   : > { %2812 = vst.msk [vmem:[#allocation2 + $0x1c] sm:$0xf] %vm934_vm4, %v2612_v13  ;;  %v5739_v13 = vld [vmem:[%s6167_s20 + $0x124] sm:$0xf] }
 0x229   : > { %3104 = vrot.lane.b32.xlu1 %v5737_v6, %s6120_s22  ;;  %v3746_v17 = vpop.permute.xlu0 %3745 }
 0x22a   : > { %3915 = vst.msk [vmem:[#allocation2 + $0x114] sm:$0xf] %vm2008_vm6, %v3746_v17  ;;  %v3607_v17 = vrot.slane %v5818_v58, 5 }
 0x22b   : > { %v3748_v21 = vpop.permute.xlu1 %3747  ;;  %2629 = vrot.lane.b32.xlu0 %v2426_v3, %s6119_s21  ;;  %v2433_v3 = vrot.slane %v2431_v61, 4  ;;  %v5611_v61 = vld [vmem:[%s6167_s20 + $0x7c] sm:$0xf] }
 0x22c   : > { %3916 = vst.msk [vmem:[#allocation2 + $0x11c] sm:$0xf] %vm2008_vm6, %v3748_v21  ;;  %v3608_v15 = vsel %vm6160_vm2, %v3606_v8, %v3607_v17 }
 0x22d   : > { %2631 = vrot.lane.b32.xlu1 %v2429_v20, %s6119_s21  ;;  %v3019_v26 = vpop.permute.xlu0 %3018  ;;  %v2435_v23 = vsel %vm6160_vm2, %v2433_v3, %v2434_v14  ;;  %v5740_v3 = vld [vmem:[%s6167_s20 + $0x12c] sm:$0xf] }
 0x22e   : > { %3220 = vst.msk [vmem:[#allocation2 + $0x14] sm:$0xf] %vm1344_vm5, %v3019_v26  ;;  %v3610_v26 = vrot.slane %v5819_v22, 5  ;;  %v5820_v22 = vld [vmem:[%s6167_s20 + $0x12c] sm:$0xe] }
 0x22f   : > { %v3021_v31 = vpop.permute.xlu1 %3020  ;;  %3765 = vrot.lane.b32.xlu0 %v3602_v18, %s6121_s23  ;;  %v3609_v18 = vrot.slane %v3607_v17, 4  ;;  %v5857_v28 = vrot.slane %v5820_v22, 9 }
 0x230   : > { %3221 = vst.msk [vmem:[#allocation2 + $0x1c] sm:$0xf] %vm1344_vm5, %v3021_v31  ;;  %v5571_v31 = vld [vmem:[%s6167_s20 + $0x11c] sm:$0xf] }
 0x231   : > { %3767 = vrot.lane.b32.xlu1 %v3605_v29, %s6121_s23  ;;  %v3682_v37 = vpop.permute.xlu0 %3681  ;;  %v5570_v29 = vld [vmem:[%s6167_s20 + $0x118] sm:$0xf]  ;;  %v3611_v30 = vsel %vm6160_vm2, %v3609_v18, %v3610_v26  ;;  %2195 = vst.msk [vmem:[#allocation2 + $0x18c] sm:$0xf] %vm267_vm3, %v5571_v31  ;;  %v7836_v26 = vld [vmem:[%s6167_s20 + $0x134] sm:$0xf] }
 0x232   : > { %3883 = vst.msk [vmem:[#allocation2 + $0x14] sm:$0xf] %vm2008_vm6, %v3682_v37  ;;  %v5706_v37 = vld [vmem:[%s6167_s20 + $0x80] sm:$0xf]  ;;  %v5781_v31 = vld [vmem:[%s6167_s20 + $0x90] sm:$0xf] }
 0x233   : > { %v3684_v36 = vpop.permute.xlu1 %3683  ;;  %3038 = vrot.lane.b32.xlu0 %v5704_v34, %s6120_s22  ;;  %v6041_v47 = vld [vmem:[#allocation2 + $0x114] ss:$8 sps:$4 sm:$0xff]   ;;  %2194 = vst.msk [vmem:[#allocation2 + $0x184] sm:$0xf] %vm267_vm3, %v5570_v29  ;;  %v5779_v34 = vld [vmem:[%s6167_s20 + $0x88] sm:$0x1] }
 0x234   : > { %3884 = vst.msk [vmem:[#allocation2 + $0x1c] sm:$0xf] %vm2008_vm6, %v3684_v36  ;;  %4653 = vmatprep.mubr.bf16.mxu1 %v6041_v47  ;;  %v3505_v36 = vrot.slane %v3503_v24, 4  ;;  %v2542_v47 = vrot.slane %v5651_v35, 5  ;;  %v5780_v35 = vld [vmem:[%s6167_s20 + $0x8c] sm:$0xe] }
 0x235   : > { %3040 = vrot.lane.b32.xlu1 %v5705_v38, %s6120_s22  ;;  %v2678_v43 = vpop.permute.xlu0 %2677  ;;  %4654 = vmatmul.mubr.bf16.vlgmr.msra.gmra.mxu1 %v6039_v45  ;;  %v3502_v38 = vrot.slane %v3500_v40, 4  ;;  %v3506_v45 = vrot.slane %v5779_v34, 5 }
 0x236   : > { %2845 = vst.msk [vmem:[#allocation2 + $0x124] sm:$0xf] %vm934_vm4, %v2678_v43  ;;  %v2544_v59 = vrot.slane %v2542_v47, 4  ;;  %v2543_v63 = vsel %vm6160_vm2, %v5687_v56, %v2542_v47  ;;  %v5708_v47 = vld [vmem:[%s6167_s20 + $0x8c] sm:$0xf] }
 0x237   : > { %v2680_v51 = vpop.permute.xlu1 %2679  ;;  %3701 = vrot.lane.b32.xlu0 %v3498_v49, %s6121_s23  ;;  %v7795_v49 = vld [vmem:[%s6167_s20 + $0x120] sm:$0xf]  ;;  %v3504_v40 = vsel %vm6160_vm2, %v3502_v38, %v3503_v24  ;;  %v5654_v56 = vld [vmem:[%s6167_s20 + $0x128] sm:$0x1] }
 0x238   : > { %2846 = vst.msk [vmem:[#allocation2 + $0x12c] sm:$0xf] %vm934_vm4, %v2680_v51  ;;  %v3507_v51 = vsel %vm6160_vm2, %v3505_v36, %v3506_v45  ;;  %v7865_v36 = vld [vmem:[%s6167_s20 + $0x94] sm:$0xf]  ;;  %v5653_v45 = vld [vmem:[%s6167_s20 + $0x124] sm:$0xf] }
 0x239   : > { %3703 = vrot.lane.b32.xlu1 %v3501_v55, %s6121_s23  ;;  %v3087_v57 = vpop.permute.xlu0 %3086  ;;  %v3951_v1 = vld [vmem:[#allocation2 + $0x10] sm:$0xff] }
 0x23a   : > { %3254 = vst.msk [vmem:[#allocation2 + $0x124] sm:$0xf] %vm1344_vm5, %v3087_v57  ;;  %v5539_v57 = vld [vmem:[%s6167_s20 + $0x7c] sm:$0xf] }
 0x23b   : > { %v3089_v62 = vpop.permute.xlu1 %3088  ;;  %2697 = vrot.lane.b32.xlu0 %v2536_v53, %s6119_s21  ;;  %v3952_v2 = vld [vmem:[#allocation2 + $0x18] sm:$0xff]  ;;  %v2545_v53 = vrot.slane %v7795_v49, 5  ;;  %2163 = vst.msk [vmem:[#allocation2 + $0x8c] sm:$0xf] %vm267_vm3, %v5539_v57  ;;  %v5541_v49 = vld [vmem:[%s6167_s20 + $0x84] sm:$0xf] }
 0x23c   : > { %v6042_v4 = vld [vmem:[#allocation2 + $0x14] ss:$8 sps:$4 sm:$0xff]   ;;  %3255 = vst.msk [vmem:[#allocation2 + $0x12c] sm:$0xf] %vm1344_vm5, %v3089_v62  ;;  %v5864_v6 = vcombine.low %v3951_v1, %v3952_v2  ;;  %v5610_v62 = vld [vmem:[%s6167_s20 + $0x78] sm:$0xe] }
 0x23d   : > { %2699 = vrot.lane.b32.xlu1 %v2539_v60, %s6119_s21  ;;  %v2614_v12 = vpop.permute.xlu0 %2613  ;;  %4525 = vmatprep.mubr.bf16.mxu0 %v6042_v4  ;;  %v2546_v1 = vsel %vm6160_vm2, %v2544_v59, %v2545_v53  ;;  %v2438_v2 = vrot.slane %v5611_v61, 5  ;;  %v7823_v4 = vld [vmem:[%s6167_s20 + $0x80] sm:$0xf]  ;;  %v5679_v17 = vrot.slane %v5610_v62, 9  ;;  %v2547_v61 = vrot.slane %v2545_v53, 4 }
 0x23e   : > { %2813 = vst.msk [vmem:[#allocation2 + $0x24] sm:$0xf] %vm934_vm4, %v2614_v12  ;;  %4526 = vmatmul.mubr.bf16.gmra.mxu0 %v5864_v6 }
 0x23f   : > { %v2616_v20 = vpop.permute.xlu1 %2615  ;;  %3106 = vrot.lane.b32.xlu0 %v5738_v5, %s6120_s22  ;;  %v5821_v5 = vld [vmem:[%s6167_s20 + $0x130] sm:$0xf]  ;;  %v2440_v8 = vrot.slane %v2438_v2, 4  ;;  %2165 = vst.msk [vmem:[#allocation2 + $0x9c] sm:$0xf] %vm267_vm3, %v5541_v49 }
 0x240   : > { %2814 = vst.msk [vmem:[#allocation2 + $0x2c] sm:$0xf] %vm934_vm4, %v2616_v20 }
 0x241   : > { %3108 = vrot.lane.b32.xlu1 %v5739_v13, %s6120_s22  ;;  %v3750_v21 = vpop.permute.xlu0 %3749 }
 0x242   : > { %3917 = vst.msk [vmem:[#allocation2 + $0x124] sm:$0xf] %vm2008_vm6, %v3750_v21  ;;  %v2441_v21 = vrot.slane %v7823_v4, 5 }
 0x243   : > { %v3752_v27 = vpop.permute.xlu1 %3751  ;;  %2633 = vrot.lane.b32.xlu0 %v2432_v9, %s6119_s21  ;;  %v5741_v9 = vld [vmem:[%s6167_s20 + $0x130] sm:$0xf] }
 0x244   : > { %3918 = vst.msk [vmem:[#allocation2 + $0x12c] sm:$0xf] %vm2008_vm6, %v3752_v27  ;;  %v2439_v27 = vsel %vm6160_vm2, %v5679_v17, %v2438_v2  ;;  %v2551_v2 = vrot.slane %v5654_v56, 5 }
 0x245   : > { %2635 = vrot.lane.b32.xlu1 %v2435_v23, %s6119_s21  ;;  %v3023_v11 = vpop.permute.xlu0 %3022  ;;  %v3614_v23 = vrot.slane %v5821_v5, 5  ;;  %v5613_v5 = vld [vmem:[%s6167_s20 + $0x84] sm:$0xf] }
 0x246   : > { %3222 = vst.msk [vmem:[#allocation2 + $0x24] sm:$0xf] %vm1344_vm5, %v3023_v11  ;;  %v2442_v11 = vsel %vm6160_vm2, %v2440_v8, %v2441_v21  ;;  %v5742_v8 = vld [vmem:[%s6167_s20 + $0x134] sm:$0xf] }
 0x247   : > { %v3025_v33 = vpop.permute.xlu1 %3024  ;;  %3769 = vrot.lane.b32.xlu0 %v3608_v15, %s6121_s23  ;;  %v3616_v29 = vrot.slane %v3614_v23, 4 }
 0x248   : > { %3223 = vst.msk [vmem:[#allocation2 + $0x2c] sm:$0xf] %vm1344_vm5, %v3025_v33  ;;  %v3615_v33 = vsel %vm6160_vm2, %v5857_v28, %v3614_v23  ;;  %v5743_v28 = vld [vmem:[%s6167_s20 + $0x138] sm:$0xf] }
 0x249   : > { %3771 = vrot.lane.b32.xlu1 %v3611_v30, %s6121_s23  ;;  %v3686_v39 = vpop.permute.xlu0 %3685  ;;  %v3985_v43 = vld [vmem:[#allocation2 + $0x120] sm:$0xff]  ;;  %v3617_v30 = vrot.slane %v7836_v26, 5 }
 0x24a   : > { %3885 = vst.msk [vmem:[#allocation2 + $0x24] sm:$0xf] %vm2008_vm6, %v3686_v39  ;;  %v3510_v39 = vrot.slane %v5781_v31, 5 }
 0x24b   : > { %v3688_v50 = vpop.permute.xlu1 %3687  ;;  %3042 = vrot.lane.b32.xlu0 %v5706_v37, %s6120_s22  ;;  %v3986_v54 = vld [vmem:[#allocation2 + $0x128] sm:$0xff]  ;;  %v5572_v37 = vld [vmem:[%s6167_s20 + $0x120] sm:$0xf]  ;;  %v3618_v38 = vsel %vm6160_vm2, %v3616_v29, %v3617_v30 }
 0x24c   : > { %v6044_v32 = vld [vmem:[#allocation2 + $0x124] ss:$8 sps:$4 sm:$0xff]   ;;  %3886 = vst.msk [vmem:[#allocation2 + $0x2c] sm:$0xf] %vm2008_vm6, %v3688_v50  ;;  %v5898_v55 = vcombine.low %v3985_v43, %v3986_v54  ;;  %v5849_v50 = vrot.slane %v5780_v35, 9 }
 0x24d   : > { %3044 = vrot.lane.b32.xlu1 %v5707_v42, %s6120_s22  ;;  %v2682_v48 = vpop.permute.xlu0 %2681  ;;  %4661 = vmatprep.mubr.bf16.mxu1 %v6044_v32  ;;  %2196 = vst.msk [vmem:[#allocation2 + $0x194] sm:$0xf] %vm267_vm3, %v5572_v37  ;;  %v5573_v42 = vld [vmem:[%s6167_s20 + $0x124] sm:$0xf]  ;;  %v5709_v54 = vld [vmem:[%s6167_s20 + $0x90] sm:$0xf] }
 0x24e   : > { %2847 = vst.msk [vmem:[#allocation2 + $0x134] sm:$0xf] %vm934_vm4, %v2682_v48  ;;  %4662 = vmatmul.mubr.bf16.gmra.mxu1 %v5898_v55  ;;  %v3512_v32 = vrot.slane %v3510_v39, 4  ;;  %v2548_v55 = vrot.slane %v5653_v45, 5  ;;  %v3511_v57 = vsel %vm6160_vm2, %v5849_v50, %v3510_v39  ;;  %v5575_v50 = vld [vmem:[%s6167_s20 + $0x130] sm:$0xf] }
 0x24f   : > { %v2684_v60 = vpop.permute.xlu1 %2683  ;;  %3705 = vrot.lane.b32.xlu0 %v3504_v40, %s6121_s23  ;;  %2197 = vst.msk [vmem:[#allocation2 + $0x19c] sm:$0xf] %vm267_vm3, %v5573_v42  ;;  %v3513_v40 = vrot.slane %v7865_v36, 5  ;;  %v5783_v42 = vld [vmem:[%s6167_s20 + $0x98] sm:$0xf] }
 0x250   : > { %2848 = vst.msk [vmem:[#allocation2 + $0x13c] sm:$0xf] %vm934_vm4, %v2684_v60  ;;  %v3516_v45 = vrot.slane %v5783_v42, 5 }
 0x251   : > { %3707 = vrot.lane.b32.xlu1 %v3507_v51, %s6121_s23  ;;  %v3091_v58 = vpop.permute.xlu0 %3090  ;;  %v3953_v7 = vld [vmem:[#allocation2 + $0x20] sm:$0xff]  ;;  %v3514_v62 = vsel %vm6160_vm2, %v3512_v32, %v3513_v40  ;;  %v5656_v32 = vld [vmem:[%s6167_s20 + $0x130] sm:$0xf]  ;;  %2199 = vst.msk [vmem:[#allocation2 + $0x1ac] sm:$0xf] %vm267_vm3, %v5575_v50  ;;  %v3515_v56 = vrot.slane %v3513_v40, 4 }
 0x252   : > { %3256 = vst.msk [vmem:[#allocation2 + $0x134] sm:$0xf] %vm1344_vm5, %v3091_v58  ;;  %v5540_v58 = vld [vmem:[%s6167_s20 + $0x80] sm:$0xf] }
 0x253   : > { %v3093_v6 = vpop.permute.xlu1 %3092  ;;  %2701 = vrot.lane.b32.xlu0 %v2543_v63, %s6119_s21  ;;  %v3954_v12 = vld [vmem:[#allocation2 + $0x28] sm:$0xff]  ;;  %2164 = vst.msk [vmem:[#allocation2 + $0x94] sm:$0xf] %vm267_vm3, %v5540_v58 }
 0x254   : > { %v6046_v13 = vld [vmem:[#allocation2 + $0x24] ss:$8 sps:$4 sm:$0xff]   ;;  %3257 = vst.msk [vmem:[#allocation2 + $0x13c] sm:$0xf] %vm1344_vm5, %v3093_v6  ;;  %v5866_v14 = vcombine.low %v3953_v7, %v3954_v12  ;;  %v2549_v6 = vsel %vm6160_vm2, %v2547_v61, %v2548_v55  ;;  %v7949_v61 = vld [vmem:[%s6167_s20 + $0x134] sm:$0xf] }
 0x255   : > { %2703 = vrot.lane.b32.xlu1 %v2546_v1, %s6119_s21  ;;  %v2618_v20 = vpop.permute.xlu0 %2617  ;;  %4533 = vmatprep.mubr.bf16.mxu0 %v6046_v13  ;;  %v2550_v1 = vrot.slane %v2548_v55, 4  ;;  %v2444_v13 = vrot.slane %v5613_v5, 5  ;;  %v5710_v55 = vld [vmem:[%s6167_s20 + $0x94] sm:$0xf] }
 0x256   : > { %2815 = vst.msk [vmem:[#allocation2 + $0x34] sm:$0xf] %vm934_vm4, %v2618_v20  ;;  %4534 = vmatmul.mubr.bf16.gmra.mxu0 %v5866_v14  ;;  %v5823_v14 = vld [vmem:[%s6167_s20 + $0x138] sm:$0xf] }
 0x257   : > { %v2620_v18 = vpop.permute.xlu1 %2619  ;;  %3110 = vrot.lane.b32.xlu0 %v5740_v3, %s6120_s22  ;;  %v2552_v12 = vsel %vm6160_vm2, %v2550_v1, %v2551_v2  ;;  %v5614_v3 = vld [vmem:[%s6167_s20 + $0x88] sm:$0x1]  ;;  %v3620_v29 = vrot.slane %v5823_v14, 5 }
 0x258   : > { %2816 = vst.msk [vmem:[#allocation2 + $0x3c] sm:$0xf] %vm934_vm4, %v2620_v18  ;;  %v2443_v18 = vrot.slane %v2441_v21, 4  ;;  %v5824_v21 = vld [vmem:[%s6167_s20 + $0x13c] sm:$0x1] }
 0x259   : > { %3112 = vrot.lane.b32.xlu1 %v5741_v9, %s6120_s22  ;;  %v3754_v15 = vpop.permute.xlu0 %3753  ;;  %v3622_v37 = vrot.slane %v3620_v29, 4 }
 0x25a   : > { %3919 = vst.msk [vmem:[#allocation2 + $0x134] sm:$0xf] %vm2008_vm6, %v3754_v15  ;;  %v2446_v15 = vrot.slane %v2444_v13, 4  ;;  %v2445_v31 = vsel %vm6160_vm2, %v2443_v18, %v2444_v13 }
 0x25b   : > { %v3756_v24 = vpop.permute.xlu1 %3755  ;;  %2637 = vrot.lane.b32.xlu0 %v2439_v27, %s6119_s21 }
 0x25c   : > { %3920 = vst.msk [vmem:[#allocation2 + $0x13c] sm:$0xf] %vm2008_vm6, %v3756_v24  ;;  %v6123_v24 = vmov -1e+30  }
 0x25d   : > { %2639 = vrot.lane.b32.xlu1 %v2442_v11, %s6119_s21  ;;  %v3027_v34 = vpop.permute.xlu0 %3026  ;;  %v2447_v11 = vrot.slane %v5614_v3, 5  ;;  %5094 = vst [vmem:[#allocation3 + $0x8] sm:$0xff] %v6123_v24  ;;  %5095 = vst [vmem:[#allocation3 + $0x10] sm:$0xff] %v6123_v24  ;;  %v5616_v3 = vld [vmem:[%s6167_s20 + $0x90] sm:$0xf] }
 0x25e   : > { %3224 = vst.msk [vmem:[#allocation2 + $0x34] sm:$0xf] %vm1344_vm5, %v3027_v34 }
 0x25f   : > { %v3029_v44 = vpop.permute.xlu1 %3028  ;;  %3773 = vrot.lane.b32.xlu0 %v3615_v33, %s6121_s23  ;;  %v3619_v33 = vrot.slane %v3617_v30, 4  ;;  %v2448_v35 = vsel %vm6160_vm2, %v2446_v15, %v2447_v11  ;;  %v5744_v11 = vld [vmem:[%s6167_s20 + $0x140] sm:$0xf] }
 0x260   : > { %3225 = vst.msk [vmem:[#allocation2 + $0x3c] sm:$0xf] %vm1344_vm5, %v3029_v44 }
 0x261   : > { %3775 = vrot.lane.b32.xlu1 %v3618_v38, %s6121_s23  ;;  %v3690_v43 = vpop.permute.xlu0 %3689  ;;  %v3987_v46 = vld [vmem:[#allocation2 + $0x130] sm:$0xff]  ;;  %v3623_v38 = vrot.slane %v5824_v21, 5  ;;  %v3621_v26 = vsel %vm6160_vm2, %v3619_v33, %v3620_v29  ;;  %v5745_v33 = vld [vmem:[%s6167_s20 + $0x144] sm:$0xf] }
 0x262   : > { %3887 = vst.msk [vmem:[#allocation2 + $0x34] sm:$0xf] %vm2008_vm6, %v3690_v43 }
 0x263   : > { %v3692_v48 = vpop.permute.xlu1 %3691  ;;  %3046 = vrot.lane.b32.xlu0 %v5708_v47, %s6120_s22  ;;  %v3988_v51 = vld [vmem:[#allocation2 + $0x138] sm:$0xff]  ;;  %v3624_v44 = vsel %vm6160_vm2, %v3622_v37, %v3623_v38  ;;  %v5574_v47 = vld [vmem:[%s6167_s20 + $0x12c] sm:$0xf] }
 0x264   : > { %v6048_v59 = vld [vmem:[#allocation2 + $0x134] ss:$8 sps:$4 sm:$0xff]   ;;  %3888 = vst.msk [vmem:[#allocation2 + $0x3c] sm:$0xf] %vm2008_vm6, %v3692_v48  ;;  %v5900_v60 = vcombine.low %v3987_v46, %v3988_v51  ;;  %v5711_v46 = vld [vmem:[%s6167_s20 + $0x98] sm:$0xf] }
 0x265   : > { %3048 = vrot.lane.b32.xlu1 %v5709_v54, %s6120_s22  ;;  %v2686_v63 = vpop.permute.xlu0 %2685  ;;  %4669 = vmatprep.mubr.bf16.mxu1 %v6048_v59  ;;  %v5784_v54 = vld [vmem:[%s6167_s20 + $0x9c] sm:$0x1]  ;;  %2198 = vst.msk [vmem:[#allocation2 + $0x1a4] sm:$0xf] %vm267_vm3, %v5574_v47  ;;  %v5655_v51 = vld [vmem:[%s6167_s20 + $0x12c] sm:$0xe] }
 0x266   : > { %2849 = vst.msk [vmem:[#allocation2 + $0x144] sm:$0xf] %vm934_vm4, %v2686_v63  ;;  %4670 = vmatmul.mubr.bf16.gmra.mxu1 %v5900_v60  ;;  %v3518_v59 = vrot.slane %v3516_v45, 4  ;;  %v2555_v60 = vrot.slane %v5656_v32, 5  ;;  %v5688_v2 = vrot.slane %v5655_v51, 9 }
 0x267   : > { %v2688_v53 = vpop.permute.xlu1 %2687  ;;  %3709 = vrot.lane.b32.xlu0 %v3511_v57, %s6121_s23  ;;  %v3519_v57 = vrot.slane %v5784_v54, 5  ;;  %v5577_v51 = vld [vmem:[%s6167_s20 + $0x138] sm:$0xf] }
 0x268   : > { %2850 = vst.msk [vmem:[#allocation2 + $0x14c] sm:$0xf] %vm934_vm4, %v2688_v53  ;;  %v2557_v5 = vrot.slane %v2555_v60, 4  ;;  %v2556_v14 = vsel %vm6160_vm2, %v5688_v2, %v2555_v60  ;;  %v5658_v60 = vld [vmem:[%s6167_s20 + $0x138] sm:$0xf] }
 0x269   : > { %3711 = vrot.lane.b32.xlu1 %v3514_v62, %s6121_s23  ;;  %v3095_v7 = vpop.permute.xlu0 %3094  ;;  %v3955_v20 = vld [vmem:[#allocation2 + $0x30] sm:$0xff]  ;;  %v3517_v62 = vsel %vm6160_vm2, %v3515_v56, %v3516_v45  ;;  %v3520_v53 = vsel %vm6160_vm2, %v3518_v59, %v3519_v57  ;;  %v8019_v57 = vld [vmem:[%s6167_s20 + $0xa8] sm:$0xf]  ;;  %2201 = vst.msk [vmem:[#allocation2 + $0x1bc] sm:$0xf] %vm267_vm3, %v5577_v51  ;;  %v2561_v2 = vrot.slane %v5658_v60, 5 }
 0x26a   : > { %3258 = vst.msk [vmem:[#allocation2 + $0x144] sm:$0xf] %vm1344_vm5, %v3095_v7  ;;  %v5542_v7 = vld [vmem:[%s6167_s20 + $0x8c] sm:$0xf]  ;;  %v5576_v56 = vld [vmem:[%s6167_s20 + $0x134] sm:$0xf] }
 0x26b   : > { %v3097_v17 = vpop.permute.xlu1 %3096  ;;  %2705 = vrot.lane.b32.xlu0 %v2549_v6, %s6119_s21  ;;  %v3956_v22 = vld [vmem:[#allocation2 + $0x38] sm:$0xff]  ;;  %v2558_v6 = vrot.slane %v7949_v61, 5  ;;  %2166 = vst.msk [vmem:[#allocation2 + $0xa4] sm:$0xf] %vm267_vm3, %v5542_v7  ;;  %2200 = vst.msk [vmem:[#allocation2 + $0x1b4] sm:$0xf] %vm267_vm3, %v5576_v56 }
 0x26c   : > { %v6050_v9 = vld [vmem:[#allocation2 + $0x34] ss:$8 sps:$4 sm:$0xff]   ;;  %3259 = vst.msk [vmem:[#allocation2 + $0x14c] sm:$0xf] %vm1344_vm5, %v3097_v17  ;;  %v5868_v23 = vcombine.low %v3955_v20, %v3956_v22  ;;  %v5615_v20 = vld [vmem:[%s6167_s20 + $0x8c] sm:$0xe] }
 0x26d   : > { %2707 = vrot.lane.b32.xlu1 %v2552_v12, %s6119_s21  ;;  %v2622_v27 = vpop.permute.xlu0 %2621  ;;  %4541 = vmatprep.mubr.bf16.mxu0 %v6050_v9  ;;  %v5543_v12 = vld [vmem:[%s6167_s20 + $0x90] sm:$0xf]  ;;  %v2559_v22 = vsel %vm6160_vm2, %v2557_v5, %v2558_v6  ;;  %v2451_v9 = vrot.slane %v5616_v3, 5  ;;  %v5788_v51 = vld [vmem:[%s6167_s20 + $0xac] sm:$0xf] }
 0x26e   : > { %2817 = vst.msk [vmem:[#allocation2 + $0x44] sm:$0xf] %vm934_vm4, %v2622_v27  ;;  %4542 = vmatmul.mubr.bf16.gmra.mxu0 %v5868_v23  ;;  %v5826_v23 = vld [vmem:[%s6167_s20 + $0x144] sm:$0xf]  ;;  %v3529_v60 = vrot.slane %v5788_v51, 5 }
 0x26f   : > { %v2624_v4 = vpop.permute.xlu1 %2623  ;;  %3114 = vrot.lane.b32.xlu0 %v5742_v8, %s6120_s22  ;;  %2167 = vst.msk [vmem:[#allocation2 + $0xac] sm:$0xf] %vm267_vm3, %v5543_v12  ;;  %v7977_v8 = vld [vmem:[%s6167_s20 + $0x94] sm:$0xf]  ;;  %v3627_v37 = vrot.slane %v5826_v23, 5 }
 0x270   : > { %2818 = vst.msk [vmem:[#allocation2 + $0x4c] sm:$0xf] %vm934_vm4, %v2624_v4  ;;  %v5680_v4 = vrot.slane %v5615_v20, 9  ;;  %v5544_v23 = vld [vmem:[%s6167_s20 + $0x94] sm:$0xf] }
 0x271   : > { %3116 = vrot.lane.b32.xlu1 %v5743_v28, %s6120_s22  ;;  %v3758_v34 = vpop.permute.xlu0 %3757  ;;  %v3629_v45 = vrot.slane %v3627_v37, 4  ;;  %2168 = vst.msk [vmem:[#allocation2 + $0xb4] sm:$0xf] %vm267_vm3, %v5544_v23 }
 0x272   : > { %3921 = vst.msk [vmem:[#allocation2 + $0x144] sm:$0xf] %vm2008_vm6, %v3758_v34  ;;  %v2453_v34 = vrot.slane %v2451_v9, 4  ;;  %v2452_v42 = vsel %vm6160_vm2, %v5680_v4, %v2451_v9  ;;  %v5828_v4 = vld [vmem:[%s6167_s20 + $0x14c] sm:$0xf] }
 0x273   : > { %v3760_v39 = vpop.permute.xlu1 %3759  ;;  %2641 = vrot.lane.b32.xlu0 %v2445_v31, %s6119_s21  ;;  %v5825_v31 = vld [vmem:[%s6167_s20 + $0x140] sm:$0xe] }
 0x274   : > { %3922 = vst.msk [vmem:[#allocation2 + $0x14c] sm:$0xf] %vm2008_vm6, %v3760_v39  ;;  %v7990_v39 = vld [vmem:[%s6167_s20 + $0x148] sm:$0xf] }
 0x275   : > { %2643 = vrot.lane.b32.xlu1 %v2448_v35, %s6119_s21  ;;  %v3031_v30 = vpop.permute.xlu0 %3030  ;;  %v2454_v35 = vrot.slane %v7977_v8, 5  ;;  %v3630_v47 = vrot.slane %v7990_v39, 5 }
 0x276   : > { %3226 = vst.msk [vmem:[#allocation2 + $0x44] sm:$0xf] %vm1344_vm5, %v3031_v30 }
 0x277   : > { %v3033_v43 = vpop.permute.xlu1 %3032  ;;  %3777 = vrot.lane.b32.xlu0 %v3621_v26, %s6121_s23  ;;  %v5858_v26 = vrot.slane %v5825_v31, 9 }
 0x278   : > { %3227 = vst.msk [vmem:[#allocation2 + $0x4c] sm:$0xf] %vm1344_vm5, %v3033_v43  ;;  %v5786_v43 = vld [vmem:[%s6167_s20 + $0xa4] sm:$0xf] }
 0x279   : > { %3779 = vrot.lane.b32.xlu1 %v3624_v44, %s6121_s23  ;;  %v3694_v48 = vpop.permute.xlu0 %3693  ;;  %v3989_v58 = vld [vmem:[#allocation2 + $0x140] sm:$0xff]  ;;  %v2455_v44 = vsel %vm6160_vm2, %v2453_v34, %v2454_v35  ;;  %v3628_v54 = vsel %vm6160_vm2, %v5858_v26, %v3627_v37  ;;  %v5746_v37 = vld [vmem:[%s6167_s20 + $0x148] sm:$0xf] }
 0x27a   : > { %3889 = vst.msk [vmem:[#allocation2 + $0x44] sm:$0xf] %vm2008_vm6, %v3694_v48  ;;  %v3631_v48 = vsel %vm6160_vm2, %v3629_v45, %v3630_v47 }
 0x27b   : > { %v3696_v63 = vpop.permute.xlu1 %3695  ;;  %3050 = vrot.lane.b32.xlu0 %v5710_v55, %s6120_s22  ;;  %v3990_v36 = vld [vmem:[#allocation2 + $0x148] sm:$0xff]  ;;  %v5785_v55 = vld [vmem:[%s6167_s20 + $0xa0] sm:$0xe] }
 0x27c   : > { %v6052_v40 = vld [vmem:[#allocation2 + $0x144] ss:$8 sps:$4 sm:$0xff]   ;;  %3890 = vst.msk [vmem:[#allocation2 + $0x4c] sm:$0xf] %vm2008_vm6, %v3696_v63  ;;  %v5902_v1 = vcombine.low %v3989_v58, %v3990_v36  ;;  %v5712_v63 = vld [vmem:[%s6167_s20 + $0xa0] sm:$0xf] }
 0x27d   : > { %3052 = vrot.lane.b32.xlu1 %v5711_v46, %s6120_s22  ;;  %v2690_v49 = vpop.permute.xlu0 %2689  ;;  %4677 = vmatprep.mubr.bf16.mxu1 %v6052_v40  ;;  %v3523_v46 = vrot.slane %v5786_v43, 5  ;;  %v5850_v58 = vrot.slane %v5785_v55, 9  ;;  %v5713_v40 = vld [vmem:[%s6167_s20 + $0xa4] sm:$0xf] }
 0x27e   : > { %2851 = vst.msk [vmem:[#allocation2 + $0x154] sm:$0xf] %vm934_vm4, %v2690_v49  ;;  %4678 = vmatmul.mubr.bf16.gmra.mxu1 %v5902_v1  ;;  %v3526_v1 = vrot.slane %v8019_v57, 5  ;;  %v5659_v49 = vld [vmem:[%s6167_s20 + $0x13c] sm:$0x1] }
 0x27f   : > { %v2692_v13 = vpop.permute.xlu1 %2691  ;;  %3713 = vrot.lane.b32.xlu0 %v3517_v62, %s6121_s23  ;;  %v3525_v62 = vrot.slane %v3523_v46, 4  ;;  %v2564_v9 = vrot.slane %v5659_v49, 5 }
 0x280   : > { %2852 = vst.msk [vmem:[#allocation2 + $0x15c] sm:$0xf] %vm934_vm4, %v2692_v13  ;;  %v3524_v13 = vsel %vm6160_vm2, %v5850_v58, %v3523_v46  ;;  %v5579_v58 = vld [vmem:[%s6167_s20 + $0x144] sm:$0xf]  ;;  %v3528_v49 = vrot.slane %v3526_v1, 4 }
 0x281   : > { %3715 = vrot.lane.b32.xlu1 %v3520_v53, %s6121_s23  ;;  %v3099_v17 = vpop.permute.xlu0 %3098  ;;  %v3957_v27 = vld [vmem:[#allocation2 + $0x40] sm:$0xff]  ;;  %v3527_v20 = vsel %vm6160_vm2, %v3525_v62, %v3526_v1  ;;  %2203 = vst.msk [vmem:[#allocation2 + $0x1cc] sm:$0xf] %vm267_vm3, %v5579_v58 }
 0x282   : > { %3260 = vst.msk [vmem:[#allocation2 + $0x154] sm:$0xf] %vm1344_vm5, %v3099_v17  ;;  %v5661_v62 = vld [vmem:[%s6167_s20 + $0x144] sm:$0xf] }
 0x283   : > { %v3101_v18 = vpop.permute.xlu1 %3100  ;;  %2709 = vrot.lane.b32.xlu0 %v2556_v14, %s6119_s21  ;;  %v3958_v28 = vld [vmem:[#allocation2 + $0x48] sm:$0xff]  ;;  %v2560_v14 = vrot.slane %v2558_v6, 4  ;;  %v5618_v6 = vld [vmem:[%s6167_s20 + $0x98] sm:$0xf] }
 0x284   : > { %v6054_v15 = vld [vmem:[#allocation2 + $0x44] ss:$8 sps:$4 sm:$0xff]   ;;  %3261 = vst.msk [vmem:[#allocation2 + $0x15c] sm:$0xf] %vm1344_vm5, %v3101_v18  ;;  %v5870_v29 = vcombine.low %v3957_v27, %v3958_v28  ;;  %v5545_v18 = vld [vmem:[%s6167_s20 + $0x98] sm:$0xf] }
 0x285   : > { %2711 = vrot.lane.b32.xlu1 %v2559_v22, %s6119_s21  ;;  %v2626_v21 = vpop.permute.xlu0 %2625  ;;  %4549 = vmatprep.mubr.bf16.mxu0 %v6054_v15  ;;  %v2563_v22 = vrot.slane %v2561_v2, 4  ;;  %2169 = vst.msk [vmem:[#allocation2 + $0xbc] sm:$0xf] %vm267_vm3, %v5545_v18  ;;  %v2562_v27 = vsel %vm6160_vm2, %v2560_v14, %v2561_v2  ;;  %v5714_v2 = vld [vmem:[%s6167_s20 + $0xa8] sm:$0xf] }
 0x286   : > { %2819 = vst.msk [vmem:[#allocation2 + $0x54] sm:$0xf] %vm934_vm4, %v2626_v21  ;;  %4550 = vmatmul.mubr.bf16.gmra.mxu0 %v5870_v29  ;;  %v5619_v29 = vld [vmem:[%s6167_s20 + $0x9c] sm:$0x1]  ;;  %v8101_v14 = vld [vmem:[%s6167_s20 + $0x148] sm:$0xf] }
 0x287   : > { %v2628_v38 = vpop.permute.xlu1 %2627  ;;  %3118 = vrot.lane.b32.xlu0 %v5744_v11, %s6120_s22  ;;  %v2565_v15 = vsel %vm6160_vm2, %v2563_v22, %v2564_v9  ;;  %v2457_v11 = vrot.slane %v5618_v6, 5  ;;  %v2460_v45 = vrot.slane %v5619_v29, 5  ;;  %v3530_v22 = vsel %vm6160_vm2, %v3528_v49, %v3529_v60  ;;  %v5621_v29 = vld [vmem:[%s6167_s20 + $0xa4] sm:$0xf] }
 0x288   : > { %2820 = vst.msk [vmem:[#allocation2 + $0x5c] sm:$0xf] %vm934_vm4, %v2628_v38 }
 0x289   : > { %3120 = vrot.lane.b32.xlu1 %v5745_v33, %s6120_s22  ;;  %v3762_v30 = vpop.permute.xlu0 %3761 }
 0x28a   : > { %3923 = vst.msk [vmem:[#allocation2 + $0x154] sm:$0xf] %vm2008_vm6, %v3762_v30  ;;  %v5747_v30 = vld [vmem:[%s6167_s20 + $0x14c] sm:$0xf] }
 0x28b   : > { %v3764_v50 = vpop.permute.xlu1 %3763  ;;  %2645 = vrot.lane.b32.xlu0 %v2452_v42, %s6119_s21  ;;  %v2456_v42 = vrot.slane %v2454_v35, 4  ;;  %v3632_v35 = vrot.slane %v3630_v47, 4 }
 0x28c   : > { %3924 = vst.msk [vmem:[#allocation2 + $0x15c] sm:$0xf] %vm2008_vm6, %v3764_v50  ;;  %v3633_v50 = vrot.slane %v5828_v4, 5 }
 0x28d   : > { %2647 = vrot.lane.b32.xlu1 %v2455_v44, %s6119_s21  ;;  %v3035_v32 = vpop.permute.xlu0 %3034  ;;  %v2459_v44 = vrot.slane %v2457_v11, 4  ;;  %v2458_v8 = vsel %vm6160_vm2, %v2456_v42, %v2457_v11 }
 0x28e   : > { %3228 = vst.msk [vmem:[#allocation2 + $0x54] sm:$0xf] %vm1344_vm5, %v3035_v32  ;;  %v3635_v56 = vrot.slane %v3633_v50, 4  ;;  %v3634_v39 = vsel %vm6160_vm2, %v3632_v35, %v3633_v50  ;;  %v5749_v35 = vld [vmem:[%s6167_s20 + $0x158] sm:$0xf] }
 0x28f   : > { %v3037_v59 = vpop.permute.xlu1 %3036  ;;  %3781 = vrot.lane.b32.xlu0 %v3628_v54, %s6121_s23  ;;  %v5829_v54 = vld [vmem:[%s6167_s20 + $0x150] sm:$0x1]  ;;  %v2461_v55 = vsel %vm6160_vm2, %v2459_v44, %v2460_v45  ;;  %v5748_v45 = vld [vmem:[%s6167_s20 + $0x154] sm:$0xf] }
 0x290   : > { %3229 = vst.msk [vmem:[#allocation2 + $0x5c] sm:$0xf] %vm1344_vm5, %v3037_v59 }
 0x291   : > { %3783 = vrot.lane.b32.xlu1 %v3631_v48, %s6121_s23  ;;  %v3698_v36 = vpop.permute.xlu0 %3697  ;;  %v3991_v5 = vld [vmem:[#allocation2 + $0x150] sm:$0xff]  ;;  %v3636_v48 = vrot.slane %v5829_v54, 5 }
 0x292   : > { %3891 = vst.msk [vmem:[#allocation2 + $0x54] sm:$0xf] %vm2008_vm6, %v3698_v36 }
 0x293   : > { %v3700_v53 = vpop.permute.xlu1 %3699  ;;  %3054 = vrot.lane.b32.xlu0 %v5712_v63, %s6120_s22  ;;  %v3992_v7 = vld [vmem:[#allocation2 + $0x158] sm:$0xff]  ;;  %v3637_v59 = vsel %vm6160_vm2, %v3635_v56, %v3636_v48  ;;  %v5578_v63 = vld [vmem:[%s6167_s20 + $0x140] sm:$0xf] }
 0x294   : > { %v6056_v12 = vld [vmem:[#allocation2 + $0x154] ss:$8 sps:$4 sm:$0xff]   ;;  %3892 = vst.msk [vmem:[#allocation2 + $0x5c] sm:$0xf] %vm2008_vm6, %v3700_v53  ;;  %v5904_v3 = vcombine.low %v3991_v5, %v3992_v7  ;;  %v5715_v5 = vld [vmem:[%s6167_s20 + $0xac] sm:$0xf] }
 0x295   : > { %3056 = vrot.lane.b32.xlu1 %v5713_v40, %s6120_s22  ;;  %v2694_v17 = vpop.permute.xlu0 %2693  ;;  %4685 = vmatprep.mubr.bf16.mxu1 %v6056_v12  ;;  %v5789_v40 = vld [vmem:[%s6167_s20 + $0xb0] sm:$0x1]  ;;  %2202 = vst.msk [vmem:[#allocation2 + $0x1c4] sm:$0xf] %vm267_vm3, %v5578_v63  ;;  %v5660_v7 = vld [vmem:[%s6167_s20 + $0x140] sm:$0xe] }
 0x296   : > { %2853 = vst.msk [vmem:[#allocation2 + $0x164] sm:$0xf] %vm934_vm4, %v2694_v17  ;;  %4686 = vmatmul.mubr.bf16.gmra.mxu1 %v5904_v3  ;;  %v3531_v12 = vrot.slane %v3529_v60, 4  ;;  %v2568_v3 = vrot.slane %v5661_v62, 5  ;;  %v5689_v23 = vrot.slane %v5660_v7, 9 }
 0x297   : > { %v2696_v61 = vpop.permute.xlu1 %2695  ;;  %3717 = vrot.lane.b32.xlu0 %v3524_v13, %s6121_s23  ;;  %v3532_v13 = vrot.slane %v5789_v40, 5  ;;  %v5581_v7 = vld [vmem:[%s6167_s20 + $0x14c] sm:$0xf] }
 0x298   : > { %2854 = vst.msk [vmem:[#allocation2 + $0x16c] sm:$0xf] %vm934_vm4, %v2696_v61  ;;  %v2570_v6 = vrot.slane %v2568_v3, 4  ;;  %v2569_v4 = vsel %vm6160_vm2, %v5689_v23, %v2568_v3  ;;  %v5663_v3 = vld [vmem:[%s6167_s20 + $0x14c] sm:$0xf] }
 0x299   : > { %3719 = vrot.lane.b32.xlu1 %v3527_v20, %s6121_s23  ;;  %v3103_v28 = vpop.permute.xlu0 %3102  ;;  %v3959_v31 = vld [vmem:[#allocation2 + $0x50] sm:$0xff]  ;;  %v3533_v61 = vsel %vm6160_vm2, %v3531_v12, %v3532_v13  ;;  %v8170_v13 = vld [vmem:[%s6167_s20 + $0xbc] sm:$0xf]  ;;  %2205 = vst.msk [vmem:[#allocation2 + $0x1dc] sm:$0xf] %vm267_vm3, %v5581_v7  ;;  %v2574_v23 = vrot.slane %v5663_v3, 5 }
 0x29a   : > { %3262 = vst.msk [vmem:[#allocation2 + $0x164] sm:$0xf] %vm1344_vm5, %v3103_v28  ;;  %v5546_v28 = vld [vmem:[%s6167_s20 + $0xa0] sm:$0xf] }
 0x29b   : > { %v3105_v21 = vpop.permute.xlu1 %3104  ;;  %2713 = vrot.lane.b32.xlu0 %v2562_v27, %s6119_s21  ;;  %v3960_v33 = vld [vmem:[#allocation2 + $0x58] sm:$0xff]  ;;  %v2571_v27 = vrot.slane %v8101_v14, 5  ;;  %2170 = vst.msk [vmem:[#allocation2 + $0xc4] sm:$0xf] %vm267_vm3, %v5546_v28  ;;  %v5793_v7 = vld [vmem:[%s6167_s20 + $0xc0] sm:$0xf] }
 0x29c   : > { %v6058_v34 = vld [vmem:[#allocation2 + $0x54] ss:$8 sps:$4 sm:$0xff]   ;;  %3263 = vst.msk [vmem:[#allocation2 + $0x16c] sm:$0xf] %vm1344_vm5, %v3105_v21  ;;  %v5872_v38 = vcombine.low %v3959_v31, %v3960_v33  ;;  %v5620_v31 = vld [vmem:[%s6167_s20 + $0xa0] sm:$0xe] }
 0x29d   : > { %2715 = vrot.lane.b32.xlu1 %v2565_v15, %s6119_s21  ;;  %v2630_v26 = vpop.permute.xlu0 %2629  ;;  %4557 = vmatprep.mubr.bf16.mxu0 %v6058_v34  ;;  %v5547_v15 = vld [vmem:[%s6167_s20 + $0xa4] sm:$0xf]  ;;  %v2572_v33 = vsel %vm6160_vm2, %v2570_v6, %v2571_v27  ;;  %v2464_v34 = vrot.slane %v5621_v29, 5  ;;  %v3542_v3 = vrot.slane %v5793_v7, 5 }
 0x29e   : > { %2821 = vst.msk [vmem:[#allocation2 + $0x64] sm:$0xf] %vm934_vm4, %v2630_v26  ;;  %4558 = vmatmul.mubr.bf16.gmra.mxu0 %v5872_v38  ;;  %v5831_v38 = vld [vmem:[%s6167_s20 + $0x158] sm:$0xf] }
 0x29f   : > { %v2632_v43 = vpop.permute.xlu1 %2631  ;;  %3122 = vrot.lane.b32.xlu0 %v5746_v37, %s6120_s22  ;;  %2171 = vst.msk [vmem:[#allocation2 + $0xcc] sm:$0xf] %vm267_vm3, %v5547_v15  ;;  %v8129_v37 = vld [vmem:[%s6167_s20 + $0xa8] sm:$0xf]  ;;  %v3640_v56 = vrot.slane %v5831_v38, 5 }
 0x2a0   : > { %2822 = vst.msk [vmem:[#allocation2 + $0x6c] sm:$0xf] %vm934_vm4, %v2632_v43  ;;  %v5681_v43 = vrot.slane %v5620_v31, 9  ;;  %v5548_v38 = vld [vmem:[%s6167_s20 + $0xa8] sm:$0xf] }
 0x2a1   : > { %3124 = vrot.lane.b32.xlu1 %v5747_v30, %s6120_s22  ;;  %v3766_v32 = vpop.permute.xlu0 %3765  ;;  %v3642_v60 = vrot.slane %v3640_v56, 4  ;;  %2172 = vst.msk [vmem:[#allocation2 + $0xd4] sm:$0xf] %vm267_vm3, %v5548_v38 }
 0x2a2   : > { %3925 = vst.msk [vmem:[#allocation2 + $0x164] sm:$0xf] %vm2008_vm6, %v3766_v32  ;;  %v2466_v32 = vrot.slane %v2464_v34, 4  ;;  %v2465_v51 = vsel %vm6160_vm2, %v5681_v43, %v2464_v34  ;;  %v5833_v43 = vld [vmem:[%s6167_s20 + $0x160] sm:$0xf] }
 0x2a3   : > { %v3768_v46 = vpop.permute.xlu1 %3767  ;;  %2649 = vrot.lane.b32.xlu0 %v2458_v8, %s6119_s21  ;;  %v5830_v8 = vld [vmem:[%s6167_s20 + $0x154] sm:$0xe] }
 0x2a4   : > { %3926 = vst.msk [vmem:[#allocation2 + $0x16c] sm:$0xf] %vm2008_vm6, %v3768_v46  ;;  %v8142_v46 = vld [vmem:[%s6167_s20 + $0x15c] sm:$0xf] }
 0x2a5   : > { %2651 = vrot.lane.b32.xlu1 %v2461_v55, %s6119_s21  ;;  %v3039_v47 = vpop.permute.xlu0 %3038  ;;  %v2467_v55 = vrot.slane %v8129_v37, 5  ;;  %v3643_v63 = vrot.slane %v8142_v46, 5 }
 0x2a6   : > { %3230 = vst.msk [vmem:[#allocation2 + $0x64] sm:$0xf] %vm1344_vm5, %v3039_v47 }
 0x2a7   : > { %v3041_v36 = vpop.permute.xlu1 %3040  ;;  %3785 = vrot.lane.b32.xlu0 %v3634_v39, %s6121_s23  ;;  %v5859_v39 = vrot.slane %v5830_v8, 9  ;;  %v3644_v49 = vsel %vm6160_vm2, %v3642_v60, %v3643_v63 }
 0x2a8   : > { %3231 = vst.msk [vmem:[#allocation2 + $0x6c] sm:$0xf] %vm1344_vm5, %v3041_v36  ;;  %v5791_v36 = vld [vmem:[%s6167_s20 + $0xb8] sm:$0xf] }
 0x2a9   : > { %3787 = vrot.lane.b32.xlu1 %v3637_v59, %s6121_s23  ;;  %v3702_v53 = vpop.permute.xlu0 %3701  ;;  %v3993_v20 = vld [vmem:[#allocation2 + $0x160] sm:$0xff]  ;;  %v2468_v59 = vsel %vm6160_vm2, %v2466_v32, %v2467_v55  ;;  %v3641_v40 = vsel %vm6160_vm2, %v5859_v39, %v3640_v56  ;;  %v5750_v56 = vld [vmem:[%s6167_s20 + $0x15c] sm:$0xf] }
 0x2aa   : > { %3893 = vst.msk [vmem:[#allocation2 + $0x64] sm:$0xf] %vm2008_vm6, %v3702_v53  ;;  %v3536_v53 = vrot.slane %v5791_v36, 5 }
 0x2ab   : > { %v3704_v17 = vpop.permute.xlu1 %3703  ;;  %3058 = vrot.lane.b32.xlu0 %v5714_v2, %s6120_s22  ;;  %v3994_v57 = vld [vmem:[#allocation2 + $0x168] sm:$0xff]  ;;  %v5790_v2 = vld [vmem:[%s6167_s20 + $0xb4] sm:$0xe] }
 0x2ac   : > { %v6060_v1 = vld [vmem:[#allocation2 + $0x164] ss:$8 sps:$4 sm:$0xff]   ;;  %3894 = vst.msk [vmem:[#allocation2 + $0x6c] sm:$0xf] %vm2008_vm6, %v3704_v17  ;;  %v5906_v9 = vcombine.low %v3993_v20, %v3994_v57  ;;  %v5716_v17 = vld [vmem:[%s6167_s20 + $0xb4] sm:$0xf] }
 0x2ad   : > { %3060 = vrot.lane.b32.xlu1 %v5715_v5, %s6120_s22  ;;  %v2698_v18 = vpop.permute.xlu0 %2697  ;;  %4693 = vmatprep.mubr.bf16.mxu1 %v6060_v1  ;;  %v5580_v5 = vld [vmem:[%s6167_s20 + $0x148] sm:$0xf]  ;;  %v5851_v20 = vrot.slane %v5790_v2, 9  ;;  %v5717_v1 = vld [vmem:[%s6167_s20 + $0xb8] sm:$0xf] }
 0x2ae   : > { %2855 = vst.msk [vmem:[#allocation2 + $0x174] sm:$0xf] %vm934_vm4, %v2698_v18  ;;  %4694 = vmatmul.mubr.bf16.gmra.mxu1 %v5906_v9  ;;  %v3539_v9 = vrot.slane %v8170_v13, 5  ;;  %v5664_v18 = vld [vmem:[%s6167_s20 + $0x150] sm:$0x1] }
 0x2af   : > { %v2700_v11 = vpop.permute.xlu1 %2699  ;;  %3721 = vrot.lane.b32.xlu0 %v3530_v22, %s6121_s23  ;;  %2204 = vst.msk [vmem:[#allocation2 + $0x1d4] sm:$0xf] %vm267_vm3, %v5580_v5  ;;  %v3538_v22 = vrot.slane %v3536_v53, 4  ;;  %v2577_v34 = vrot.slane %v5664_v18, 5 }
 0x2b0   : > { %2856 = vst.msk [vmem:[#allocation2 + $0x17c] sm:$0xf] %vm934_vm4, %v2700_v11  ;;  %v3537_v11 = vsel %vm6160_vm2, %v5851_v20, %v3536_v53  ;;  %v5583_v20 = vld [vmem:[%s6167_s20 + $0x158] sm:$0xf]  ;;  %v3541_v18 = vrot.slane %v3539_v9, 4 }
 0x2b1   : > { %3723 = vrot.lane.b32.xlu1 %v3533_v61, %s6121_s23  ;;  %v3107_v21 = vpop.permute.xlu0 %3106  ;;  %v3961_v26 = vld [vmem:[#allocation2 + $0x60] sm:$0xff]  ;;  %v3540_v31 = vsel %vm6160_vm2, %v3538_v22, %v3539_v9  ;;  %v5666_v22 = vld [vmem:[%s6167_s20 + $0x158] sm:$0xf]  ;;  %2207 = vst.msk [vmem:[#allocation2 + $0x1ec] sm:$0xf] %vm267_vm3, %v5583_v20 }
 0x2b2   : > { %3264 = vst.msk [vmem:[#allocation2 + $0x174] sm:$0xf] %vm1344_vm5, %v3107_v21 }
 0x2b3   : > { %v3109_v42 = vpop.permute.xlu1 %3108  ;;  %2717 = vrot.lane.b32.xlu0 %v2569_v4, %s6119_s21  ;;  %v3962_v30 = vld [vmem:[#allocation2 + $0x68] sm:$0xff]  ;;  %v2573_v4 = vrot.slane %v2571_v27, 4 }
 0x2b4   : > { %v6062_v44 = vld [vmem:[#allocation2 + $0x64] ss:$8 sps:$4 sm:$0xff]   ;;  %3265 = vst.msk [vmem:[#allocation2 + $0x17c] sm:$0xf] %vm1344_vm5, %v3109_v42  ;;  %v5874_v50 = vcombine.low %v3961_v26, %v3962_v30 }
 0x2b5   : > { %2719 = vrot.lane.b32.xlu1 %v2572_v33, %s6119_s21  ;;  %v2634_v54 = vpop.permute.xlu0 %2633  ;;  %4565 = vmatprep.mubr.bf16.mxu0 %v6062_v44  ;;  %v2576_v33 = vrot.slane %v2574_v23, 4  ;;  %v5549_v42 = vld [vmem:[%s6167_s20 + $0xac] sm:$0xf]  ;;  %v2575_v26 = vsel %vm6160_vm2, %v2573_v4, %v2574_v23  ;;  %v5718_v23 = vld [vmem:[%s6167_s20 + $0xbc] sm:$0xf] }
 0x2b6   : > { %2823 = vst.msk [vmem:[#allocation2 + $0x74] sm:$0xf] %vm934_vm4, %v2634_v54  ;;  %4566 = vmatmul.mubr.bf16.gmra.mxu0 %v5874_v50  ;;  %v5623_v27 = vld [vmem:[%s6167_s20 + $0xac] sm:$0xf]  ;;  %v5624_v50 = vld [vmem:[%s6167_s20 + $0xb0] sm:$0x1] }
 0x2b7   : > { %v2636_v48 = vpop.permute.xlu1 %2635  ;;  %3126 = vrot.lane.b32.xlu0 %v5748_v45, %s6120_s22  ;;  %2173 = vst.msk [vmem:[#allocation2 + $0xdc] sm:$0xf] %vm267_vm3, %v5549_v42  ;;  %v2578_v44 = vsel %vm6160_vm2, %v2576_v33, %v2577_v34  ;;  %v2470_v45 = vrot.slane %v5623_v27, 5  ;;  %v2473_v60 = vrot.slane %v5624_v50, 5  ;;  %v8253_v4 = vld [vmem:[%s6167_s20 + $0x15c] sm:$0xf]  ;;  %v3543_v33 = vsel %vm6160_vm2, %v3541_v18, %v3542_v3 }
 0x2b8   : > { %2824 = vst.msk [vmem:[#allocation2 + $0x7c] sm:$0xf] %vm934_vm4, %v2636_v48  ;;  %v5626_v50 = vld [vmem:[%s6167_s20 + $0xb8] sm:$0xf] }
 0x2b9   : > { %3128 = vrot.lane.b32.xlu1 %v5749_v35, %s6120_s22  ;;  %v3770_v47 = vpop.permute.xlu0 %3769 }
 0x2ba   : > { %3927 = vst.msk [vmem:[#allocation2 + $0x174] sm:$0xf] %vm2008_vm6, %v3770_v47  ;;  %v5751_v47 = vld [vmem:[%s6167_s20 + $0x160] sm:$0xf] }
 0x2bb   : > { %v3772_v58 = vpop.permute.xlu1 %3771  ;;  %2653 = vrot.lane.b32.xlu0 %v2465_v51, %s6119_s21  ;;  %v2469_v51 = vrot.slane %v2467_v55, 4  ;;  %v3645_v55 = vrot.slane %v3643_v63, 4 }
 0x2bc   : > { %3928 = vst.msk [vmem:[#allocation2 + $0x17c] sm:$0xf] %vm2008_vm6, %v3772_v58  ;;  %v3646_v58 = vrot.slane %v5833_v43, 5 }
 0x2bd   : > { %2655 = vrot.lane.b32.xlu1 %v2468_v59, %s6119_s21  ;;  %v3043_v62 = vpop.permute.xlu0 %3042  ;;  %v2472_v59 = vrot.slane %v2470_v45, 4  ;;  %v2471_v37 = vsel %vm6160_vm2, %v2469_v51, %v2470_v45 }
 0x2be   : > { %3232 = vst.msk [vmem:[#allocation2 + $0x74] sm:$0xf] %vm1344_vm5, %v3043_v62  ;;  %v3647_v46 = vsel %vm6160_vm2, %v3645_v55, %v3646_v58  ;;  %v8296_v55 = vld [vmem:[%s8781_s3] ss:$0 sm:$0xff] }
 0x2bf   : > { %v3045_v12 = vpop.permute.xlu1 %3044  ;;  %3789 = vrot.lane.b32.xlu0 %v3641_v40, %s6121_s23  ;;  %v5834_v40 = vld [vmem:[%s6167_s20 + $0x164] sm:$0x1]  ;;  %v2474_v2 = vsel %vm6160_vm2, %v2472_v59, %v2473_v60  ;;  %v5752_v60 = vld [vmem:[%s6167_s20 + $0x168] sm:$0xf] }
 0x2c0   : > { %3233 = vst.msk [vmem:[#allocation2 + $0x7c] sm:$0xf] %vm1344_vm5, %v3045_v12  ;;  %v3649_v53 = vrot.slane %v5834_v40, 5 }
 0x2c1   : > { %3791 = vrot.lane.b32.xlu1 %v3644_v49, %s6121_s23  ;;  %v3706_v57 = vpop.permute.xlu0 %3705  ;;  %v3995_v6 = vld [vmem:[#allocation2 + $0x170] sm:$0xff]  ;;  %v3648_v49 = vrot.slane %v3646_v58, 4  ;;  %v8290_v58 = vld [vmem:[%s8780_s2] ss:$0 sm:$0xff] }
 0x2c2   : > { %3895 = vst.msk [vmem:[#allocation2 + $0x74] sm:$0xf] %vm2008_vm6, %v3706_v57 }
 0x2c3   : > { %v3708_v61 = vpop.permute.xlu1 %3707  ;;  %3062 = vrot.lane.b32.xlu0 %v5716_v17, %s6120_s22  ;;  %v3996_v28 = vld [vmem:[#allocation2 + $0x178] sm:$0xff]  ;;  %v3650_v12 = vsel %vm6160_vm2, %v3648_v49, %v3649_v53  ;;  %v5582_v17 = vld [vmem:[%s6167_s20 + $0x154] sm:$0xf]  ;;  %v5753_v49 = vld [vmem:[%s6167_s20 + $0x16c] sm:$0xf] }
 0x2c4   : > { %v6064_v15 = vld [vmem:[#allocation2 + $0x174] ss:$8 sps:$4 sm:$0xff]   ;;  %3896 = vst.msk [vmem:[#allocation2 + $0x7c] sm:$0xf] %vm2008_vm6, %v3708_v61  ;;  %v5908_v29 = vcombine.low %v3995_v6, %v3996_v28  ;;  %v5719_v6 = vld [vmem:[%s6167_s20 + $0xc0] sm:$0xf] }
 0x2c5   : > { %3064 = vrot.lane.b32.xlu1 %v5717_v1, %s6120_s22  ;;  %v2702_v21 = vpop.permute.xlu0 %2701  ;;  %4701 = vmatprep.mubr.bf16.mxu1 %v6064_v15  ;;  %v5794_v1 = vld [vmem:[%s6167_s20 + $0xc4] sm:$0x1]  ;;  %2206 = vst.msk [vmem:[#allocation2 + $0x1e4] sm:$0xf] %vm267_vm3, %v5582_v17  ;;  %v5665_v28 = vld [vmem:[%s6167_s20 + $0x154] sm:$0xe] }
 0x2c6   : > { %2857 = vst.msk [vmem:[#allocation2 + $0x184] sm:$0xf] %vm934_vm4, %v2702_v21  ;;  %4702 = vmatmul.mubr.bf16.gmra.mxu1 %v5908_v29  ;;  %v3544_v15 = vrot.slane %v3542_v3, 4  ;;  %v2581_v29 = vrot.slane %v5666_v22, 5  ;;  %v5690_v38 = vrot.slane %v5665_v28, 9 }
 0x2c7   : > { %v2704_v14 = vpop.permute.xlu1 %2703  ;;  %3725 = vrot.lane.b32.xlu0 %v3537_v11, %s6121_s23  ;;  %v3545_v11 = vrot.slane %v5794_v1, 5 }
 0x2c8   : > { %2858 = vst.msk [vmem:[#allocation2 + $0x18c] sm:$0xf] %vm934_vm4, %v2704_v14  ;;  %v2583_v27 = vrot.slane %v2581_v29, 4  ;;  %v2582_v43 = vsel %vm6160_vm2, %v5690_v38, %v2581_v29 }
 0x2c9   : > { %3727 = vrot.lane.b32.xlu1 %v3540_v31, %s6121_s23  ;;  %v3111_v30 = vpop.permute.xlu0 %3110  ;;  %v3963_v8 = vld [vmem:[#allocation2 + $0x70] sm:$0xff]  ;;  %v3546_v14 = vsel %vm6160_vm2, %v3544_v15, %v3545_v11  ;;  %v5796_v15 = vld [vmem:[%s6167_s20 + $0xcc] sm:$0xf] }
 0x2ca   : > { %3266 = vst.msk [vmem:[#allocation2 + $0x184] sm:$0xf] %vm1344_vm5, %v3111_v30  ;;  %v5550_v30 = vld [vmem:[%s6167_s20 + $0xb4] sm:$0xf] }
 0x2cb   : > { %v3113_v54 = vpop.permute.xlu1 %3112  ;;  %2721 = vrot.lane.b32.xlu0 %v2575_v26, %s6119_s21  ;;  %v3964_v35 = vld [vmem:[#allocation2 + $0x78] sm:$0xff]  ;;  %v2584_v26 = vrot.slane %v8253_v4, 5  ;;  %2174 = vst.msk [vmem:[#allocation2 + $0xe4] sm:$0xf] %vm267_vm3, %v5550_v30 }
 0x2cc   : > { %v6066_v32 = vld [vmem:[#allocation2 + $0x74] ss:$8 sps:$4 sm:$0xff]   ;;  %3267 = vst.msk [vmem:[#allocation2 + $0x18c] sm:$0xf] %vm1344_vm5, %v3113_v54  ;;  %v5876_v48 = vcombine.low %v3963_v8, %v3964_v35 }
 0x2cd   : > { %2723 = vrot.lane.b32.xlu1 %v2578_v44, %s6119_s21  ;;  %v2638_v39 = vpop.permute.xlu0 %2637  ;;  %4573 = vmatprep.mubr.bf16.mxu0 %v6066_v32  ;;  %v5551_v44 = vld [vmem:[%s6167_s20 + $0xb8] sm:$0xf]  ;;  %v5625_v8 = vld [vmem:[%s6167_s20 + $0xb4] sm:$0xe]  ;;  %v2585_v35 = vsel %vm6160_vm2, %v2583_v27, %v2584_v26  ;;  %v2477_v32 = vrot.slane %v5626_v50, 5 }
 0x2ce   : > { %2825 = vst.msk [vmem:[#allocation2 + $0x84] sm:$0xf] %vm934_vm4, %v2638_v39  ;;  %4574 = vmatmul.mubr.bf16.gmra.mxu0 %v5876_v48  ;;  %v5836_v48 = vld [vmem:[%s6167_s20 + $0x16c] sm:$0xf]  ;;  %v5682_v40 = vrot.slane %v5625_v8, 9 }
 0x2cf   : > { %v2640_v36 = vpop.permute.xlu1 %2639  ;;  %3130 = vrot.lane.b32.xlu0 %v5750_v56, %s6120_s22  ;;  %2175 = vst.msk [vmem:[#allocation2 + $0xec] sm:$0xf] %vm267_vm3, %v5551_v44  ;;  %v8281_v56 = vld [vmem:[%s6167_s20 + $0xbc] sm:$0xf]  ;;  %v2479_v53 = vrot.slane %v2477_v32, 4  ;;  %v3653_v7 = vrot.slane %v5836_v48, 5 }
 0x2d0   : > { %2826 = vst.msk [vmem:[#allocation2 + $0x8c] sm:$0xf] %vm934_vm4, %v2640_v36  ;;  %v2478_v17 = vsel %vm6160_vm2, %v5682_v40, %v2477_v32  ;;  %v5720_v27 = vld [vmem:[%s6167_s20 + $0xc8] sm:$0xf] }
 0x2d1   : > { %3132 = vrot.lane.b32.xlu1 %v5751_v47, %s6120_s22  ;;  %v3774_v62 = vpop.permute.xlu0 %3773  ;;  %v3655_v18 = vrot.slane %v3653_v7, 4 }
 0x2d2   : > { %3929 = vst.msk [vmem:[#allocation2 + $0x184] sm:$0xf] %vm2008_vm6, %v3774_v62  ;;  %v5835_v62 = vld [vmem:[%s6167_s20 + $0x168] sm:$0xe] }
 0x2d3   : > { %v3776_v5 = vpop.permute.xlu1 %3775  ;;  %2657 = vrot.lane.b32.xlu0 %v2471_v37, %s6119_s21  ;;  %v5860_v20 = vrot.slane %v5835_v62, 9  ;;  %v5498_v62 = vld [vmem:[%s6167_s20 + $0x14c] sm:$0xf] }
 0x2d4   : > { %3930 = vst.msk [vmem:[#allocation2 + $0x18c] sm:$0xf] %vm2008_vm6, %v3776_v5  ;;  %v2480_v5 = vrot.slane %v8281_v56, 5 }
 0x2d5   : > { %2659 = vrot.lane.b32.xlu1 %v2474_v2, %s6119_s21  ;;  %v3047_v63 = vpop.permute.xlu0 %3046  ;;  %v3654_v29 = vsel %vm6160_vm2, %v5860_v20, %v3653_v7  ;;  %v5628_v20 = vld [vmem:[%s6167_s20 + $0xc0] sm:$0xf] }
 0x2d6   : > { %3234 = vst.msk [vmem:[#allocation2 + $0x84] sm:$0xf] %vm1344_vm5, %v3047_v63 }
 0x2d7   : > { %v3049_v57 = vpop.permute.xlu1 %3048  ;;  %3793 = vrot.lane.b32.xlu0 %v3647_v46, %s6121_s23 }
 0x2d8   : > { %3235 = vst.msk [vmem:[#allocation2 + $0x8c] sm:$0xf] %vm1344_vm5, %v3049_v57 }
 0x2d9   : > { %3795 = vrot.lane.b32.xlu1 %v3650_v12, %s6121_s23  ;;  %v3710_v61 = vpop.permute.xlu0 %3709  ;;  %v3997_v31 = vld [vmem:[#allocation2 + $0x180] sm:$0xff]  ;;  %v8305_v12 = vld [vmem:[%s6167_s20 + $0x170] sm:$0xf] }
 0x2da   : > { %3897 = vst.msk [vmem:[#allocation2 + $0x84] sm:$0xf] %vm2008_vm6, %v3710_v61  ;;  %v3656_v61 = vrot.slane %v8305_v12, 5 }
 0x2db   : > { %v3712_v21 = vpop.permute.xlu1 %3711  ;;  %3066 = vrot.lane.b32.xlu0 %v5718_v23, %s6120_s22  ;;  %v3998_v13 = vld [vmem:[#allocation2 + $0x188] sm:$0xff]  ;;  %v2481_v23 = vsel %vm6160_vm2, %v2479_v53, %v2480_v5 }
 0x2dc   : > { %v6068_v9 = vld [vmem:[#allocation2 + $0x184] ss:$8 sps:$4 sm:$0xff]   ;;  %3898 = vst.msk [vmem:[#allocation2 + $0x8c] sm:$0xf] %vm2008_vm6, %v3712_v21  ;;  %v5910_v34 = vcombine.low %v3997_v31, %v3998_v13  ;;  %v5795_v31 = vld [vmem:[%s6167_s20 + $0xc8] sm:$0xe]  ;;  %v3657_v13 = vsel %vm6160_vm2, %v3655_v18, %v3656_v61 }
 0x2dd   : > { %3068 = vrot.lane.b32.xlu1 %v5719_v6, %s6120_s22  ;;  %v2706_v42 = vpop.permute.xlu0 %2705  ;;  %4709 = vmatprep.mubr.bf16.mxu1 %v6068_v9  ;;  %v3549_v9 = vrot.slane %v5796_v15, 5  ;;  %v5852_v30 = vrot.slane %v5795_v31, 9 }
 0x2de   : > { %2859 = vst.msk [vmem:[#allocation2 + $0x194] sm:$0xf] %vm934_vm4, %v2706_v42  ;;  %4710 = vmatmul.mubr.bf16.gmra.mxu1 %v5910_v34  ;;  %v5585_v34 = vld [vmem:[%s6167_s20 + $0x160] sm:$0xf]  ;;  %v8336_v42 = vld [vmem:[%s6167_s20 + $0xd0] sm:$0xf] }
 0x2df   : > { %v2708_v45 = vpop.permute.xlu1 %2707  ;;  %3729 = vrot.lane.b32.xlu0 %v3543_v33, %s6121_s23  ;;  %v5584_v33 = vld [vmem:[%s6167_s20 + $0x15c] sm:$0xf]  ;;  %2209 = vst.msk [vmem:[#allocation2 + $0x1fc] sm:$0xf] %vm267_vm3, %v5585_v34  ;;  %v3552_v50 = vrot.slane %v8336_v42, 5 }
 0x2e0   : > { %2860 = vst.msk [vmem:[#allocation2 + $0x19c] sm:$0xf] %vm934_vm4, %v2708_v45  ;;  %v5721_v45 = vld [vmem:[%s6167_s20 + $0xcc] sm:$0xf] }
 0x2e1   : > { %3731 = vrot.lane.b32.xlu1 %v3546_v14, %s6121_s23  ;;  %v3115_v54 = vpop.permute.xlu0 %3114  ;;  %v3965_v39 = vld [vmem:[#allocation2 + $0x80] sm:$0xff]  ;;  %2208 = vst.msk [vmem:[#allocation2 + $0x1f4] sm:$0xf] %vm267_vm3, %v5584_v33 }
 0x2e2   : > { %3268 = vst.msk [vmem:[#allocation2 + $0x194] sm:$0xf] %vm1344_vm5, %v3115_v54  ;;  %v5668_v14 = vld [vmem:[%s6167_s20 + $0x160] sm:$0xf]  ;;  %v5669_v54 = vld [vmem:[%s6167_s20 + $0x164] sm:$0x1] }
 0x2e3   : > { %v3117_v51 = vpop.permute.xlu1 %3116  ;;  %2725 = vrot.lane.b32.xlu0 %v2582_v43, %s6119_s21  ;;  %v3966_v47 = vld [vmem:[#allocation2 + $0x88] sm:$0xff]  ;;  %v2587_v43 = vrot.slane %v5668_v14, 5 }
 0x2e4   : > { %v6070_v59 = vld [vmem:[#allocation2 + $0x84] ss:$8 sps:$4 sm:$0xff]   ;;  %3269 = vst.msk [vmem:[#allocation2 + $0x19c] sm:$0xf] %vm1344_vm5, %v3117_v51  ;;  %v5878_v36 = vcombine.low %v3965_v39, %v3966_v47  ;;  %v3550_v51 = vsel %vm6160_vm2, %v5852_v30, %v3549_v9  ;;  %v2586_v47 = vrot.slane %v2584_v26, 4 }
 0x2e5   : > { %2727 = vrot.lane.b32.xlu1 %v2585_v35, %s6119_s21  ;;  %v2642_v37 = vpop.permute.xlu0 %2641  ;;  %4581 = vmatprep.mubr.bf16.mxu0 %v6070_v59  ;;  %v4519_v2 = vpop.f32.mrf.mxu0  ;;  %v2589_v40 = vrot.slane %v2587_v43, 4 }
 0x2e6   : > { %2827 = vst.msk [vmem:[#allocation2 + $0x94] sm:$0xf] %vm934_vm4, %v2642_v37  ;;  %4582 = vmatmul.mubr.bf16.gmra.mxu0 %v5878_v36  ;;  %v4797_v63 = vmul.f32 %v8290_v58, %v4519_v2  ;;  %v2590_v37 = vrot.slane %v5669_v54, 5 }
 0x2e7   : > { %v2644_v46 = vpop.permute.xlu1 %2643  ;;  %3134 = vrot.lane.b32.xlu0 %v5752_v60, %s6120_s22  ;;  %v4521_v3 = vpop.f32.mrf.mxu0 }
 0x2e8   : > { %2828 = vst.msk [vmem:[#allocation2 + $0x9c] sm:$0xf] %vm934_vm4, %v2644_v46  ;;  %v4872_v57 = vadd.f32 %v8296_v55, %v4797_v63  ;;  %v1786_v46 = vrot.slane %v5498_v62, 5  ;;  %v5499_v63 = vld [vmem:[%s6167_s20 + $0x150] sm:$0x1] }
 0x2e9   : > { %3136 = vrot.lane.b32.xlu1 %v5753_v49, %s6120_s22  ;;  %v3778_v1 = vpop.permute.xlu0 %3777  ;;  %v4522_v22 = vpop.f32.mrf.mxu0  ;;  %v2588_v49 = vsel %vm6160_vm2, %v2586_v47, %v2587_v43  ;;  %v1789_v34 = vrot.slane %v5499_v63, 5  ;;  %v5799_v62 = vld [vmem:[%s6167_s20 + $0xd8] sm:$0x1] }
 0x2ea   : > { %3931 = vst.msk [vmem:[#allocation2 + $0x194] sm:$0xf] %vm2008_vm6, %v3778_v1  ;;  %v4940_v6 = vmax.f32 %v4872_v57, 0.0  ;;  %v5552_v57 = vld [vmem:[%s6167_s20 + $0xbc] sm:$0xf]  ;;  %v1788_v33 = vrot.slane %v1786_v46, 4 }
 0x2eb   : > { %v3780_v28 = vpop.permute.xlu1 %3779  ;;  %2661 = vrot.lane.b32.xlu0 %v2478_v17, %s6119_s21  ;;  %v4524_v11 = vpop.f32.mrf.mxu0  ;;  %v2591_v17 = vsel %vm6160_vm2, %v2589_v40, %v2590_v37  ;;  %v5553_v1 = vld [vmem:[%s6167_s20 + $0xc0] sm:$0xf]  ;;  %2176 = vst.msk [vmem:[#allocation2 + $0xf4] sm:$0xf] %vm267_vm3, %v5552_v57 }
 0x2ec   : > { %3932 = vst.msk [vmem:[#allocation2 + $0x19c] sm:$0xf] %vm2008_vm6, %v3780_v28  ;;  %5008 = vst [vmem:[#allocation3] sm:$0xff] %v4940_v6  ;;  %v5754_v11 = vld [vmem:[%s6167_s20 + $0x170] sm:$0xf]  ;;  %v1790_v43 = vsel %vm6160_vm2, %v1788_v33, %v1789_v34 }
 0x2ed   : > { %2663 = vrot.lane.b32.xlu1 %v2481_v23, %s6119_s21  ;;  %v3051_v21 = vpop.permute.xlu0 %3050  ;;  %5076 = vst [vmem:[#allocation3] sm:$0x1] %v6123_v24  ;;  %2177 = vst.msk [vmem:[#allocation2 + $0xfc] sm:$0xf] %vm267_vm3, %v5553_v1  ;;  %v5670_v1 = vld [vmem:[%s6167_s20 + $0x168] sm:$0xe] }
 0x2ee   : > { %3236 = vst.msk [vmem:[#allocation2 + $0x94] sm:$0xf] %vm1344_vm5, %v3051_v21  ;;  %5093 = vst [vmem:[#allocation3] sm:$0xff] %v6123_v24  ;;  %v3551_v24 = vrot.slane %v3549_v9, 4  ;;  %v1785_v21 = vrot.slane %v1783_v25, 4 }
 0x2ef   : > { %v3053_v38 = vpop.permute.xlu1 %3052  ;;  %3797 = vrot.lane.b32.xlu0 %v3654_v29, %s6121_s23  ;;  %v5755_v9 = vld [vmem:[%s6167_s20 + $0x174] sm:$0xf] }
 0x2f0   : > { %3237 = vst.msk [vmem:[#allocation2 + $0x9c] sm:$0xf] %vm1344_vm5, %v3053_v38  ;;  %v3553_v36 = vsel %vm6160_vm2, %v3551_v24, %v3552_v50  ;;  %v2483_v38 = vrot.slane %v5628_v20, 5  ;;  %v1787_v30 = vsel %vm6160_vm2, %v1785_v21, %v1786_v46  ;;  %v3554_v20 = vrot.slane %v3552_v50, 4  ;;  %v8435_v50 = vld [vmem:[%s6167_s20 + $0x170] sm:$0xf] }
 0x2f1   : > { %3799 = vrot.lane.b32.xlu1 %v3657_v13, %s6121_s23  ;;  %v3714_v44 = vpop.permute.xlu0 %3713  ;;  %v3999_v35 = vld [vmem:[#allocation2 + $0x190] sm:$0xff]  ;;  %v5691_v21 = vrot.slane %v5670_v1, 9 }
 0x2f2   : > { %3899 = vst.msk [vmem:[#allocation2 + $0x94] sm:$0xf] %vm2008_vm6, %v3714_v44  ;;  %v2482_v44 = vrot.slane %v2480_v5, 4  ;;  %v2485_v54 = vrot.slane %v2483_v38, 4 }
 0x2f3   : > { %v3716_v8 = vpop.permute.xlu1 %3715  ;;  %3070 = vrot.lane.b32.xlu0 %v5720_v27, %s6120_s22  ;;  %v4000_v32 = vld [vmem:[#allocation2 + $0x198] sm:$0xff]  ;;  %v5629_v27 = vld [vmem:[%s6167_s20 + $0xc4] sm:$0x1] }
 0x2f4   : > { %v6072_v48 = vld [vmem:[#allocation2 + $0x194] ss:$8 sps:$4 sm:$0xff]   ;;  %3900 = vst.msk [vmem:[#allocation2 + $0x9c] sm:$0xf] %vm2008_vm6, %v3716_v8  ;;  %v5912_v39 = vcombine.low %v3999_v35, %v4000_v32  ;;  %v2486_v8 = vrot.slane %v5629_v27, 5  ;;  %v3659_v35 = vrot.slane %v5838_v16, 5  ;;  %v2484_v5 = vsel %vm6160_vm2, %v2482_v44, %v2483_v38 }
 0x2f5   : > { %3072 = vrot.lane.b32.xlu1 %v5721_v45, %s6120_s22  ;;  %v2710_v59 = vpop.permute.xlu0 %2709  ;;  %4717 = vmatprep.mubr.bf16.mxu1 %v6072_v48  ;;  %v4655_v60 = vpop.f32.mrf.mxu1  ;;  %v5839_v48 = vld [vmem:[%s6167_s20 + $0x178] sm:$0x1]  ;;  %v2597_v38 = vrot.slane %v8435_v50, 5 }
 0x2f6   : > { %2861 = vst.msk [vmem:[#allocation2 + $0x1a4] sm:$0xf] %vm934_vm4, %v2710_v59  ;;  %4718 = vmatmul.mubr.bf16.gmra.mxu1 %v5912_v39  ;;  %v4831_v26 = vmul.f32 %v8290_v58, %v4655_v60  ;;  %v2487_v47 = vsel %vm6160_vm2, %v2485_v54, %v2486_v8  ;;  %v3661_v59 = vrot.slane %v3659_v35, 4  ;;  %v3662_v60 = vrot.slane %v5839_v48, 5  ;;  %v8455_v48 = vld [vmem:[#allocation3 + $0x8] sm:$0xff] }
 0x2f7   : > { %v2712_v4 = vpop.permute.xlu1 %2711  ;;  %3733 = vrot.lane.b32.xlu0 %v3550_v51, %s6121_s23  ;;  %v4657_v2 = vpop.f32.mrf.mxu1  ;;  %v3658_v51 = vrot.slane %v3656_v61, 4 }
 0x2f8   : > { %2862 = vst.msk [vmem:[#allocation2 + $0x1ac] sm:$0xf] %vm934_vm4, %v2712_v4  ;;  %v4906_v53 = vadd.f32 %v8296_v55, %v4831_v26  ;;  %v3663_v4 = vsel %vm6160_vm2, %v3661_v59, %v3662_v60  ;;  %v5671_v26 = vld [vmem:[%s6167_s20 + $0x16c] sm:$0xf]  ;;  %v5586_v2 = vld [vmem:[%s6167_s20 + $0x168] sm:$0xf] }
 0x2f9   : > { %3735 = vrot.lane.b32.xlu1 %v3553_v36, %s6121_s23  ;;  %v3119_v7 = vpop.permute.xlu0 %3118  ;;  %v4658_v3 = vpop.f32.mrf.mxu1  ;;  %v3967_v18 = vld [vmem:[#allocation2 + $0x90] sm:$0xff]  ;;  %v3660_v12 = vsel %vm6160_vm2, %v3658_v51, %v3659_v35  ;;  %2210 = vst.msk [vmem:[#allocation2 + $0x204] sm:$0xf] %vm267_vm3, %v5586_v2  ;;  %v5630_v2 = vld [vmem:[%s6167_s20 + $0xc8] sm:$0xe] }
 0x2fa   : > { %3270 = vst.msk [vmem:[#allocation2 + $0x1a4] sm:$0xf] %vm1344_vm5, %v3119_v7  ;;  %v4974_v22 = vmax.f32 %v4906_v53, 0.0  ;;  %v5798_v36 = vld [vmem:[%s6167_s20 + $0xd4] sm:$0xf] }
 0x2fb   : > { %v3121_v23 = vpop.permute.xlu1 %3120  ;;  %2729 = vrot.lane.b32.xlu0 %v2588_v49, %s6119_s21  ;;  %v3968_v6 = vld [vmem:[#allocation2 + $0x98] sm:$0xff]  ;;  %v4660_v15 = vpop.f32.mrf.mxu1  ;;  %v3555_v37 = vrot.slane %v5798_v36, 5  ;;  %v5587_v49 = vld [vmem:[%s6167_s20 + $0x16c] sm:$0xf]  ;;  %v5722_v3 = vld [vmem:[%s6167_s20 + $0xd0] sm:$0xf] }
 0x2fc   : > { %v6074_v28 = vld [vmem:[#allocation2 + $0x94] ss:$8 sps:$4 sm:$0xff]   ;;  %3271 = vst.msk [vmem:[#allocation2 + $0x1ac] sm:$0xf] %vm1344_vm5, %v3121_v23  ;;  %v5880_v29 = vcombine.low %v3967_v18, %v3968_v6  ;;  %5042 = vst [vmem:[#allocation3 + $0x110] sm:$0xff] %v4974_v22  ;;  %v3558_v6 = vrot.slane %v5799_v62, 5 }
 0x2fd   : > { %2731 = vrot.lane.b32.xlu1 %v2591_v17, %s6119_s21  ;;  %v2646_v31 = vpop.permute.xlu0 %2645  ;;  %4589 = vmatprep.mubr.bf16.mxu0 %v6074_v28  ;;  %2211 = vst.msk [vmem:[#allocation2 + $0x20c] sm:$0xf] %vm267_vm3, %v5587_v49  ;;  %v5723_v23 = vld [vmem:[%s6167_s20 + $0xd4] sm:$0xf]  ;;  %v3557_v18 = vrot.slane %v3555_v37, 4  ;;  %v2594_v28 = vrot.slane %v5671_v26, 5 }
 0x2fe   : > { %2829 = vst.msk [vmem:[#allocation2 + $0xa4] sm:$0xf] %vm934_vm4, %v2646_v31  ;;  %v4527_v13 = vpop.f32.mrf.mxu0  ;;  %4590 = vmatmul.mubr.bf16.gmra.mxu0 %v5880_v29  ;;  %v3556_v29 = vsel %vm6160_vm2, %v3554_v20, %v3555_v37  ;;  %v5756_v37 = vld [vmem:[%s6167_s20 + $0x17c] sm:$0xf] }
 0x2ff   : > { %v2648_v14 = vpop.permute.xlu1 %2647  ;;  %3138 = vrot.lane.b32.xlu0 %v5754_v11, %s6120_s22  ;;  %v3559_v33 = vsel %vm6160_vm2, %v3557_v18, %v3558_v6  ;;  %v2596_v34 = vrot.slane %v2594_v28, 4 }
 0x300   : > { %2830 = vst.msk [vmem:[#allocation2 + $0xac] sm:$0xf] %vm934_vm4, %v2648_v14  ;;  %v4529_v25 = vpop.f32.mrf.mxu0  ;;  %v5501_v14 = vld [vmem:[%s6167_s20 + $0x158] sm:$0xf] }
 0x301   : > { %3140 = vrot.lane.b32.xlu1 %v5755_v9, %s6120_s22  ;;  %v3782_v45 = vpop.permute.xlu0 %3781  ;;  %v1793_v51 = vrot.slane %v5501_v14, 5 }
 0x302   : > { %3933 = vst.msk [vmem:[#allocation2 + $0x1a4] sm:$0xf] %vm2008_vm6, %v3782_v45  ;;  %v4530_v24 = vpop.f32.mrf.mxu0 }
 0x303   : > { %v3784_v32 = vpop.permute.xlu1 %3783  ;;  %1928 = vrot.lane.b32.xlu0 %v1787_v30, %s6121_s23 }
 0x304   : > { %3934 = vst.msk [vmem:[#allocation2 + $0x1ac] sm:$0xf] %vm2008_vm6, %v3784_v32  ;;  %v4532_v56 = vpop.f32.mrf.mxu0  ;;  %v5500_v32 = vld [vmem:[%s6167_s20 + $0x154] sm:$0xe] }
 0x305   : > { %1930 = vrot.lane.b32.xlu1 %v1790_v43, %s6121_s23  ;;  %v3055_v39 = vpop.permute.xlu0 %3054  ;;  %v2595_v43 = vsel %vm6160_vm2, %v5691_v21, %v2594_v28  ;;  %v5521_v62 = vrot.slane %v5500_v32, 9  ;;  %v5840_v28 = vld [vmem:[%s6167_s20 + $0x17c] sm:$0xe]  ;;  %v5588_v32 = vld [vmem:[%s6167_s20 + $0x170] sm:$0xf] }
 0x306   : > { %3238 = vst.msk [vmem:[#allocation2 + $0xa4] sm:$0xf] %vm1344_vm5, %v3055_v39  ;;  %v5554_v39 = vld [vmem:[%s6167_s20 + $0xc8] sm:$0xf] }
 0x307   : > { %v3057_v40 = vpop.permute.xlu1 %3056  ;;  %2665 = vrot.lane.b32.xlu0 %v2484_v5, %s6119_s21  ;;  %v2598_v5 = vsel %vm6160_vm2, %v2596_v34, %v2597_v38  ;;  %2178 = vst.msk [vmem:[#allocation2 + $0x104] sm:$0xf] %vm267_vm3, %v5554_v39  ;;  %v5673_v39 = vld [vmem:[%s6167_s20 + $0x174] sm:$0xf]  ;;  %2212 = vst.msk [vmem:[#allocation2 + $0x214] sm:$0xf] %vm267_vm3, %v5588_v32 }
 0x308   : > { %3239 = vst.msk [vmem:[#allocation2 + $0xac] sm:$0xf] %vm1344_vm5, %v3057_v40  ;;  %v8468_v40 = vld [vmem:[%s6167_s20 + $0x15c] sm:$0xf] }
 0x309   : > { %2667 = vrot.lane.b32.xlu1 %v2487_v47, %s6119_s21  ;;  %v3718_v61 = vpop.permute.xlu0 %3717  ;;  %v4001_v7 = vld [vmem:[#allocation2 + $0x1a0] sm:$0xff]  ;;  %v5555_v47 = vld [vmem:[%s6167_s20 + $0xcc] sm:$0xf] }
 0x30a   : > { %3901 = vst.msk [vmem:[#allocation2 + $0xa4] sm:$0xf] %vm2008_vm6, %v3718_v61 }
 0x30b   : > { %v3720_v53 = vpop.permute.xlu1 %3719  ;;  %3801 = vrot.lane.b32.xlu0 %v3660_v12, %s6121_s23  ;;  %v4002_v46 = vld [vmem:[#allocation2 + $0x1a8] sm:$0xff]  ;;  %2179 = vst.msk [vmem:[#allocation2 + $0x10c] sm:$0xf] %vm267_vm3, %v5555_v47 }
 0x30c   : > { %v6076_v63 = vld [vmem:[#allocation2 + $0x1a4] ss:$8 sps:$4 sm:$0xff]   ;;  %3902 = vst.msk [vmem:[#allocation2 + $0xac] sm:$0xf] %vm2008_vm6, %v3720_v53  ;;  %v5914_v17 = vcombine.low %v4001_v7, %v4002_v46  ;;  %v5757_v53 = vld [vmem:[%s6167_s20 + $0x180] sm:$0xf] }
 0x30d   : > { %3803 = vrot.lane.b32.xlu1 %v3663_v4, %s6121_s23  ;;  %v2714_v57 = vpop.permute.xlu0 %2713  ;;  %4725 = vmatprep.mubr.bf16.mxu1 %v6076_v63  ;;  %v5631_v12 = vld [vmem:[%s6167_s20 + $0xcc] sm:$0xf]  ;;  %v1795_v7 = vrot.slane %v1793_v51, 4  ;;  %v1796_v46 = vrot.slane %v8468_v40, 5 }
 0x30e   : > { %2863 = vst.msk [vmem:[#allocation2 + $0x1b4] sm:$0xf] %vm934_vm4, %v2714_v57  ;;  %v4663_v22 = vpop.f32.mrf.mxu1  ;;  %4726 = vmatmul.mubr.bf16.gmra.mxu1 %v5914_v17  ;;  %v2490_v63 = vrot.slane %v5631_v12, 5  ;;  %v5841_v57 = vld [vmem:[%s6167_s20 + $0x180] sm:$0xf] }
 0x30f   : > { %v2716_v15 = vpop.permute.xlu1 %2715  ;;  %3074 = vrot.lane.b32.xlu0 %v5722_v3, %s6120_s22  ;;  %v4833_v42 = vmul.f32 %v8290_v58, %v4663_v22  ;;  %v1794_v22 = vsel %vm6160_vm2, %v5521_v62, %v1793_v51 }
 0x310   : > { %2864 = vst.msk [vmem:[#allocation2 + $0x1bc] sm:$0xf] %vm934_vm4, %v2716_v15  ;;  %v4665_v11 = vpop.f32.mrf.mxu1  ;;  %v1797_v15 = vsel %vm6160_vm2, %v1795_v7, %v1796_v46 }
 0x311   : > { %v4908_v31 = vadd.f32 %v8296_v55, %v4833_v42  ;;  %3076 = vrot.lane.b32.xlu1 %v5723_v23, %s6120_s22  ;;  %v3123_v13 = vpop.permute.xlu0 %3122  ;;  %v3969_v30 = vld [vmem:[#allocation2 + $0xa0] sm:$0xff]  ;;  %v5683_v23 = vrot.slane %v5630_v2, 9  ;;  %v2492_v42 = vrot.slane %v2490_v63, 4  ;;  %v3666_v11 = vrot.slane %v5841_v57, 5 }
 0x312   : > { %3272 = vst.msk [vmem:[#allocation2 + $0x1b4] sm:$0xf] %vm1344_vm5, %v3123_v13  ;;  %v4666_v9 = vpop.f32.mrf.mxu1  ;;  %v2599_v57 = vrot.slane %v2597_v38, 4  ;;  %v5503_v38 = vld [vmem:[%s6167_s20 + $0x160] sm:$0xf] }
 0x313   : > { %v4976_v27 = vmax.f32 %v4908_v31, 0.0  ;;  %v3125_v16 = vpop.permute.xlu1 %3124  ;;  %3737 = vrot.lane.b32.xlu0 %v3556_v29, %s6121_s23  ;;  %v4834_v25 = vmul.f32 %v8290_v58, %v4666_v9  ;;  %v3970_v44 = vld [vmem:[#allocation2 + $0xa8] sm:$0xff]  ;;  %v8498_v31 = vld [vmem:[%s6167_s20 + $0x184] sm:$0xf]  ;;  %v2491_v13 = vsel %vm6160_vm2, %v5683_v23, %v2490_v63  ;;  %v5861_v9 = vrot.slane %v5840_v28, 9 }
 0x314   : > { %v6078_v45 = vld [vmem:[#allocation2 + $0xa4] ss:$8 sps:$4 sm:$0xff]   ;;  %3273 = vst.msk [vmem:[#allocation2 + $0x1bc] sm:$0xf] %vm1344_vm5, %v3125_v16  ;;  %v4668_v24 = vpop.f32.mrf.mxu1  ;;  %v5882_v54 = vcombine.low %v3969_v30, %v3970_v44  ;;  %v2494_v34 = vsel %vm6160_vm2, %v2492_v42, %v2493_v52  ;;  %v3668_v14 = vrot.slane %v3666_v11, 4 }
 0x315   : > { %5044 = vst [vmem:[#allocation3 + $0x120] sm:$0xff] %v4976_v27  ;;  %v4909_v8 = vadd.f32 %v8296_v55, %v4834_v25  ;;  %3739 = vrot.lane.b32.xlu1 %v3559_v33, %s6121_s23  ;;  %v2650_v35 = vpop.permute.xlu0 %2649  ;;  %4597 = vmatprep.mubr.bf16.mxu0 %v6078_v45  ;;  %v3669_v27 = vrot.slane %v8498_v31, 5  ;;  %v5801_v16 = vld [vmem:[%s6167_s20 + $0xe0] sm:$0xf]  ;;  %v3667_v41 = vsel %vm6160_vm2, %v5861_v9, %v3666_v11 }
 0x316   : > { %5085 = vst [vmem:[#allocation3 + $0x120] sm:$0x1] %v8455_v48  ;;  %2831 = vst.msk [vmem:[#allocation2 + $0xb4] sm:$0xf] %vm934_vm4, %v2650_v35  ;;  %v4535_v56 = vpop.f32.mrf.mxu0  ;;  %4598 = vmatmul.mubr.bf16.gmra.mxu0 %v5882_v54  ;;  %v3562_v35 = vrot.slane %v5801_v16, 5 }
 0x317   : > { %v4977_v59 = vmax.f32 %v4909_v8, 0.0  ;;  %v2652_v60 = vpop.permute.xlu1 %2651  ;;  %2733 = vrot.lane.b32.xlu0 %v2595_v43, %s6119_s21  ;;  %v4801_v36 = vmul.f32 %v8290_v58, %v4535_v56  ;;  %v5800_v43 = vld [vmem:[%s6167_s20 + $0xdc] sm:$0xe]  ;;  %v3670_v8 = vsel %vm6160_vm2, %v3668_v14, %v3669_v27  ;;  %v5589_v56 = vld [vmem:[%s6167_s20 + $0x174] sm:$0xf] }
 0x318   : > { %2832 = vst.msk [vmem:[#allocation2 + $0xbc] sm:$0xf] %vm934_vm4, %v2652_v60  ;;  %v4537_v61 = vpop.f32.mrf.mxu0  ;;  %v5853_v60 = vrot.slane %v5800_v43, 9  ;;  %v3564_v62 = vrot.slane %v3562_v35, 4  ;;  %v5758_v16 = vld [vmem:[%s6167_s20 + $0x184] sm:$0xf] }
 0x319   : > { %5045 = vst [vmem:[#allocation3 + $0x128] sm:$0xff] %v4977_v59  ;;  %v4876_v4 = vadd.f32 %v8296_v55, %v4801_v36  ;;  %2735 = vrot.lane.b32.xlu1 %v2598_v5, %s6119_s21  ;;  %v3786_v26 = vpop.permute.xlu0 %3785  ;;  %2213 = vst.msk [vmem:[#allocation2 + $0x21c] sm:$0xf] %vm267_vm3, %v5589_v56  ;;  %v5724_v59 = vld [vmem:[%s6167_s20 + $0xdc] sm:$0xf] }
 0x31a   : > { %3935 = vst.msk [vmem:[#allocation2 + $0x1b4] sm:$0xf] %vm2008_vm6, %v3786_v26  ;;  %v4538_v49 = vpop.f32.mrf.mxu0  ;;  %v5674_v26 = vld [vmem:[%s6167_s20 + $0x178] sm:$0x1]  ;;  %v3566_v23 = vsel %vm6160_vm2, %v3564_v62, %v3565_v19  ;;  %v5844_v43 = vld [vmem:[%s6167_s20 + $0x18c] sm:$0x1] }
 0x31b   : > { %v4944_v3 = vmax.f32 %v4876_v4, 0.0  ;;  %v3788_v17 = vpop.permute.xlu1 %3787  ;;  %3142 = vrot.lane.b32.xlu0 %v5756_v37, %s6120_s22  ;;  %v4802_v20 = vmul.f32 %v8290_v58, %v4538_v49  ;;  %v5725_v37 = vld [vmem:[%s6167_s20 + $0xe0] sm:$0xf]  ;;  %v2600_v4 = vrot.slane %v5673_v39, 5  ;;  %v3675_v32 = vrot.slane %v5844_v43, 5 }
 0x31c   : > { %3936 = vst.msk [vmem:[#allocation2 + $0x1bc] sm:$0xf] %vm2008_vm6, %v3788_v17  ;;  %v4540_v1 = vpop.f32.mrf.mxu0  ;;  %v3563_v17 = vsel %vm6160_vm2, %v5853_v60, %v3562_v35 }
 0x31d   : > { %5012 = vst [vmem:[#allocation3 + $0x20] sm:$0xff] %v4944_v3  ;;  %v4877_v18 = vadd.f32 %v8296_v55, %v4802_v20  ;;  %3144 = vrot.lane.b32.xlu1 %v5757_v53, %s6120_s22  ;;  %v3059_v6 = vpop.permute.xlu0 %3058  ;;  %v2601_v10 = vsel %vm6160_vm2, %v2599_v57, %v2600_v4 }
 0x31e   : > { %5077 = vst [vmem:[#allocation3 + $0x20] sm:$0x1] %v8455_v48  ;;  %3240 = vst.msk [vmem:[#allocation2 + $0xb4] sm:$0xf] %vm1344_vm5, %v3059_v6  ;;  %v2603_v6 = vrot.slane %v5674_v26, 5 }
 0x31f   : > { %v4945_v29 = vmax.f32 %v4877_v18, 0.0  ;;  %v3061_v21 = vpop.permute.xlu1 %3060  ;;  %1932 = vrot.lane.b32.xlu0 %v1794_v22, %s6121_s23  ;;  %v2602_v18 = vrot.slane %v2600_v4, 4 }
 0x320   : > { %3241 = vst.msk [vmem:[#allocation2 + $0xbc] sm:$0xf] %vm1344_vm5, %v3061_v21  ;;  %v1799_v21 = vrot.slane %v5503_v38, 5 }
 0x321   : > { %5013 = vst [vmem:[#allocation3 + $0x28] sm:$0xff] %v4945_v29  ;;  %1934 = vrot.lane.b32.xlu1 %v1797_v15, %s6121_s23  ;;  %v3722_v33 = vpop.permute.xlu0 %3721  ;;  %v4003_v30 = vld [vmem:[#allocation2 + $0x1b0] sm:$0xff]  ;;  %v2604_v29 = vsel %vm6160_vm2, %v2602_v18, %v2603_v6 }
 0x322   : > { %3903 = vst.msk [vmem:[#allocation2 + $0xb4] sm:$0xf] %vm2008_vm6, %v3722_v33  ;;  %v5504_v33 = vld [vmem:[%s6167_s20 + $0x164] sm:$0x1] }
 0x323   : > { %v3724_v25 = vpop.permute.xlu1 %3723  ;;  %2669 = vrot.lane.b32.xlu0 %v2491_v13, %s6119_s21  ;;  %v4004_v44 = vld [vmem:[#allocation2 + $0x1b8] sm:$0xff] }
 0x324   : > { %v6080_v45 = vld [vmem:[#allocation2 + $0x1b4] ss:$8 sps:$4 sm:$0xff]   ;;  %3904 = vst.msk [vmem:[#allocation2 + $0xbc] sm:$0xf] %vm2008_vm6, %v3724_v25  ;;  %v5916_v24 = vcombine.low %v4003_v30, %v4004_v44  ;;  %v1798_v25 = vrot.slane %v1796_v46, 4  ;;  %v3671_v46 = vrot.slane %v3669_v27, 4 }
 0x325   : > { %2671 = vrot.lane.b32.xlu1 %v2494_v34, %s6119_s21  ;;  %v2718_v52 = vpop.permute.xlu0 %2717  ;;  %4733 = vmatprep.mubr.bf16.mxu1 %v6080_v45  ;;  %v5843_v34 = vld [vmem:[%s6167_s20 + $0x188] sm:$0xf]  ;;  %v1801_v45 = vrot.slane %v1799_v21, 4 }
 0x326   : > { %2865 = vst.msk [vmem:[#allocation2 + $0x1c4] sm:$0xf] %vm934_vm4, %v2718_v52  ;;  %v4671_v54 = vpop.f32.mrf.mxu1  ;;  %4734 = vmatmul.mubr.bf16.gmra.mxu1 %v5916_v24  ;;  %v5759_v44 = vld [vmem:[%s6167_s20 + $0x188] sm:$0xf]  ;;  %v3672_v24 = vrot.slane %v5843_v34, 5  ;;  %v1800_v40 = vsel %vm6160_vm2, %v1798_v25, %v1799_v21 }
 0x327   : > { %v2720_v5 = vpop.permute.xlu1 %2719  ;;  %3805 = vrot.lane.b32.xlu0 %v3667_v41, %s6121_s23  ;;  %v4835_v51 = vmul.f32 %v8290_v58, %v4671_v54  ;;  %v1802_v41 = vrot.slane %v5504_v33, 5 }
 0x328   : > { %2866 = vst.msk [vmem:[#allocation2 + $0x1cc] sm:$0xf] %vm934_vm4, %v2720_v5  ;;  %v4673_v47 = vpop.f32.mrf.mxu1  ;;  %v3674_v35 = vrot.slane %v3672_v24, 4  ;;  %v3673_v31 = vsel %vm6160_vm2, %v3671_v46, %v3672_v24 }
 0x329   : > { %v4910_v36 = vadd.f32 %v8296_v55, %v4835_v51  ;;  %3807 = vrot.lane.b32.xlu1 %v3670_v8, %s6121_s23  ;;  %v3127_v12 = vpop.permute.xlu0 %3126  ;;  %v3971_v53 = vld [vmem:[#allocation2 + $0xb0] sm:$0xff]  ;;  %v1803_v8 = vsel %vm6160_vm2, %v1801_v45, %v1802_v41 }
 0x32a   : > { %3274 = vst.msk [vmem:[#allocation2 + $0x1c4] sm:$0xf] %vm1344_vm5, %v3127_v12  ;;  %v4674_v61 = vpop.f32.mrf.mxu1  ;;  %v3676_v60 = vsel %vm6160_vm2, %v3674_v35, %v3675_v32 }
 0x32b   : > { %v4978_v2 = vmax.f32 %v4910_v36, 0.0  ;;  %v3129_v49 = vpop.permute.xlu1 %3128  ;;  %3078 = vrot.lane.b32.xlu0 %v5724_v59, %s6120_s22  ;;  %v3972_v7 = vld [vmem:[#allocation2 + $0xb8] sm:$0xff] }
 0x32c   : > { %v6082_v63 = vld [vmem:[#allocation2 + $0xb4] ss:$8 sps:$4 sm:$0xff]   ;;  %3275 = vst.msk [vmem:[#allocation2 + $0x1cc] sm:$0xf] %vm1344_vm5, %v3129_v49  ;;  %v4676_v3 = vpop.f32.mrf.mxu1  ;;  %v5884_v20 = vcombine.low %v3971_v53, %v3972_v7 }
 0x32d   : > { %5046 = vst [vmem:[#allocation3 + $0x130] sm:$0xff] %v4978_v2  ;;  %3080 = vrot.lane.b32.xlu1 %v5725_v37, %s6120_s22  ;;  %v2654_v1 = vpop.permute.xlu0 %2653  ;;  %4605 = vmatprep.mubr.bf16.mxu0 %v6082_v63 }
 0x32e   : > { %2833 = vst.msk [vmem:[#allocation2 + $0xc4] sm:$0xf] %vm934_vm4, %v2654_v1  ;;  %v4543_v22 = vpop.f32.mrf.mxu0  ;;  %4606 = vmatmul.mubr.bf16.gmra.mxu0 %v5884_v20 }
 0x32f   : > { %v2656_v28 = vpop.permute.xlu1 %2655  ;;  %3741 = vrot.lane.b32.xlu0 %v3563_v17, %s6121_s23  ;;  %v4803_v50 = vmul.f32 %v8290_v58, %v4543_v22 }
 0x330   : > { %2834 = vst.msk [vmem:[#allocation2 + $0xcc] sm:$0xf] %vm934_vm4, %v2656_v28  ;;  %v4545_v15 = vpop.f32.mrf.mxu0 }
 0x331   : > { %v4878_v42 = vadd.f32 %v8296_v55, %v4803_v50  ;;  %3743 = vrot.lane.b32.xlu1 %v3566_v23, %s6121_s23  ;;  %v3790_v19 = vpop.permute.xlu0 %3789 }
 0x332   : > { %3937 = vst.msk [vmem:[#allocation2 + $0x1c4] sm:$0xf] %vm2008_vm6, %v3790_v19  ;;  %v4546_v11 = vpop.f32.mrf.mxu0 }
 0x333   : > { %v4946_v13 = vmax.f32 %v4878_v42, 0.0  ;;  %v3792_v9 = vpop.permute.xlu1 %3791  ;;  %2737 = vrot.lane.b32.xlu0 %v2601_v10, %s6119_s21 }
 0x334   : > { %3938 = vst.msk [vmem:[#allocation2 + $0x1cc] sm:$0xf] %vm2008_vm6, %v3792_v9  ;;  %v4548_v14 = vpop.f32.mrf.mxu0 }
 0x335   : > { %5014 = vst [vmem:[#allocation3 + $0x30] sm:$0xff] %v4946_v13  ;;  %2739 = vrot.lane.b32.xlu1 %v2604_v29, %s6119_s21  ;;  %v3063_v30 = vpop.permute.xlu0 %3062 }
 0x336   : > { %3242 = vst.msk [vmem:[#allocation2 + $0xc4] sm:$0xf] %vm1344_vm5, %v3063_v30 }
 0x337   : > { %v3065_v52 = vpop.permute.xlu1 %3064  ;;  %3146 = vrot.lane.b32.xlu0 %v5758_v16, %s6120_s22 }
 0x338   : > { %3243 = vst.msk [vmem:[#allocation2 + $0xcc] sm:$0xf] %vm1344_vm5, %v3065_v52 }
 0x339   : > { %3148 = vrot.lane.b32.xlu1 %v5759_v44, %s6120_s22  ;;  %v3726_v54 = vpop.permute.xlu0 %3725  ;;  %v4005_v5 = vld [vmem:[#allocation2 + $0x1c0] sm:$0xff] }
 0x33a   : > { %3905 = vst.msk [vmem:[#allocation2 + $0xc4] sm:$0xf] %vm2008_vm6, %v3726_v54 }
 0x33b   : > { %v3728_v56 = vpop.permute.xlu1 %3727  ;;  %1936 = vrot.lane.b32.xlu0 %v1800_v40, %s6121_s23  ;;  %v4006_v51 = vld [vmem:[#allocation2 + $0x1c8] sm:$0xff] }
 0x33c   : > { %v6084_v39 = vld [vmem:[#allocation2 + $0x1c4] ss:$8 sps:$4 sm:$0xff]   ;;  %3906 = vst.msk [vmem:[#allocation2 + $0xcc] sm:$0xf] %vm2008_vm6, %v3728_v56  ;;  %v5918_v27 = vcombine.low %v4005_v5, %v4006_v51 }
 0x33d   : > { %1938 = vrot.lane.b32.xlu1 %v1803_v8, %s6121_s23  ;;  %v2722_v47 = vpop.permute.xlu0 %2721  ;;  %4741 = vmatprep.mubr.bf16.mxu1 %v6084_v39 }
 0x33e   : > { %2867 = vst.msk [vmem:[#allocation2 + $0x1d4] sm:$0xf] %vm934_vm4, %v2722_v47  ;;  %v4679_v59 = vpop.f32.mrf.mxu1  ;;  %4742 = vmatmul.mubr.bf16.gmra.mxu1 %v5918_v27 }
 0x33f   : > { %v2724_v36 = vpop.permute.xlu1 %2723  ;;  %3809 = vrot.lane.b32.xlu0 %v3673_v31, %s6121_s23  ;;  %v4837_v12 = vmul.f32 %v8290_v58, %v4679_v59 }
 0x340   : > { %2868 = vst.msk [vmem:[#allocation2 + $0x1dc] sm:$0xf] %vm934_vm4, %v2724_v36  ;;  %v4681_v61 = vpop.f32.mrf.mxu1 }
 0x341   : > { %v4912_v37 = vadd.f32 %v8296_v55, %v4837_v12  ;;  %3811 = vrot.lane.b32.xlu1 %v3676_v60, %s6121_s23  ;;  %v3131_v62 = vpop.permute.xlu0 %3130  ;;  %v3973_v49 = vld [vmem:[#allocation2 + $0xc0] sm:$0xff] }
 0x342   : > { %3276 = vst.msk [vmem:[#allocation2 + $0x1d4] sm:$0xf] %vm1344_vm5, %v3131_v62  ;;  %v4682_v4 = vpop.f32.mrf.mxu1  ;;  %v8625_v61 = vld [vmem:[%s8780_s2] ss:$0 sm:$0xff] }
 0x343   : > { %v4980_v26 = vmax.f32 %v4912_v37, 0.0  ;;  %v3133_v2 = vpop.permute.xlu1 %3132  ;;  %v4838_v0 = vmul.f32 %v8290_v58, %v4682_v4  ;;  %v3974_v53 = vld [vmem:[#allocation2 + $0xc8] sm:$0xff] }
 0x344   : > { %v6086_v7 = vld [vmem:[#allocation2 + $0xc4] ss:$8 sps:$4 sm:$0xff]   ;;  %3277 = vst.msk [vmem:[#allocation2 + $0x1dc] sm:$0xf] %vm1344_vm5, %v3133_v2  ;;  %v4684_v63 = vpop.f32.mrf.mxu1  ;;  %v5886_v3 = vcombine.low %v3973_v49, %v3974_v53 }
 0x345   : > { %5048 = vst [vmem:[#allocation3 + $0x140] sm:$0xff] %v4980_v26  ;;  %v4913_v17 = vadd.f32 %v8296_v55, %v4838_v0  ;;  %v2658_v20 = vpop.permute.xlu0 %2657  ;;  %4613 = vmatprep.mubr.bf16.mxu0 %v6086_v7 }
 0x346   : > { %5086 = vst [vmem:[#allocation3 + $0x140] sm:$0x1] %v8455_v48  ;;  %2835 = vst.msk [vmem:[#allocation2 + $0xd4] sm:$0xf] %vm934_vm4, %v2658_v20  ;;  %v4551_v57 = vpop.f32.mrf.mxu0  ;;  %4614 = vmatmul.mubr.bf16.gmra.mxu0 %v5886_v3 }
 0x347   : > { %v4981_v1 = vmax.f32 %v4913_v17, 0.0  ;;  %v2660_v22 = vpop.permute.xlu1 %2659  ;;  %v4805_v23 = vmul.f32 %v8290_v58, %v4551_v57 }
 0x348   : > { %2836 = vst.msk [vmem:[#allocation2 + $0xdc] sm:$0xf] %vm934_vm4, %v2660_v22  ;;  %v4553_v18 = vpop.f32.mrf.mxu0 }
 0x349   : > { %5049 = vst [vmem:[#allocation3 + $0x148] sm:$0xff] %v4981_v1  ;;  %v4880_v6 = vadd.f32 %v8296_v55, %v4805_v23  ;;  %v3794_v28 = vpop.permute.xlu0 %3793 }
 0x34a   : > { %3939 = vst.msk [vmem:[#allocation2 + $0x1d4] sm:$0xf] %vm2008_vm6, %v3794_v28  ;;  %v4554_v50 = vpop.f32.mrf.mxu0 }
 0x34b   : > { %v4948_v38 = vmax.f32 %v4880_v6, 0.0  ;;  %v3796_v15 = vpop.permute.xlu1 %3795  ;;  %v4806_v10 = vmul.f32 %v8290_v58, %v4554_v50 }
 0x34c   : > { %3940 = vst.msk [vmem:[#allocation2 + $0x1dc] sm:$0xf] %vm2008_vm6, %v3796_v15  ;;  %v4556_v42 = vpop.f32.mrf.mxu0 }
 0x34d   : > { %5016 = vst [vmem:[#allocation3 + $0x40] sm:$0xff] %v4948_v38  ;;  %v4881_v19 = vadd.f32 %v8296_v55, %v4806_v10  ;;  %v3067_v11 = vpop.permute.xlu0 %3066 }
 0x34e   : > { %5078 = vst [vmem:[#allocation3 + $0x40] sm:$0x1] %v8455_v48  ;;  %3244 = vst.msk [vmem:[#allocation2 + $0xd4] sm:$0xf] %vm1344_vm5, %v3067_v11 }
 0x34f   : > { %v4949_v29 = vmax.f32 %v4881_v19, 0.0  ;;  %v3069_v21 = vpop.permute.xlu1 %3068 }
 0x350   : > { %3245 = vst.msk [vmem:[#allocation2 + $0xdc] sm:$0xf] %vm1344_vm5, %v3069_v21 }
 0x351   : > { %5017 = vst [vmem:[#allocation3 + $0x48] sm:$0xff] %v4949_v29  ;;  %v3730_v13 = vpop.permute.xlu0 %3729  ;;  %v4007_v33 = vld [vmem:[#allocation2 + $0x1d0] sm:$0xff] }
 0x352   : > { %3907 = vst.msk [vmem:[#allocation2 + $0xd4] sm:$0xf] %vm2008_vm6, %v3730_v13 }
 0x353   : > { %v3732_v9 = vpop.permute.xlu1 %3731  ;;  %v4008_v34 = vld [vmem:[#allocation2 + $0x1d8] sm:$0xff] }
 0x354   : > { %v6088_v14 = vld [vmem:[#allocation2 + $0x1d4] ss:$8 sps:$4 sm:$0xff]   ;;  %3908 = vst.msk [vmem:[#allocation2 + $0xdc] sm:$0xf] %vm2008_vm6, %v3732_v9  ;;  %v5920_v16 = vcombine.low %v4007_v33, %v4008_v34 }
 0x355   : > { %v2726_v25 = vpop.permute.xlu0 %2725  ;;  %4749 = vmatprep.mubr.bf16.mxu1 %v6088_v14 }
 0x356   : > { %2869 = vst.msk [vmem:[#allocation2 + $0x1e4] sm:$0xf] %vm934_vm4, %v2726_v25  ;;  %v4687_v30 = vpop.f32.mrf.mxu1  ;;  %4750 = vmatmul.mubr.bf16.gmra.mxu1 %v5920_v16 }
 0x357   : > { %v2728_v44 = vpop.permute.xlu1 %2727  ;;  %v4839_v45 = vmul.f32 %v8290_v58, %v4687_v30 }
 0x358   : > { %2870 = vst.msk [vmem:[#allocation2 + $0x1ec] sm:$0xf] %vm934_vm4, %v2728_v44  ;;  %v4689_v41 = vpop.f32.mrf.mxu1 }
 0x359   : > { %v4914_v24 = vadd.f32 %v8296_v55, %v4839_v45  ;;  %v3135_v52 = vpop.permute.xlu0 %3134  ;;  %v3975_v54 = vld [vmem:[#allocation2 + $0xd0] sm:$0xff] }
 0x35a   : > { %3278 = vst.msk [vmem:[#allocation2 + $0x1e4] sm:$0xf] %vm1344_vm5, %v3135_v52  ;;  %v4690_v43 = vpop.f32.mrf.mxu1 }
 0x35b   : > { %v4982_v40 = vmax.f32 %v4914_v24, 0.0  ;;  %v3137_v46 = vpop.permute.xlu1 %3136  ;;  %v3976_v8 = vld [vmem:[#allocation2 + $0xd8] sm:$0xff] }
 0x35c   : > { %v6090_v35 = vld [vmem:[#allocation2 + $0xd4] ss:$8 sps:$4 sm:$0xff]   ;;  %3279 = vst.msk [vmem:[#allocation2 + $0x1ec] sm:$0xf] %vm1344_vm5, %v3137_v46  ;;  %v4692_v32 = vpop.f32.mrf.mxu1  ;;  %v5888_v56 = vcombine.low %v3975_v54, %v3976_v8 }
 0x35d   : > { %5050 = vst [vmem:[#allocation3 + $0x150] sm:$0xff] %v4982_v40  ;;  %v2662_v5 = vpop.permute.xlu0 %2661  ;;  %4621 = vmatprep.mubr.bf16.mxu0 %v6090_v35 }
 0x35e   : > { %2837 = vst.msk [vmem:[#allocation2 + $0xe4] sm:$0xf] %vm934_vm4, %v2662_v5  ;;  %v4559_v51 = vpop.f32.mrf.mxu0  ;;  %4622 = vmatmul.mubr.bf16.gmra.mxu0 %v5888_v56 }
 0x35f   : > { %v2664_v39 = vpop.permute.xlu1 %2663  ;;  %v4807_v31 = vmul.f32 %v8290_v58, %v4559_v51  ;;  %v8631_v58 = vld [vmem:[%s8781_s3] ss:$0 sm:$0xff] }
 0x360   : > { %2838 = vst.msk [vmem:[#allocation2 + $0xec] sm:$0xf] %vm934_vm4, %v2664_v39  ;;  %v4561_v27 = vpop.f32.mrf.mxu0 }
 0x361   : > { %v4882_v47 = vadd.f32 %v8296_v55, %v4807_v31  ;;  %v3798_v59 = vpop.permute.xlu0 %3797 }
 0x362   : > { %3941 = vst.msk [vmem:[#allocation2 + $0x1e4] sm:$0xf] %vm2008_vm6, %v3798_v59  ;;  %v4562_v60 = vpop.f32.mrf.mxu0 }
 0x363   : > { %v4950_v36 = vmax.f32 %v4882_v47, 0.0  ;;  %v3800_v12 = vpop.permute.xlu1 %3799 }
 0x364   : > { %3942 = vst.msk [vmem:[#allocation2 + $0x1ec] sm:$0xf] %vm2008_vm6, %v3800_v12  ;;  %v4564_v37 = vpop.f32.mrf.mxu0 }
 0x365   : > { %5018 = vst [vmem:[#allocation3 + $0x50] sm:$0xff] %v4950_v36  ;;  %v3071_v55 = vpop.permute.xlu0 %3070 }
 0x366   : > { %3246 = vst.msk [vmem:[#allocation2 + $0xe4] sm:$0xf] %vm1344_vm5, %v3071_v55 }
 0x367   : > { %v3073_v62 = vpop.permute.xlu1 %3072 }
 0x368   : > { %3247 = vst.msk [vmem:[#allocation2 + $0xec] sm:$0xf] %vm1344_vm5, %v3073_v62 }
 0x369   : > { %v3734_v4 = vpop.permute.xlu0 %3733  ;;  %v4009_v2 = vld [vmem:[#allocation2 + $0x1e0] sm:$0xff] }
 0x36a   : > { %3909 = vst.msk [vmem:[#allocation2 + $0xe4] sm:$0xf] %vm2008_vm6, %v3734_v4 }
 0x36b   : > { %v3736_v26 = vpop.permute.xlu1 %3735  ;;  %v4010_v0 = vld [vmem:[#allocation2 + $0x1e8] sm:$0xff] }
 0x36c   : > { %v6092_v49 = vld [vmem:[#allocation2 + $0x1e4] ss:$8 sps:$4 sm:$0xff]   ;;  %3910 = vst.msk [vmem:[#allocation2 + $0xec] sm:$0xf] %vm2008_vm6, %v3736_v26  ;;  %v5922_v53 = vcombine.low %v4009_v2, %v4010_v0 }
 0x36d   : > { %v2730_v7 = vpop.permute.xlu0 %2729  ;;  %4757 = vmatprep.mubr.bf16.mxu1 %v6092_v49 }
 0x36e   : > { %2871 = vst.msk [vmem:[#allocation2 + $0x1f4] sm:$0xf] %vm934_vm4, %v2730_v7  ;;  %v4695_v63 = vpop.f32.mrf.mxu1  ;;  %4758 = vmatmul.mubr.bf16.gmra.mxu1 %v5922_v53 }
 0x36f   : > { %v2732_v3 = vpop.permute.xlu1 %2731  ;;  %v4841_v17 = vmul.f32 %v8625_v61, %v4695_v63 }
 0x370   : > { %2872 = vst.msk [vmem:[#allocation2 + $0x1fc] sm:$0xf] %vm934_vm4, %v2732_v3  ;;  %v4697_v20 = vpop.f32.mrf.mxu1 }
 0x371   : > { %v4916_v57 = vadd.f32 %v8631_v58, %v4841_v17  ;;  %v3139_v1 = vpop.permute.xlu0 %3138  ;;  %v3977_v28 = vld [vmem:[#allocation2 + $0xe0] sm:$0xff] }
 0x372   : > { %3280 = vst.msk [vmem:[#allocation2 + $0x1f4] sm:$0xf] %vm1344_vm5, %v3139_v1  ;;  %v4698_v22 = vpop.f32.mrf.mxu1 }
 0x373   : > { %v4984_v23 = vmax.f32 %v4916_v57, 0.0  ;;  %v3141_v18 = vpop.permute.xlu1 %3140  ;;  %v4842_v6 = vmul.f32 %v8625_v61, %v4698_v22  ;;  %v3978_v50 = vld [vmem:[#allocation2 + $0xe8] sm:$0xff] }
 0x374   : > { %v6094_v38 = vld [vmem:[#allocation2 + $0xe4] ss:$8 sps:$4 sm:$0xff]   ;;  %3281 = vst.msk [vmem:[#allocation2 + $0x1fc] sm:$0xf] %vm1344_vm5, %v3141_v18  ;;  %v4700_v15 = vpop.f32.mrf.mxu1  ;;  %v5890_v10 = vcombine.low %v3977_v28, %v3978_v50 }
 0x375   : > { %5052 = vst [vmem:[#allocation3 + $0x160] sm:$0xff] %v4984_v23  ;;  %v4917_v42 = vadd.f32 %v8631_v58, %v4842_v6  ;;  %v1929_v19 = vpop.permute.xlu0 %1928  ;;  %4629 = vmatprep.mubr.bf16.mxu0 %v6094_v38 }
 0x376   : > { %5087 = vst [vmem:[#allocation3 + $0x160] sm:$0x1] %v8455_v48  ;;  %2071 = vst.msk [vmem:[#allocation2 + $0x1f0] sm:$0xf] %vm2008_vm6, %v1929_v19  ;;  %v4567_v11 = vpop.f32.mrf.mxu0  ;;  %4630 = vmatmul.mubr.bf16.gmra.mxu0 %v5890_v10 }
 0x377   : > { %v4985_v29 = vmax.f32 %v4917_v42, 0.0  ;;  %v1931_v21 = vpop.permute.xlu1 %1930  ;;  %v4809_v13 = vmul.f32 %v8625_v61, %v4567_v11 }
 0x378   : > { %2072 = vst.msk [vmem:[#allocation2 + $0x1f8] sm:$0xf] %vm2008_vm6, %v1931_v21  ;;  %v4569_v9 = vpop.f32.mrf.mxu0 }
 0x379   : > { %5053 = vst [vmem:[#allocation3 + $0x168] sm:$0xff] %v4985_v29  ;;  %v4884_v33 = vadd.f32 %v8631_v58, %v4809_v13  ;;  %v2666_v34 = vpop.permute.xlu0 %2665 }
 0x37a   : > { %2839 = vst.msk [vmem:[#allocation2 + $0xf4] sm:$0xf] %vm934_vm4, %v2666_v34  ;;  %v4570_v14 = vpop.f32.mrf.mxu0 }
 0x37b   : > { %v4952_v16 = vmax.f32 %v4884_v33, 0.0  ;;  %v2668_v25 = vpop.permute.xlu1 %2667  ;;  %v4810_v30 = vmul.f32 %v8625_v61, %v4570_v14 }
 0x37c   : > { %2840 = vst.msk [vmem:[#allocation2 + $0xfc] sm:$0xf] %vm934_vm4, %v2668_v25  ;;  %v4572_v44 = vpop.f32.mrf.mxu0 }
 0x37d   : > { %5020 = vst [vmem:[#allocation3 + $0x60] sm:$0xff] %v4952_v16  ;;  %v4885_v45 = vadd.f32 %v8631_v58, %v4810_v30  ;;  %v3802_v41 = vpop.permute.xlu0 %3801 }
 0x37e   : > { %5079 = vst [vmem:[#allocation3 + $0x60] sm:$0x1] %v8455_v48  ;;  %3943 = vst.msk [vmem:[#allocation2 + $0x1f4] sm:$0xf] %vm2008_vm6, %v3802_v41 }
 0x37f   : > { %v4953_v24 = vmax.f32 %v4885_v45, 0.0  ;;  %v3804_v52 = vpop.permute.xlu1 %3803 }
 0x380   : > { %3944 = vst.msk [vmem:[#allocation2 + $0x1fc] sm:$0xf] %vm2008_vm6, %v3804_v52 }
 0x381   : > { %5021 = vst [vmem:[#allocation3 + $0x68] sm:$0xff] %v4953_v24  ;;  %v3075_v43 = vpop.permute.xlu0 %3074 }
 0x382   : > { %3248 = vst.msk [vmem:[#allocation2 + $0xf4] sm:$0xf] %vm1344_vm5, %v3075_v43 }
 0x383   : > { %v3077_v40 = vpop.permute.xlu1 %3076 }
 0x384   : > { %3249 = vst.msk [vmem:[#allocation2 + $0xfc] sm:$0xf] %vm1344_vm5, %v3077_v40 }
 0x385   : > { %v3738_v46 = vpop.permute.xlu0 %3737  ;;  %v4011_v32 = vld [vmem:[#allocation2 + $0x1f0] sm:$0xff] }
 0x386   : > { %3911 = vst.msk [vmem:[#allocation2 + $0xf4] sm:$0xf] %vm2008_vm6, %v3738_v46  ;;  %v4703_v54 = vpop.f32.mrf.mxu1 }
 0x387   : > { %v3740_v8 = vpop.permute.xlu1 %3739  ;;  %v4843_v35 = vmul.f32 %v8625_v61, %v4703_v54  ;;  %v4012_v56 = vld [vmem:[#allocation2 + $0x1f8] sm:$0xff] }
 0x388   : > { %v6096_v5 = vld [vmem:[#allocation2 + $0x1f4] ss:$8 sps:$4 sm:$0xff]   ;;  %3912 = vst.msk [vmem:[#allocation2 + $0xfc] sm:$0xf] %vm2008_vm6, %v3740_v8  ;;  %v4705_v51 = vpop.f32.mrf.mxu1  ;;  %v5924_v39 = vcombine.low %v4011_v32, %v4012_v56 }
 0x389   : > { %v4918_v31 = vadd.f32 %v8631_v58, %v4843_v35  ;;  %v2734_v27 = vpop.permute.xlu0 %2733  ;;  %4765 = vmatprep.mubr.bf16.mxu1 %v6096_v5 }
 0x38a   : > { %2873 = vst.msk [vmem:[#allocation2 + $0x204] sm:$0xf] %vm934_vm4, %v2734_v27  ;;  %v4706_v47 = vpop.f32.mrf.mxu1  ;;  %4766 = vmatmul.mubr.bf16.gmra.mxu1 %v5924_v39 }
 0x38b   : > { %v4986_v59 = vmax.f32 %v4918_v31, 0.0  ;;  %v2736_v60 = vpop.permute.xlu1 %2735 }
 0x38c   : > { %2874 = vst.msk [vmem:[#allocation2 + $0x20c] sm:$0xf] %vm934_vm4, %v2736_v60  ;;  %v4708_v36 = vpop.f32.mrf.mxu1 }
 0x38d   : > { %5054 = vst [vmem:[#allocation3 + $0x170] sm:$0xff] %v4986_v59  ;;  %v3143_v12 = vpop.permute.xlu0 %3142  ;;  %v3979_v4 = vld [vmem:[#allocation2 + $0xf0] sm:$0xff] }
 0x38e   : > { %3282 = vst.msk [vmem:[#allocation2 + $0x204] sm:$0xf] %vm1344_vm5, %v3143_v12  ;;  %v4575_v37 = vpop.f32.mrf.mxu0 }
 0x38f   : > { %v3145_v55 = vpop.permute.xlu1 %3144  ;;  %v4811_v62 = vmul.f32 %v8625_v61, %v4575_v37  ;;  %v3980_v26 = vld [vmem:[#allocation2 + $0xf8] sm:$0xff] }
 0x390   : > { %v6098_v2 = vld [vmem:[#allocation2 + $0xf4] ss:$8 sps:$4 sm:$0xff]   ;;  %3283 = vst.msk [vmem:[#allocation2 + $0x20c] sm:$0xf] %vm1344_vm5, %v3145_v55  ;;  %v4577_v0 = vpop.f32.mrf.mxu0  ;;  %v5892_v49 = vcombine.low %v3979_v4, %v3980_v26 }
 0x391   : > { %v4886_v53 = vadd.f32 %v8631_v58, %v4811_v62  ;;  %v1933_v7 = vpop.permute.xlu0 %1932  ;;  %4637 = vmatprep.mubr.bf16.mxu0 %v6098_v2 }
 0x392   : > { %2073 = vst.msk [vmem:[#allocation2 + $0x200] sm:$0xf] %vm2008_vm6, %v1933_v7  ;;  %v4578_v63 = vpop.f32.mrf.mxu0  ;;  %4638 = vmatmul.mubr.bf16.gmra.mxu0 %v5892_v49 }
 0x393   : > { %v4954_v3 = vmax.f32 %v4886_v53, 0.0  ;;  %v1935_v17 = vpop.permute.xlu1 %1934  ;;  %v5097_v63 = vld [vmem:[#allocation3] ss:$2 sm:$0xff] }
 0x394   : > { %2074 = vst.msk [vmem:[#allocation2 + $0x208] sm:$0xf] %vm2008_vm6, %v1935_v17  ;;  %v4580_v20 = vpop.f32.mrf.mxu0  ;;  %v5131_v17 = vld [vmem:[#allocation3 + $0x1] ss:$2 sm:$0xff] }
 0x395   : > { %5022 = vst [vmem:[#allocation3 + $0x70] sm:$0xff] %v4954_v3  ;;  %v2670_v57 = vpop.permute.xlu0 %2669  ;;  %v5101_v20 = vld [vmem:[#allocation3 + $0x40] ss:$2 sm:$0xff] }
 0x396   : > { %2841 = vst.msk [vmem:[#allocation2 + $0x104] sm:$0xf] %vm934_vm4, %v2670_v57  ;;  %v5135_v57 = vld [vmem:[#allocation3 + $0x41] ss:$2 sm:$0xff] }
 0x397   : > { %v2672_v1 = vpop.permute.xlu1 %2671 }
 0x398   : > { %2842 = vst.msk [vmem:[#allocation2 + $0x10c] sm:$0xf] %vm934_vm4, %v2672_v1 }
 0x399   : > { %v3806_v22 = vpop.permute.xlu0 %3805 }
 0x39a   : > { %3945 = vst.msk [vmem:[#allocation2 + $0x204] sm:$0xf] %vm2008_vm6, %v3806_v22  ;;  %v5099_v22 = vld [vmem:[#allocation3 + $0x20] ss:$2 sm:$0xff] }
 0x39b   : > { %v3808_v23 = vpop.permute.xlu1 %3807 }
 0x39c   : > { %3946 = vst.msk [vmem:[#allocation2 + $0x20c] sm:$0xf] %vm2008_vm6, %v3808_v23  ;;  %v5133_v23 = vld [vmem:[#allocation3 + $0x21] ss:$2 sm:$0xff] }
 0x39d   : > { %v3079_v18 = vpop.permute.xlu0 %3078 }
 0x39e   : > { %3250 = vst.msk [vmem:[#allocation2 + $0x104] sm:$0xf] %vm1344_vm5, %v3079_v18  ;;  %v4711_v6 = vpop.f32.mrf.mxu1  ;;  %v5186_v18 = vld [vmem:[#allocation3 + $0x42] ss:$2 sm:$0xff] }
 0x39f   : > { %v3081_v28 = vpop.permute.xlu1 %3080  ;;  %v4845_v50 = vmul.f32 %v8625_v61, %v4711_v6  ;;  %v5103_v6 = vld [vmem:[#allocation3 + $0x60] ss:$2 sm:$0xff] }
 0x3a0   : > { %3251 = vst.msk [vmem:[#allocation2 + $0x10c] sm:$0xf] %vm1344_vm5, %v3081_v28  ;;  %v4713_v38 = vpop.f32.mrf.mxu1  ;;  %v5137_v28 = vld [vmem:[#allocation3 + $0x61] ss:$2 sm:$0xff] }
 0x3a1   : > { %v4920_v15 = vadd.f32 %v8631_v58, %v4845_v50  ;;  %v3742_v10 = vpop.permute.xlu0 %3741  ;;  %v4013_v21 = vld [vmem:[#allocation2 + $0x200] sm:$0xff]  ;;  %v5164_v50 = vmax.f32 %v5097_v63, %v5131_v17 }
 0x3a2   : > { %3913 = vst.msk [vmem:[#allocation2 + $0x104] sm:$0xf] %vm2008_vm6, %v3742_v10  ;;  %v4714_v42 = vpop.f32.mrf.mxu1  ;;  %v5182_v38 = vld [vmem:[#allocation3 + $0x2] ss:$2 sm:$0xff]  ;;  %v5166_v10 = vmax.f32 %v5101_v20, %v5135_v57 }
 0x3a3   : > { %v4988_v19 = vmax.f32 %v4920_v15, 0.0  ;;  %v3744_v11 = vpop.permute.xlu1 %3743  ;;  %v4846_v29 = vmul.f32 %v8625_v61, %v4714_v42  ;;  %v4014_v13 = vld [vmem:[#allocation2 + $0x208] sm:$0xff] }
 0x3a4   : > { %v6100_v9 = vld [vmem:[#allocation2 + $0x204] ss:$8 sps:$4 sm:$0xff]   ;;  %3914 = vst.msk [vmem:[#allocation2 + $0x10c] sm:$0xf] %vm2008_vm6, %v3744_v11  ;;  %v4716_v33 = vpop.f32.mrf.mxu1  ;;  %v5926_v34 = vcombine.low %v4013_v21, %v4014_v13  ;;  %v5217_v21 = vmax.f32 %v5166_v10, %v5186_v18  ;;  %v5167_v13 = vmax.f32 %v5103_v6, %v5137_v28 }
 0x3a5   : > { %5056 = vst [vmem:[#allocation3 + $0x180] sm:$0xff] %v4988_v19  ;;  %v4921_v14 = vadd.f32 %v8631_v58, %v4846_v29  ;;  %v2738_v16 = vpop.permute.xlu0 %2737  ;;  %4773 = vmatprep.mubr.bf16.mxu1 %v6100_v9  ;;  %v5184_v15 = vld [vmem:[#allocation3 + $0x22] ss:$2 sm:$0xff]  ;;  %v5165_v29 = vmax.f32 %v5099_v22, %v5133_v23  ;;  %v5215_v9 = vmax.f32 %v5164_v50, %v5182_v38 }
 0x3a6   : > { %5088 = vst [vmem:[#allocation3 + $0x180] sm:$0x1] %v8455_v48  ;;  %2875 = vst.msk [vmem:[#allocation2 + $0x214] sm:$0xf] %vm934_vm4, %v2738_v16  ;;  %v4583_v25 = vpop.f32.mrf.mxu0  ;;  %4774 = vmatmul.mubr.bf16.gmra.mxu1 %v5926_v34  ;;  %v5188_v42 = vld [vmem:[#allocation3 + $0x62] ss:$2 sm:$0xff] }
 0x3a7   : > { %v4989_v30 = vmax.f32 %v4921_v14, 0.0  ;;  %v2740_v44 = vpop.permute.xlu1 %2739  ;;  %v4813_v45 = vmul.f32 %v8625_v61, %v4583_v25  ;;  %v5216_v33 = vmax.f32 %v5165_v29, %v5184_v15  ;;  %v5218_v34 = vmax.f32 %v5167_v13, %v5188_v42 }
 0x3a8   : > { %2876 = vst.msk [vmem:[#allocation2 + $0x21c] sm:$0xf] %vm934_vm4, %v2740_v44  ;;  %v4585_v41 = vpop.f32.mrf.mxu0 }
 0x3a9   : > { %5057 = vst [vmem:[#allocation3 + $0x188] sm:$0xff] %v4989_v30  ;;  %v4888_v24 = vadd.f32 %v8631_v58, %v4813_v45  ;;  %v3147_v52 = vpop.permute.xlu0 %3146  ;;  %v3981_v8 = vld [vmem:[#allocation2 + $0x100] sm:$0xff]  ;;  %v5240_v25 = vmax.f32 %v5216_v33, %v5217_v21  ;;  %v5232_v45 = vmax.f32 %v5215_v9, %v5216_v33  ;;  %v5233_v41 = vmax.f32 %v5217_v21, %v5218_v34 }
 0x3aa   : > { %3284 = vst.msk [vmem:[#allocation2 + $0x214] sm:$0xf] %vm1344_vm5, %v3147_v52  ;;  %v4586_v43 = vpop.f32.mrf.mxu0 }
 0x3ab   : > { %v4956_v40 = vmax.f32 %v4888_v24, 0.0  ;;  %v3149_v46 = vpop.permute.xlu1 %3148  ;;  %v4814_v54 = vmul.f32 %v8625_v61, %v4586_v43  ;;  %v3982_v35 = vld [vmem:[#allocation2 + $0x108] sm:$0xff] }
 0x3ac   : > { %v6102_v32 = vld [vmem:[#allocation2 + $0x104] ss:$8 sps:$4 sm:$0xff]   ;;  %3285 = vst.msk [vmem:[#allocation2 + $0x21c] sm:$0xf] %vm1344_vm5, %v3149_v46  ;;  %v4588_v56 = vpop.f32.mrf.mxu0  ;;  %v5894_v5 = vcombine.low %v3981_v8, %v3982_v35 }
 0x3ad   : > { %5024 = vst [vmem:[#allocation3 + $0x80] sm:$0xff] %v4956_v40  ;;  %v4889_v51 = vadd.f32 %v8631_v58, %v4814_v54  ;;  %v1937_v39 = vpop.permute.xlu0 %1936  ;;  %4645 = vmatprep.mubr.bf16.mxu0 %v6102_v32  ;;  %v5248_v40 = vmax.f32 %v5232_v45, %v5240_v25 }
 0x3ae   : > { %5080 = vst [vmem:[#allocation3 + $0x80] sm:$0x1] %v8455_v48  ;;  %2075 = vst.msk [vmem:[#allocation2 + $0x210] sm:$0xf] %vm2008_vm6, %v1937_v39  ;;  %4646 = vmatmul.mubr.bf16.gmra.mxu0 %v5894_v5  ;;  %v8715_v39 = vld [vmem:[#allocation3 + $0x8] sm:$0xff] }
 0x3af   : > { %v4957_v31 = vmax.f32 %v4889_v51, 0.0  ;;  %v1939_v27 = vpop.permute.xlu1 %1938 }
 0x3b0   : > { %2076 = vst.msk [vmem:[#allocation2 + $0x218] sm:$0xf] %vm2008_vm6, %v1939_v27 }
 0x3b1   : > { %5025 = vst [vmem:[#allocation3 + $0x88] sm:$0xff] %v4957_v31  ;;  %v3810_v47 = vpop.permute.xlu0 %3809 }
 0x3b2   : > { %3947 = vst.msk [vmem:[#allocation2 + $0x214] sm:$0xf] %vm2008_vm6, %v3810_v47 }
 0x3b3   : > { %v3812_v59 = vpop.permute.xlu1 %3811 }
 0x3b4   : > { %3948 = vst.msk [vmem:[#allocation2 + $0x21c] sm:$0xf] %vm2008_vm6, %v3812_v59 }
 0x3b6   : > { %v4719_v60 = vpop.f32.mrf.mxu1 }
 0x3b7   : > { %v4847_v36 = vmul.f32 %v8625_v61, %v4719_v60  ;;  %v6106_v4 = vld [vmem:[#allocation2 + $0x210] ss:$8 sps:$4 sm:$0xff]  }
 0x3b8   : > { %v4721_v12 = vpop.f32.mrf.mxu1  ;;  %v5105_v19 = vld [vmem:[#allocation3 + $0x80] ss:$2 sm:$0xff]  ;;  %v5139_v11 = vld [vmem:[#allocation3 + $0x81] ss:$2 sm:$0xff] }
 0x3b9   : > { %v4922_v48 = vadd.f32 %v8631_v58, %v4847_v36  ;;  %v5168_v14 = vmax.f32 %v5105_v19, %v5139_v11 }
 0x3ba   : > { %v4722_v37 = vpop.f32.mrf.mxu1 }
 0x3bb   : > { %v4990_v55 = vmax.f32 %v4922_v48, 0.0  ;;  %v6104_v62 = vld [vmem:[#allocation2 + $0x214] ss:$8 sps:$4 sm:$0xff]  }
 0x3bc   : > { %v4724_v26 = vpop.f32.mrf.mxu1  ;;  %4781 = vmatprep.mubr.bf16.mxu1 %v6104_v62 }
 0x3bd   : > { %5058 = vst [vmem:[#allocation3 + $0x190] sm:$0xff] %v4990_v55  ;;  %4782 = vmatmul.mubr.bf16.gmra.mxu1 %v6106_v4 }
 0x3be   : > { %v4591_v2 = vpop.f32.mrf.mxu0 }
 0x3bf   : > { %v4815_v0 = vmul.f32 %v8625_v61, %v4591_v2 }
 0x3c0   : > { %v4593_v49 = vpop.f32.mrf.mxu0 }
 0x3c1   : > { %v4890_v53 = vadd.f32 %v8631_v58, %v4815_v0 }
 0x3c2   : > { %v4594_v7 = vpop.f32.mrf.mxu0 }
 0x3c3   : > { %v4958_v3 = vmax.f32 %v4890_v53, 0.0 }
 0x3c4   : > { %v4596_v1 = vpop.f32.mrf.mxu0 }
 0x3c5   : > { %5026 = vst [vmem:[#allocation3 + $0x90] sm:$0xff] %v4958_v3 }
 0x3cc   : > { %v5190_v16 = vld [vmem:[#allocation3 + $0x82] ss:$2 sm:$0xff] }
 0x3cd   : > { %v8701_v30 = vmax.f32 %v5168_v14, %v5190_v16 }
 0x3ce   : > { %v4727_v44 = vpop.f32.mrf.mxu1 }
 0x3cf   : > { %v5241_v24 = vmax.f32 %v5218_v34, %v8701_v30  ;;  %v4849_v52 = vmul.f32 %v8625_v61, %v4727_v44 }
 0x3d0   : > { %v4729_v43 = vpop.f32.mrf.mxu1 }
 0x3d1   : > { %v5249_v46 = vmax.f32 %v5233_v41, %v5241_v24  ;;  %v4924_v54 = vadd.f32 %v8631_v58, %v4849_v52 }
 0x3d2   : > { %v4730_v8 = vpop.f32.mrf.mxu1 }
 0x3d3   : > { %v5954_v35 = vpack.c.bf16 %v5249_v46, %v5248_v40  ;;  %v4992_v32 = vmax.f32 %v4924_v54, 0.0  ;;  %v4850_v56 = vmul.f32 %v8625_v61, %v4730_v8 }
 0x3d4   : > { %v4732_v5 = vpop.f32.mrf.mxu1 }
 0x3d5   : > { %5955 = vst [vmem:[%s8710_s19] sm:$0xff] %v5954_v35   ;;  %5060 = vst [vmem:[#allocation3 + $0x1a0] sm:$0xff] %v4992_v32  ;;  %v4925_v51 = vadd.f32 %v8631_v58, %v4850_v56 }
 0x3d6   : > { %5089 = vst [vmem:[#allocation3 + $0x1a0] sm:$0x1] %v8715_v39  ;;  %v4599_v31 = vpop.f32.mrf.mxu0 }
 0x3d7   : > { %v4993_v27 = vmax.f32 %v4925_v51, 0.0  ;;  %v4817_v47 = vmul.f32 %v8625_v61, %v4599_v31 }
 0x3d8   : > { %v4601_v59 = vpop.f32.mrf.mxu0 }
 0x3d9   : > { %5061 = vst [vmem:[#allocation3 + $0x1a8] sm:$0xff] %v4993_v27  ;;  %v4892_v60 = vadd.f32 %v8631_v58, %v4817_v47 }
 0x3da   : > { %v4602_v36 = vpop.f32.mrf.mxu0 }
 0x3db   : > { %v4960_v12 = vmax.f32 %v4892_v60, 0.0  ;;  %v4818_v48 = vmul.f32 %v8625_v61, %v4602_v36 }
 0x3dc   : > { %v4604_v37 = vpop.f32.mrf.mxu0 }
 0x3dd   : > { %5028 = vst [vmem:[#allocation3 + $0xa0] sm:$0xff] %v4960_v12  ;;  %v4893_v55 = vadd.f32 %v8631_v58, %v4818_v48 }
 0x3de   : > { %5081 = vst [vmem:[#allocation3 + $0xa0] sm:$0x1] %v8715_v39 }
 0x3df   : > { %v4961_v62 = vmax.f32 %v4893_v55, 0.0 }
 0x3e1   : > { %5029 = vst [vmem:[#allocation3 + $0xa8] sm:$0xff] %v4961_v62 }
 0x3e6   : > { %v4735_v4 = vpop.f32.mrf.mxu1 }
 0x3e7   : > { %v4851_v26 = vmul.f32 %v8625_v61, %v4735_v4 }
 0x3e8   : > { %v4737_v2 = vpop.f32.mrf.mxu1 }
 0x3e9   : > { %v4926_v0 = vadd.f32 %v8631_v58, %v4851_v26 }
 0x3ea   : > { %v4738_v49 = vpop.f32.mrf.mxu1 }
 0x3eb   : > { %v4994_v53 = vmax.f32 %v4926_v0, 0.0 }
 0x3ec   : > { %v4740_v7 = vpop.f32.mrf.mxu1 }
 0x3ed   : > { %5062 = vst [vmem:[#allocation3 + $0x1b0] sm:$0xff] %v4994_v53 }
 0x3ee   : > { %v4607_v63 = vpop.f32.mrf.mxu0 }
 0x3ef   : > { %v4819_v3 = vmul.f32 %v8625_v61, %v4607_v63 }
 0x3f0   : > { %v4609_v17 = vpop.f32.mrf.mxu0 }
 0x3f1   : > { %v4894_v20 = vadd.f32 %v8631_v58, %v4819_v3 }
 0x3f2   : > { %v4610_v57 = vpop.f32.mrf.mxu0 }
 0x3f3   : > { %v4962_v1 = vmax.f32 %v4894_v20, 0.0 }
 0x3f4   : > { %v4612_v22 = vpop.f32.mrf.mxu0 }
 0x3f5   : > { %5030 = vst [vmem:[#allocation3 + $0xb0] sm:$0xff] %v4962_v1 }
 0x3fe   : > { %v4743_v23 = vpop.f32.mrf.mxu1 }
 0x3ff   : > { %v4853_v18 = vmul.f32 %v8625_v61, %v4743_v23 }
 0x400   : > { %v4745_v6 = vpop.f32.mrf.mxu1 }
 0x401   : > { %v4928_v28 = vadd.f32 %v8631_v58, %v4853_v18 }
 0x402   : > { %v4746_v50 = vpop.f32.mrf.mxu1 }
 0x403   : > { %v4996_v38 = vmax.f32 %v4928_v28, 0.0  ;;  %v4854_v15 = vmul.f32 %v8625_v61, %v4746_v50 }
 0x404   : > { %v4748_v10 = vpop.f32.mrf.mxu1 }
 0x405   : > { %5064 = vst [vmem:[#allocation3 + $0x1c0] sm:$0xff] %v4996_v38  ;;  %v4929_v42 = vadd.f32 %v8631_v58, %v4854_v15 }
 0x406   : > { %5090 = vst [vmem:[#allocation3 + $0x1c0] sm:$0x1] %v8715_v39  ;;  %v4615_v19 = vpop.f32.mrf.mxu0 }
 0x407   : > { %v4997_v11 = vmax.f32 %v4929_v42, 0.0  ;;  %v4821_v29 = vmul.f32 %v8625_v61, %v4615_v19 }
 0x408   : > { %v4617_v21 = vpop.f32.mrf.mxu0 }
 0x409   : > { %5065 = vst [vmem:[#allocation3 + $0x1c8] sm:$0xff] %v4997_v11  ;;  %v4896_v13 = vadd.f32 %v8631_v58, %v4821_v29 }
 0x40a   : > { %v4618_v9 = vpop.f32.mrf.mxu0 }
 0x40b   : > { %v4964_v33 = vmax.f32 %v4896_v13, 0.0  ;;  %v4822_v34 = vmul.f32 %v8625_v61, %v4618_v9 }
 0x40c   : > { %v4620_v14 = vpop.f32.mrf.mxu0 }
 0x40d   : > { %5032 = vst [vmem:[#allocation3 + $0xc0] sm:$0xff] %v4964_v33  ;;  %v4897_v16 = vadd.f32 %v8631_v58, %v4822_v34 }
 0x40e   : > { %5082 = vst [vmem:[#allocation3 + $0xc0] sm:$0x1] %v8715_v39 }
 0x40f   : > { %v4965_v25 = vmax.f32 %v4897_v16, 0.0 }
 0x411   : > { %5033 = vst [vmem:[#allocation3 + $0xc8] sm:$0xff] %v4965_v25 }
 0x416   : > { %v4751_v44 = vpop.f32.mrf.mxu1 }
 0x417   : > { %v4855_v45 = vmul.f32 %v8625_v61, %v4751_v44 }
 0x418   : > { %v4753_v41 = vpop.f32.mrf.mxu1 }
 0x419   : > { %v4930_v24 = vadd.f32 %v8631_v58, %v4855_v45 }
 0x41a   : > { %v4754_v52 = vpop.f32.mrf.mxu1 }
 0x41b   : > { %v4998_v43 = vmax.f32 %v4930_v24, 0.0 }
 0x41c   : > { %v4756_v40 = vpop.f32.mrf.mxu1 }
 0x41d   : > { %5066 = vst [vmem:[#allocation3 + $0x1d0] sm:$0xff] %v4998_v43 }
 0x41e   : > { %v4623_v46 = vpop.f32.mrf.mxu0 }
 0x41f   : > { %v4823_v54 = vmul.f32 %v8625_v61, %v4623_v46 }
 0x420   : > { %v4625_v8 = vpop.f32.mrf.mxu0 }
 0x421   : > { %v4898_v35 = vadd.f32 %v8631_v58, %v4823_v54  ;;  %v5117_v54 = vld [vmem:[#allocation3 + $0x140] ss:$2 sm:$0xff]  ;;  %v5151_v8 = vld [vmem:[#allocation3 + $0x141] ss:$2 sm:$0xff] }
 0x422   : > { %v4626_v32 = vpop.f32.mrf.mxu0 }
 0x423   : > { %v4966_v56 = vmax.f32 %v4898_v35, 0.0  ;;  %v5119_v35 = vld [vmem:[#allocation3 + $0x160] ss:$2 sm:$0xff] }
 0x424   : > { %v4628_v5 = vpop.f32.mrf.mxu0  ;;  %v5121_v32 = vld [vmem:[#allocation3 + $0x180] ss:$2 sm:$0xff] }
 0x425   : > { %5034 = vst [vmem:[#allocation3 + $0xd0] sm:$0xff] %v4966_v56  ;;  %v5155_v56 = vld [vmem:[#allocation3 + $0x181] ss:$2 sm:$0xff] }
 0x426   : > { %v5153_v5 = vld [vmem:[#allocation3 + $0x161] ss:$2 sm:$0xff] }
 0x42e   : > { %v4759_v51 = vpop.f32.mrf.mxu1 }
 0x42f   : > { %v4857_v31 = vmul.f32 %v8625_v61, %v4759_v51  ;;  %v5109_v51 = vld [vmem:[#allocation3 + $0xc0] ss:$2 sm:$0xff] }
 0x430   : > { %v4761_v27 = vpop.f32.mrf.mxu1 }
 0x431   : > { %v4932_v47 = vadd.f32 %v8631_v58, %v4857_v31  ;;  %v5143_v31 = vld [vmem:[#allocation3 + $0xc1] ss:$2 sm:$0xff]  ;;  %v5115_v27 = vld [vmem:[#allocation3 + $0x120] ss:$2 sm:$0xff] }
 0x432   : > { %v4762_v59 = vpop.f32.mrf.mxu1 }
 0x433   : > { %v5000_v60 = vmax.f32 %v4932_v47, 0.0  ;;  %v4858_v36 = vmul.f32 %v8625_v61, %v4762_v59  ;;  %v5149_v47 = vld [vmem:[#allocation3 + $0x121] ss:$2 sm:$0xff]  ;;  %v5206_v59 = vld [vmem:[#allocation3 + $0x182] ss:$2 sm:$0xff] }
 0x434   : > { %v4764_v12 = vpop.f32.mrf.mxu1 }
 0x435   : > { %5068 = vst [vmem:[#allocation3 + $0x1e0] sm:$0xff] %v5000_v60  ;;  %v4933_v48 = vadd.f32 %v8631_v58, %v4858_v36  ;;  %v5107_v60 = vld [vmem:[#allocation3 + $0xa0] ss:$2 sm:$0xff]  ;;  %v5141_v36 = vld [vmem:[#allocation3 + $0xa1] ss:$2 sm:$0xff]  ;;  %v5176_v12 = vmax.f32 %v5121_v32, %v5155_v56 }
 0x436   : > { %5091 = vst [vmem:[#allocation3 + $0x1e0] sm:$0x1] %v8715_v39  ;;  %v4631_v37 = vpop.f32.mrf.mxu0 }
 0x437   : > { %v5001_v55 = vmax.f32 %v4933_v48, 0.0  ;;  %v4825_v62 = vmul.f32 %v8625_v61, %v4631_v37  ;;  %v5194_v48 = vld [vmem:[#allocation3 + $0xc2] ss:$2 sm:$0xff] }
 0x438   : > { %v4633_v4 = vpop.f32.mrf.mxu0 }
 0x439   : > { %5069 = vst [vmem:[#allocation3 + $0x1e8] sm:$0xff] %v5001_v55  ;;  %v4900_v26 = vadd.f32 %v8631_v58, %v4825_v62  ;;  %v5204_v62 = vld [vmem:[#allocation3 + $0x162] ss:$2 sm:$0xff] }
 0x43a   : > { %v4634_v2 = vpop.f32.mrf.mxu0  ;;  %v5192_v4 = vld [vmem:[#allocation3 + $0xa2] ss:$2 sm:$0xff] }
 0x43b   : > { %v4968_v0 = vmax.f32 %v4900_v26, 0.0  ;;  %v4826_v49 = vmul.f32 %v8625_v61, %v4634_v2  ;;  %v5170_v26 = vmax.f32 %v5109_v51, %v5143_v31  ;;  %v5174_v2 = vmax.f32 %v5117_v54, %v5151_v8  ;;  %v5208_v8 = vld [vmem:[#allocation3 + $0x1a2] ss:$2 sm:$0xff] }
 0x43c   : > { %v4636_v53 = vpop.f32.mrf.mxu0 }
 0x43d   : > { %5036 = vst [vmem:[#allocation3 + $0xe0] sm:$0xff] %v4968_v0  ;;  %v4901_v7 = vadd.f32 %v8631_v58, %v4826_v49  ;;  %v5175_v0 = vmax.f32 %v5119_v35, %v5153_v5  ;;  %v8765_v49 = vmax.f32 %v5176_v12, %v5206_v59  ;;  %v5169_v53 = vmax.f32 %v5107_v60, %v5141_v36 }
 0x43e   : > { %5083 = vst [vmem:[#allocation3 + $0xe0] sm:$0x1] %v8715_v39 }
 0x43f   : > { %v4969_v63 = vmax.f32 %v4901_v7, 0.0 }
 0x440   : > { %v5161_v54 = vld [vmem:[#allocation3 + $0x1e1] ss:$2 sm:$0xff] }
 0x441   : > { %5037 = vst [vmem:[#allocation3 + $0xe8] sm:$0xff] %v4969_v63 }
 0x448   : > { %v5111_v37 = vld [vmem:[#allocation3 + $0xe0] ss:$2 sm:$0xff]  ;;  %v5145_v55 = vld [vmem:[#allocation3 + $0xe1] ss:$2 sm:$0xff] }
 0x44a   : > { %v4767_v3 = vpop.f32.mrf.mxu1 }
 0x44b   : > { %v4859_v17 = vmul.f32 %v8625_v61, %v4767_v3  ;;  %v5200_v3 = vld [vmem:[#allocation3 + $0x122] ss:$2 sm:$0xff] }
 0x44c   : > { %v4769_v20 = vpop.f32.mrf.mxu1 }
 0x44d   : > { %v4934_v57 = vadd.f32 %v8631_v58, %v4859_v17  ;;  %v5221_v17 = vmax.f32 %v5170_v26, %v5194_v48  ;;  %v5171_v20 = vmax.f32 %v5111_v37, %v5145_v55 }
 0x44e   : > { %v4770_v1 = vpop.f32.mrf.mxu1 }
 0x44f   : > { %v5002_v22 = vmax.f32 %v4934_v57, 0.0  ;;  %v5173_v1 = vmax.f32 %v5115_v27, %v5149_v47 }
 0x450   : > { %v4772_v23 = vpop.f32.mrf.mxu1 }
 0x451   : > { %5070 = vst [vmem:[#allocation3 + $0x1f0] sm:$0xff] %v5002_v22  ;;  %v5226_v23 = vmax.f32 %v5175_v0, %v5204_v62 }
 0x452   : > { %v4639_v18 = vpop.f32.mrf.mxu0 }
 0x453   : > { %v4827_v6 = vmul.f32 %v8625_v61, %v4639_v18  ;;  %v5220_v18 = vmax.f32 %v5169_v53, %v5192_v4 }
 0x454   : > { %v4641_v28 = vpop.f32.mrf.mxu0 }
 0x455   : > { %v4902_v50 = vadd.f32 %v8631_v58, %v4827_v6 }
 0x456   : > { %v4642_v38 = vpop.f32.mrf.mxu0 }
 0x457   : > { %v4970_v15 = vmax.f32 %v4902_v50, 0.0 }
 0x458   : > { %v4644_v10 = vpop.f32.mrf.mxu0 }
 0x459   : > { %5038 = vst [vmem:[#allocation3 + $0xf0] sm:$0xff] %v4970_v15 }
 0x460   : > { %v5196_v7 = vld [vmem:[#allocation3 + $0xe2] ss:$2 sm:$0xff] }
 0x461   : > { %v5222_v38 = vmax.f32 %v5171_v20, %v5196_v7 }
 0x466   : > { %v4775_v42 = vpop.f32.mrf.mxu1 }
 0x467   : > { %v4861_v19 = vmul.f32 %v8625_v61, %v4775_v42  ;;  %v5224_v42 = vmax.f32 %v5173_v1, %v5200_v3 }
 0x468   : > { %v4777_v11 = vpop.f32.mrf.mxu1 }
 0x469   : > { %v4936_v29 = vadd.f32 %v8631_v58, %v4861_v19  ;;  %v5245_v19 = vmax.f32 %v5226_v23, %v8765_v49 }
 0x46a   : > { %v4778_v21 = vpop.f32.mrf.mxu1 }
 0x46b   : > { %v5004_v13 = vmax.f32 %v4936_v29, 0.0  ;;  %v4862_v9 = vmul.f32 %v8625_v61, %v4778_v21  ;;  %v5125_v21 = vld [vmem:[#allocation3 + $0x1c0] ss:$2 sm:$0xff] }
 0x46c   : > { %v4780_v33 = vpop.f32.mrf.mxu1 }
 0x46d   : > { %5072 = vst [vmem:[#allocation3 + $0x200] sm:$0xff] %v5004_v13  ;;  %v4937_v34 = vadd.f32 %v8631_v58, %v4862_v9  ;;  %v5159_v13 = vld [vmem:[#allocation3 + $0x1c1] ss:$2 sm:$0xff]  ;;  %v5242_v9 = vmax.f32 %v5220_v18, %v5221_v17 }
 0x46e   : > { %5092 = vst [vmem:[#allocation3 + $0x200] sm:$0x1] %v8715_v39  ;;  %v4647_v14 = vpop.f32.mrf.mxu0 }
 0x46f   : > { %v5005_v16 = vmax.f32 %v4937_v34, 0.0  ;;  %v4829_v25 = vmul.f32 %v8625_v61, %v4647_v14 }
 0x470   : > { %v4649_v44 = vpop.f32.mrf.mxu0 }
 0x471   : > { %5073 = vst [vmem:[#allocation3 + $0x208] sm:$0xff] %v5005_v16  ;;  %v4904_v45 = vadd.f32 %v8631_v58, %v4829_v25  ;;  %v5234_v16 = vmax.f32 %v8701_v30, %v5220_v18  ;;  %v5123_v44 = vld [vmem:[#allocation3 + $0x1a0] ss:$2 sm:$0xff] }
 0x472   : > { %v4650_v41 = vpop.f32.mrf.mxu0  ;;  %v5212_v30 = vld [vmem:[#allocation3 + $0x1e2] ss:$2 sm:$0xff] }
 0x473   : > { %v4972_v24 = vmax.f32 %v4904_v45, 0.0  ;;  %v4830_v52 = vmul.f32 %v8625_v61, %v4650_v41  ;;  %v5157_v45 = vld [vmem:[#allocation3 + $0x1a1] ss:$2 sm:$0xff]  ;;  %v5235_v41 = vmax.f32 %v5221_v17, %v5222_v38  ;;  %v5250_v35 = vmax.f32 %v5234_v16, %v5242_v9 }
 0x474   : > { %v4652_v43 = vpop.f32.mrf.mxu0  ;;  %v5177_v5 = vmax.f32 %v5123_v44, %v5157_v45 }
 0x475   : > { %5040 = vst [vmem:[#allocation3 + $0x100] sm:$0xff] %v4972_v24  ;;  %v4905_v40 = vadd.f32 %v8631_v58, %v4830_v52  ;;  %v5178_v43 = vmax.f32 %v5125_v21, %v5159_v13 }
 0x476   : > { %5084 = vst [vmem:[#allocation3 + $0x100] sm:$0x1] %v8715_v39  ;;  %v5202_v39 = vld [vmem:[#allocation3 + $0x142] ss:$2 sm:$0xff]  ;;  %v5228_v36 = vmax.f32 %v5177_v5, %v5208_v8 }
 0x477   : > { %v4973_v46 = vmax.f32 %v4905_v40, 0.0  ;;  %v5225_v22 = vmax.f32 %v5174_v2, %v5202_v39  ;;  %v5210_v40 = vld [vmem:[#allocation3 + $0x1c2] ss:$2 sm:$0xff] }
 0x478   : > { %v5129_v51 = vld [vmem:[#allocation3 + $0x200] ss:$2 sm:$0xff]  ;;  %v5163_v31 = vld [vmem:[#allocation3 + $0x201] ss:$2 sm:$0xff]  ;;  %v5229_v27 = vmax.f32 %v5178_v43, %v5210_v40  ;;  %v5238_v62 = vmax.f32 %v8765_v49, %v5228_v36 }
 0x479   : > { %5041 = vst [vmem:[#allocation3 + $0x108] sm:$0xff] %v4973_v46  ;;  %v5244_v34 = vmax.f32 %v5224_v42, %v5225_v22  ;;  %v5237_v14 = vmax.f32 %v5225_v22, %v5226_v23  ;;  %v5127_v46 = vld [vmem:[#allocation3 + $0x1e0] ss:$2 sm:$0xff]  ;;  %v5180_v48 = vmax.f32 %v5129_v51, %v5163_v31 }
 0x47a   : > { %v5179_v47 = vmax.f32 %v5127_v46, %v5161_v54  ;;  %v5246_v55 = vmax.f32 %v5228_v36, %v5229_v27 }
 0x47b   : > { %v5253_v52 = vmax.f32 %v5237_v14, %v5245_v19 }
 0x47c   : > { %v5230_v12 = vmax.f32 %v5179_v47, %v5212_v30  ;;  %v5254_v2 = vmax.f32 %v5238_v62, %v5246_v55 }
 0x47d   : > { %v4783_v63 = vpop.f32.mrf.mxu1 }
 0x47e   : > { %v4863_v57 = vmul.f32 %v8625_v61, %v4783_v63  ;;  %v5239_v4 = vmax.f32 %v5229_v27, %v5230_v12 }
 0x47f   : > { %v4785_v50 = vpop.f32.mrf.mxu1 }
 0x480   : > { %v5113_v6 = vld [vmem:[#allocation3 + $0x100] ss:$2 sm:$0xff]  ;;  %v5147_v28 = vld [vmem:[#allocation3 + $0x101] ss:$2 sm:$0xff]  ;;  %v4938_v10 = vadd.f32 %v8631_v58, %v4863_v57 }
 0x481   : > { %v5172_v15 = vmax.f32 %v5113_v6, %v5147_v28  ;;  %v5198_v11 = vld [vmem:[#allocation3 + $0x102] ss:$2 sm:$0xff]  ;;  %v4786_v29 = vpop.f32.mrf.mxu1 }
 0x482   : > { %v5006_v33 = vmax.f32 %v4938_v10, 0.0 }
 0x483   : > { %v5223_v61 = vmax.f32 %v5172_v15, %v5198_v11  ;;  %v4788_v25 = vpop.f32.mrf.mxu1 }
 0x484   : > { %5074 = vst [vmem:[#allocation3 + $0x210] sm:$0xff] %v5006_v33 }
 0x485   : > { %v5236_v24 = vmax.f32 %v5223_v61, %v5224_v42  ;;  %v5243_v58 = vmax.f32 %v5222_v38, %v5223_v61 }
 0x487   : > { %v5251_v32 = vmax.f32 %v5235_v41, %v5243_v58  ;;  %v5252_v56 = vmax.f32 %v5236_v24, %v5244_v34 }
 0x489   : > { %v5959_v59 = vpack.c.bf16 %v5251_v32, %v5250_v35  ;;  %v5964_v60 = vpack.c.bf16 %v5253_v52, %v5252_v56 }
 0x48b   : > { %5971 = vst [vmem:[%s8710_s19 + $0x8] sm:$0xff] %v5959_v59   ;;  %5972 = vst [vmem:[%s8710_s19 + $0x10] sm:$0xff] %v5964_v60   ;;  %v5214_v37 = vld [vmem:[#allocation3 + $0x202] ss:$2 sm:$0xff] }
 0x48c   : > { %v5231_v39 = vmax.f32 %v5180_v48, %v5214_v37 }
 0x48e   : > { %v5247_v26 = vmax.f32 %v5230_v12, %v5231_v39 }
 0x490   : > { %v5255_v0 = vmax.f32 %v5239_v4, %v5247_v26 }
 0x492   : > { %v5969_v53 = vpack.c.bf16 %v5255_v0, %v5254_v2 }
 0x494   : > { %5973 = vst [vmem:[%s8710_s19 + $0x18] sm:$0xff] %v5969_v53  }
 0x495 PF: > { %s14_s15 = sadd.s32 1, %s6117_s15  }
 0x496   : > { %p11_p4 = scmp.ge.s32.totalorder %s14_s15, 4  }
 0x498   :  { %13 = sbr.rel (!%p11_p4) target bundleno = 1 (0x1), region = 119 }

</bundles_post_ra>
